<compile_context>
chip_gen: v7x
topology: tpu7x:2x2x1
jax: 0.10.0
libtpu: 0.0.40
codegen_flags: <defaults>
</compile_context>

<pallas_src>
import functools
import math

import jax
import jax.numpy as jnp
from jax import lax
from jax.experimental import pallas as pl
from jax.experimental.pallas import tpu as pltpu


# ----------------------------------------------------------------------------
# helpers
# ----------------------------------------------------------------------------
def _layer_norm(x, g, b, eps):
    mu = jnp.mean(x, axis=-1, keepdims=True)
    xc = x - mu
    var = jnp.mean(xc * xc, axis=-1, keepdims=True)
    return xc * lax.rsqrt(var + eps) * g + b


def _gelu(x):
    # tanh-approximate GELU (EUP tanh); HF uses exact erf GELU -> ~1e-3 drift, fine for inference.
    return 0.5 * x * (1.0 + jnp.tanh(0.7978845608028654 * (x + 0.044715 * x * x * x)))


# ----------------------------------------------------------------------------
# Kernel 1: fused encoder stack
#   grid=(NLAYERS,); activations resident in VMEM scratch across layers.
#   Layer 0 epilogue : embedding LayerNorm.
#   Layer L-1 epilogue: write hidden states + pooled tanh(dense(CLS)).
# ----------------------------------------------------------------------------
def _fused_encoder_kernel(x_ref, mask_ref, eg_ref, eb_ref,
                          wqkv_ref, bqkv_ref, wo_ref, bo_ref, g1_ref, b1_ref,
                          w1_ref, bb1_ref, w2_ref, bb2_ref, g2_ref, b2_ref,
                          pw_ref, pb_ref,
                          o_ref, utt_ref,
                          act_sc, attn_sc,
                          *, batch, seq, nheads, head_dim, eps):
    layer = pl.program_id(0)
    nlayers = pl.num_programs(0)
    T = seq
    H = x_ref.shape[-1]

    # ---- layer 0: initialise resident activations with the embedding LayerNorm ----
    @pl.when(layer == 0)
    def _():
        act_sc[...] = _layer_norm(x_ref[...], eg_ref[...], eb_ref[...], eps)

    x = act_sc[...]                                    # (B*T, H) f32, resident across layers
    xb = x.astype(jnp.bfloat16)

    # hoisted per-layer weight loads (weights are bf16, biases / LN params f32)
    wqkv = wqkv_ref[0]
    wo = wo_ref[0]
    w1 = w1_ref[0]
    w2 = w2_ref[0]
    bqkv = bqkv_ref[0]
    bo = bo_ref[0]
    bb1 = bb1_ref[0]
    bb2 = bb2_ref[0]

    # fused QKV projection over the whole (B*T) slab — bf16 MXU inputs, f32 accumulate
    qkv = jnp.dot(xb, wqkv, preferred_element_type=jnp.float32) + bqkv   # (B*T, 3H)

    scale = 1.0 / math.sqrt(head_dim)

    # ---- attention: per batch element, per head, accumulating each head's context
    # directly into the output projection (no per-head lane concat) ----
    # TODO(synk): for long sequences (T >~ 2K) tile the key axis with an online softmax.
    for b in range(batch):
        r0 = b * T
        neg = jnp.broadcast_to(mask_ref[b], (T, T))    # additive key mask, hoisted out of head loop
        q_b = qkv[r0:r0 + T, 0:H]
        k_b = qkv[r0:r0 + T, H:2 * H]
        v_b = qkv[r0:r0 + T, 2 * H:3 * H]
        attn_b = jnp.zeros((T, H), jnp.float32)
        for h in range(nheads):
            lo = h * head_dim
            hi = lo + head_dim
            qh = (q_b[:, lo:hi] * scale).astype(jnp.bfloat16)   # scale folded into q cast
            kh = k_b[:, lo:hi].astype(jnp.bfloat16)
            vh = v_b[:, lo:hi].astype(jnp.bfloat16)
            s = lax.dot_general(qh, kh, (((1,), (1,)), ((), ())),
                                preferred_element_type=jnp.float32) + neg   # (T,T)
            m = jnp.max(s, axis=-1, keepdims=True)
            p = jnp.exp(s - m)
            denom = jnp.sum(p, axis=-1, keepdims=True)
            p = p * pl.reciprocal(denom, approx=True)           # EUP reciprocal
            ctx = jnp.dot(p.astype(jnp.bfloat16), vh,
                          preferred_element_type=jnp.float32)   # (T, head_dim)
            attn_b = attn_b + jnp.dot(ctx.astype(jnp.bfloat16), wo[lo:hi, :],
                                      preferred_element_type=jnp.float32)
        attn_sc[r0:r0 + T, :] = attn_b + bo

    # ---- residual + LayerNorm, FFN (GELU), residual + LayerNorm ----
    h1 = _layer_norm(x + attn_sc[...], g1_ref[0], b1_ref[0], eps)

    ff = jnp.dot(h1.astype(jnp.bfloat16), w1, preferred_element_type=jnp.float32) + bb1
    ff = _gelu(ff)
    ff2 = jnp.dot(ff.astype(jnp.bfloat16), w2, preferred_element_type=jnp.float32) + bb2
    xn = _layer_norm(h1 + ff2, g2_ref[0], b2_ref[0], eps)
    act_sc[...] = xn

    # ---- last layer: emit hidden states and pooled CLS output ----
    @pl.when(layer == nlayers - 1)
    def _():
        o_ref[...] = xn
        cls = jnp.concatenate([xn[b * T:b * T + 1, :] for b in range(batch)], axis=0)
        utt_ref[...] = jnp.tanh(
            jnp.dot(cls.astype(jnp.bfloat16), pw_ref[...],
                    preferred_element_type=jnp.float32) + pb_ref[...])


def fused_encoder(x_flat, mask_add, emb_ln_g, emb_ln_b, stack, pool_w, pool_b,
                  *, batch, seq, nheads, head_dim, eps=1e-5):
    BT, H = x_flat.shape
    L = stack["wqkv"].shape[0]

    def layer_spec(a):                     # per-layer stacked weights: (L, r, c)
        return pl.BlockSpec((1,) + a.shape[1:], lambda l: (l, 0, 0))

    def const2(a):                         # replicated 2-D operand
        return pl.BlockSpec(a.shape, lambda l: (0, 0))

    def const3(a):                         # replicated 3-D operand
        return pl.BlockSpec(a.shape, lambda l: (0, 0, 0))

    kernel = functools.partial(_fused_encoder_kernel, batch=batch, seq=seq,
                               nheads=nheads, head_dim=head_dim, eps=eps)

    return pl.pallas_call(
        kernel,
        out_shape=(jax.ShapeDtypeStruct((BT, H), jnp.float32),
                   jax.ShapeDtypeStruct((batch, H), jnp.float32)),
        grid=(L,),
        in_specs=[
            const2(x_flat),                # embedding sum (B*T, H)
            const3(mask_add),              # additive key mask (B, 1, T)
            const2(emb_ln_g), const2(emb_ln_b),
            layer_spec(stack["wqkv"]), layer_spec(stack["bqkv"]),
            layer_spec(stack["wo"]), layer_spec(stack["bo"]),
            layer_spec(stack["ln1_g"]), layer_spec(stack["ln1_b"]),
            layer_spec(stack["w1"]), layer_spec(stack["b1"]),
            layer_spec(stack["w2"]), layer_spec(stack["b2"]),
            layer_spec(stack["ln2_g"]), layer_spec(stack["ln2_b"]),
            const2(pool_w), const2(pool_b),
        ],
        out_specs=(pl.BlockSpec((BT, H), lambda l: (0, 0)),
                   pl.BlockSpec((batch, H), lambda l: (0, 0))),
        scratch_shapes=[pltpu.VMEM((BT, H), jnp.float32),    # resident activations
                        pltpu.VMEM((BT, H), jnp.float32)],   # attention output slab
        compiler_params=pltpu.CompilerParams(
            dimension_semantics=("arbitrary",),              # layers are sequential
            vmem_limit_bytes=48 * 1024 * 1024),              # explicit budget (v7x = 64 MiB physical)
    )(x_flat, mask_add, emb_ln_g, emb_ln_b,
      stack["wqkv"], stack["bqkv"], stack["wo"], stack["bo"],
      stack["ln1_g"], stack["ln1_b"], stack["w1"], stack["b1"],
      stack["w2"], stack["b2"], stack["ln2_g"], stack["ln2_b"],
      pool_w, pool_b)


# ----------------------------------------------------------------------------
# Kernel 2: out[b][:lens[b]] = h[b][token_loc[b]], rest zeros
#   token_loc / lens scalar-prefetched into SMEM; short gather loop fully unrolled.
# ----------------------------------------------------------------------------
def _gather_pad_kernel(loc_ref, len_ref, h_ref, o_ref, *, seq_len, max_len):
    b = pl.program_id(0)
    n = len_ref[b]
    for i in range(max_len):                                   # static, fully unrolled
        loc = loc_ref[b, i]
        loc = jnp.minimum(jnp.maximum(loc, 0), seq_len - 1)    # keep in-bounds (no HW check)
        row = h_ref[0, pl.ds(loc, 1), :]                       # (1,H) gathered hidden
        row = jnp.where(i < n, row, jnp.zeros_like(row))       # zero padding past lens[b]
        o_ref[0, pl.ds(i, 1), :] = row


def gather_word_hiddens(token_loc, lens, h, max_len):
    B, T, H = h.shape
    return pl.pallas_call(
        functools.partial(_gather_pad_kernel, seq_len=T, max_len=max_len),
        out_shape=jax.ShapeDtypeStruct((B, max_len, H), jnp.float32),
        grid_spec=pltpu.PrefetchScalarGridSpec(
            num_scalar_prefetch=2,
            grid=(B,),
            in_specs=[pl.BlockSpec((1, T, H), lambda b, loc, ln: (b, 0, 0))],
            out_specs=pl.BlockSpec((1, max_len, H), lambda b, loc, ln: (b, 0, 0)),
        ),
        compiler_params=pltpu.CompilerParams(dimension_semantics=("parallel",)),
    )(token_loc, lens, h)


# ----------------------------------------------------------------------------
# Full forward (matches BertEncoder.forward after tokenization)
# ----------------------------------------------------------------------------
def bert_encoder_forward(params, token_ids, mask_ids, token_loc, lens,
                         *, max_len, nheads, head_dim, pad_id=1):
    # TODO(synk): get_info (RobertaTokenizer string processing) is host-side Python with no
    # TPU/Pallas equivalent; token_ids / mask_ids / token_loc / lens arrive already encoded.
    B, T = token_ids.shape
    H = params["word_emb"].shape[1]

    # Embedding table gathers stay in XLA (dynamic vocab gather); everything after is Pallas.
    word_e = jnp.take(params["word_emb"], token_ids, axis=0)          # (B,T,H)
    not_pad = (token_ids != pad_id).astype(jnp.int32)
    pos_ids = jnp.cumsum(not_pad, axis=1) * not_pad + pad_id          # RoBERTa offset positions
    pos_e = jnp.take(params["pos_emb"], pos_ids, axis=0)              # (B,T,H)
    type_e = params["type_emb"][0]                                    # type_ids are all zero (RoBERTa)
    emb = (word_e + pos_e + type_e).reshape(B * T, H)                 # (B*T,H)

    # additive key mask (pad tokens -> -1e30), expanded once per batch inside the kernel
    mask_add = jnp.where(mask_ids > 0, 0.0, -1e30).astype(jnp.float32)[:, None, :]   # (B,1,T)

    h_flat, utt = fused_encoder(emb, mask_add,
                                params["emb_ln_g"], params["emb_ln_b"],
                                params["stack"], params["pool_w"], params["pool_b"],
                                batch=B, seq=T, nheads=nheads, head_dim=head_dim)

    h3 = h_flat.reshape(B, T, H)
    out = gather_word_hiddens(token_loc, lens, h3, max_len)           # (B,max_len,H)
    return out, utt


# ----------------------------------------------------------------------------
# Parameter init (random — pretrained roberta-base weights cannot be loaded here)
# Matmul weights stored in bf16 (MXU-native); biases / LN params / embeddings in f32.
# ----------------------------------------------------------------------------
def init_params(key, *, vocab, hidden, inter, nlayers, max_pos):
    keys = jax.random.split(key, 8)

    def dense(k, shape, dtype=jnp.float32):
        return (0.02 * jax.random.normal(k, shape, jnp.float32)).astype(dtype)

    return {
        "word_emb": dense(keys[0], (vocab, hidden)),
        "pos_emb": dense(keys[1], (max_pos, hidden)),
        "type_emb": dense(keys[2], (1, hidden)),
        "emb_ln_g": jnp.ones((1, hidden), jnp.float32),
        "emb_ln_b": jnp.zeros((1, hidden), jnp.float32),
        "pool_w": dense(keys[3], (hidden, hidden), jnp.bfloat16),
        "pool_b": jnp.zeros((1, hidden), jnp.float32),
        "stack": {
            "wqkv": dense(keys[4], (nlayers, hidden, 3 * hidden), jnp.bfloat16),
            "bqkv": jnp.zeros((nlayers, 1, 3 * hidden), jnp.float32),
            "wo": dense(keys[5], (nlayers, hidden, hidden), jnp.bfloat16),
            "bo": jnp.zeros((nlayers, 1, hidden), jnp.float32),
            "ln1_g": jnp.ones((nlayers, 1, hidden), jnp.float32),
            "ln1_b": jnp.zeros((nlayers, 1, hidden), jnp.float32),
            "w1": dense(keys[6], (nlayers, hidden, inter), jnp.bfloat16),
            "b1": jnp.zeros((nlayers, 1, inter), jnp.float32),
            "w2": dense(keys[7], (nlayers, inter, hidden), jnp.bfloat16),
            "b2": jnp.zeros((nlayers, 1, hidden), jnp.float32),
            "ln2_g": jnp.ones((nlayers, 1, hidden), jnp.float32),
            "ln2_b": jnp.zeros((nlayers, 1, hidden), jnp.float32),
        },
    }


if __name__ == "__main__":
    # Scaled-down RoBERTa config with lane-dense dims (hidden / head_dim / inter % 128 == 0).
    B, T = 2, 16              # batch, tokenized sequence length
    HIDDEN = 256              # real model: 768
    NHEADS, HEAD_DIM = 2, 128
    INTER = 512
    NLAYERS = 2               # real model: 12
    VOCAB = 512
    MAX_WORDS = 8             # = lens[0] in the torch module
    PAD_ID = 1                # roberta <pad>

    key = jax.random.PRNGKey(0)
    k_tok, k_par = jax.random.split(key, 2)

    # Deterministic synthetic "tokenized" batch (stand-in for get_info's output).
    tok_lens = jnp.array([[16], [12]], jnp.int32)               # tokens incl. <s>/</s>, rest <pad>
    pos = jnp.arange(T, dtype=jnp.int32)[None, :]
    rand_ids = jax.random.randint(k_tok, (B, T), 3, VOCAB, jnp.int32)
    token_ids = jnp.where(pos == 0, 0, rand_ids)                # <s>
    token_ids = jnp.where(pos == tok_lens - 1, 2, token_ids)    # </s>
    token_ids = jnp.where(pos >= tok_lens, PAD_ID, token_ids)   # <pad>
    mask_ids = (pos < tok_lens).astype(jnp.int32)               # (B,T)

    lens = jnp.array([8, 5], jnp.int32)                         # word counts per sentence
    token_loc = jnp.array([[1, 2, 4, 5, 7, 9, 11, 13],
                           [1, 3, 5, 7, 9, 0, 0, 0]], jnp.int32)   # word-start token positions

    params = init_params(k_par, vocab=VOCAB, hidden=HIDDEN, inter=INTER,
                         nlayers=NLAYERS, max_pos=T + 2)

    fwd = jax.jit(functools.partial(bert_encoder_forward,
                                    max_len=MAX_WORDS, nheads=NHEADS,
                                    head_dim=HEAD_DIM, pad_id=PAD_ID))
    out, utt = fwd(params, token_ids, mask_ids, token_loc, lens)
    out = jax.block_until_ready(out)
    utt = jax.block_until_ready(utt)

    assert out.shape == (B, MAX_WORDS, HIDDEN)
    assert utt.shape == (B, HIDDEN)
    assert bool(jnp.isfinite(out).all()) and bool(jnp.isfinite(utt).all())
    assert float(jnp.abs(out[1, 5:]).max()) == 0.0              # padding rows past lens[1] are zero
    assert float(jnp.abs(out[0]).max()) > 0.0                   # gathered rows carry real activations
    print("KERNEL_OK")
</pallas_src>

<mosaic_0001>
module attributes {stable_mosaic.version = 11 : i64} {
  func.func @_gather_pad_kernel(%arg0: i32, %arg1: memref<2x8xi32, #tpu.memory_space<smem>>, %arg2: memref<2xi32, #tpu.memory_space<smem>>, %arg3: memref<1x16x256xf32, #tpu.memory_space<vmem>>, %arg4: memref<1x8x256xf32, #tpu.memory_space<vmem>>) attributes {dimension_semantics = [#tpu.dimension_semantics<parallel>], iteration_bounds = array<i64: 2>, scalar_prefetch = 2 : i64, scratch_operands = 0 : i64, tpu.core_type = #tpu.core_type<tc>, window_params = [{transform_indices = @transform_0, window_bounds = array<i64: 1, 16, 256>}, {transform_indices = @transform_1, window_bounds = array<i64: 1, 8, 256>}]} {
    %0 = arith.index_cast %arg0 : i32 to index
    %1 = memref.load %arg2[%0] : memref<2xi32, #tpu.memory_space<smem>>
    %2 = arith.index_cast %arg0 : i32 to index
    %c0 = arith.constant 0 : index
    %3 = memref.load %arg1[%2, %c0] : memref<2x8xi32, #tpu.memory_space<smem>>
    %c0_i32 = arith.constant 0 : i32
    %4 = arith.maxsi %3, %c0_i32 : i32
    %c15_i32 = arith.constant 15 : i32
    %5 = arith.minsi %4, %c15_i32 : i32
    %c0_0 = arith.constant 0 : index
    %6 = arith.index_cast %5 : i32 to index
    %c0_1 = arith.constant 0 : index
    %7 = vector.load %arg3[%c0_0, %6, %c0_1] : memref<1x16x256xf32, #tpu.memory_space<vmem>>, vector<1x1x256xf32>
    %8 = vector.shape_cast %7 : vector<1x1x256xf32> to vector<1x256xf32>
    %c0_i32_2 = arith.constant 0 : i32
    %9 = arith.cmpi sgt, %1, %c0_i32_2 : i32
    %cst = arith.constant 0.000000e+00 : f32
    %10 = vector.broadcast %cst : f32 to vector<1x256xf32>
    %11 = arith.select %9, %8, %10 : vector<1x256xf32>
    %c0_3 = arith.constant 0 : index
    %c0_4 = arith.constant 0 : index
    %c0_5 = arith.constant 0 : index
    %12 = vector.load %arg4[%c0_3, %c0_4, %c0_5] : memref<1x8x256xf32, #tpu.memory_space<vmem>>, vector<1x1x256xf32>
    %13 = vector.shape_cast %12 : vector<1x1x256xf32> to vector<1x256xf32>
    %14 = vector.shape_cast %11 : vector<1x256xf32> to vector<1x1x256xf32>
    tpu.vector_store %arg4[%c0_3, %c0_4, %c0_5], %14 {strides = array<i32>} : memref<1x8x256xf32, #tpu.memory_space<vmem>>, vector<1x1x256xf32>,
    %15 = arith.index_cast %arg0 : i32 to index
    %c1 = arith.constant 1 : index
    %16 = memref.load %arg1[%15, %c1] : memref<2x8xi32, #tpu.memory_space<smem>>
    %c0_i32_6 = arith.constant 0 : i32
    %17 = arith.maxsi %16, %c0_i32_6 : i32
    %c15_i32_7 = arith.constant 15 : i32
    %18 = arith.minsi %17, %c15_i32_7 : i32
    %c0_8 = arith.constant 0 : index
    %19 = arith.index_cast %18 : i32 to index
    %c0_9 = arith.constant 0 : index
    %20 = vector.load %arg3[%c0_8, %19, %c0_9] : memref<1x16x256xf32, #tpu.memory_space<vmem>>, vector<1x1x256xf32>
    %21 = vector.shape_cast %20 : vector<1x1x256xf32> to vector<1x256xf32>
    %c1_i32 = arith.constant 1 : i32
    %22 = arith.cmpi sgt, %1, %c1_i32 : i32
    %cst_10 = arith.constant 0.000000e+00 : f32
    %23 = vector.broadcast %cst_10 : f32 to vector<1x256xf32>
    %24 = arith.select %22, %21, %23 : vector<1x256xf32>
    %c0_11 = arith.constant 0 : index
    %c1_12 = arith.constant 1 : index
    %c0_13 = arith.constant 0 : index
    %25 = vector.load %arg4[%c0_11, %c1_12, %c0_13] : memref<1x8x256xf32, #tpu.memory_space<vmem>>, vector<1x1x256xf32>
    %26 = vector.shape_cast %25 : vector<1x1x256xf32> to vector<1x256xf32>
    %27 = vector.shape_cast %24 : vector<1x256xf32> to vector<1x1x256xf32>
    tpu.vector_store %arg4[%c0_11, %c1_12, %c0_13], %27 {strides = array<i32>} : memref<1x8x256xf32, #tpu.memory_space<vmem>>, vector<1x1x256xf32>,
    %28 = arith.index_cast %arg0 : i32 to index
    %c2 = arith.constant 2 : index
    %29 = memref.load %arg1[%28, %c2] : memref<2x8xi32, #tpu.memory_space<smem>>
    %c0_i32_14 = arith.constant 0 : i32
    %30 = arith.maxsi %29, %c0_i32_14 : i32
    %c15_i32_15 = arith.constant 15 : i32
    %31 = arith.minsi %30, %c15_i32_15 : i32
    %c0_16 = arith.constant 0 : index
    %32 = arith.index_cast %31 : i32 to index
    %c0_17 = arith.constant 0 : index
    %33 = vector.load %arg3[%c0_16, %32, %c0_17] : memref<1x16x256xf32, #tpu.memory_space<vmem>>, vector<1x1x256xf32>
    %34 = vector.shape_cast %33 : vector<1x1x256xf32> to vector<1x256xf32>
    %c2_i32 = arith.constant 2 : i32
    %35 = arith.cmpi sgt, %1, %c2_i32 : i32
    %cst_18 = arith.constant 0.000000e+00 : f32
    %36 = vector.broadcast %cst_18 : f32 to vector<1x256xf32>
    %37 = arith.select %35, %34, %36 : vector<1x256xf32>
    %c0_19 = arith.constant 0 : index
    %c2_20 = arith.constant 2 : index
    %c0_21 = arith.constant 0 : index
    %38 = vector.load %arg4[%c0_19, %c2_20, %c0_21] : memref<1x8x256xf32, #tpu.memory_space<vmem>>, vector<1x1x256xf32>
    %39 = vector.shape_cast %38 : vector<1x1x256xf32> to vector<1x256xf32>
    %40 = vector.shape_cast %37 : vector<1x256xf32> to vector<1x1x256xf32>
    tpu.vector_store %arg4[%c0_19, %c2_20, %c0_21], %40 {strides = array<i32>} : memref<1x8x256xf32, #tpu.memory_space<vmem>>, vector<1x1x256xf32>,
    %41 = arith.index_cast %arg0 : i32 to index
    %c3 = arith.constant 3 : index
    %42 = memref.load %arg1[%41, %c3] : memref<2x8xi32, #tpu.memory_space<smem>>
    %c0_i32_22 = arith.constant 0 : i32
    %43 = arith.maxsi %42, %c0_i32_22 : i32
    %c15_i32_23 = arith.constant 15 : i32
    %44 = arith.minsi %43, %c15_i32_23 : i32
    %c0_24 = arith.constant 0 : index
    %45 = arith.index_cast %44 : i32 to index
    %c0_25 = arith.constant 0 : index
    %46 = vector.load %arg3[%c0_24, %45, %c0_25] : memref<1x16x256xf32, #tpu.memory_space<vmem>>, vector<1x1x256xf32>
    %47 = vector.shape_cast %46 : vector<1x1x256xf32> to vector<1x256xf32>
    %c3_i32 = arith.constant 3 : i32
    %48 = arith.cmpi sgt, %1, %c3_i32 : i32
    %cst_26 = arith.constant 0.000000e+00 : f32
    %49 = vector.broadcast %cst_26 : f32 to vector<1x256xf32>
    %50 = arith.select %48, %47, %49 : vector<1x256xf32>
    %c0_27 = arith.constant 0 : index
    %c3_28 = arith.constant 3 : index
    %c0_29 = arith.constant 0 : index
    %51 = vector.load %arg4[%c0_27, %c3_28, %c0_29] : memref<1x8x256xf32, #tpu.memory_space<vmem>>, vector<1x1x256xf32>
    %52 = vector.shape_cast %51 : vector<1x1x256xf32> to vector<1x256xf32>
    %53 = vector.shape_cast %50 : vector<1x256xf32> to vector<1x1x256xf32>
    tpu.vector_store %arg4[%c0_27, %c3_28, %c0_29], %53 {strides = array<i32>} : memref<1x8x256xf32, #tpu.memory_space<vmem>>, vector<1x1x256xf32>,
    %54 = arith.index_cast %arg0 : i32 to index
    %c4 = arith.constant 4 : index
    %55 = memref.load %arg1[%54, %c4] : memref<2x8xi32, #tpu.memory_space<smem>>
    %c0_i32_30 = arith.constant 0 : i32
    %56 = arith.maxsi %55, %c0_i32_30 : i32
    %c15_i32_31 = arith.constant 15 : i32
    %57 = arith.minsi %56, %c15_i32_31 : i32
    %c0_32 = arith.constant 0 : index
    %58 = arith.index_cast %57 : i32 to index
    %c0_33 = arith.constant 0 : index
    %59 = vector.load %arg3[%c0_32, %58, %c0_33] : memref<1x16x256xf32, #tpu.memory_space<vmem>>, vector<1x1x256xf32>
    %60 = vector.shape_cast %59 : vector<1x1x256xf32> to vector<1x256xf32>
    %c4_i32 = arith.constant 4 : i32
    %61 = arith.cmpi sgt, %1, %c4_i32 : i32
    %cst_34 = arith.constant 0.000000e+00 : f32
    %62 = vector.broadcast %cst_34 : f32 to vector<1x256xf32>
    %63 = arith.select %61, %60, %62 : vector<1x256xf32>
    %c0_35 = arith.constant 0 : index
    %c4_36 = arith.constant 4 : index
    %c0_37 = arith.constant 0 : index
    %64 = vector.load %arg4[%c0_35, %c4_36, %c0_37] : memref<1x8x256xf32, #tpu.memory_space<vmem>>, vector<1x1x256xf32>
    %65 = vector.shape_cast %64 : vector<1x1x256xf32> to vector<1x256xf32>
    %66 = vector.shape_cast %63 : vector<1x256xf32> to vector<1x1x256xf32>
    tpu.vector_store %arg4[%c0_35, %c4_36, %c0_37], %66 {strides = array<i32>} : memref<1x8x256xf32, #tpu.memory_space<vmem>>, vector<1x1x256xf32>,
    %67 = arith.index_cast %arg0 : i32 to index
    %c5 = arith.constant 5 : index
    %68 = memref.load %arg1[%67, %c5] : memref<2x8xi32, #tpu.memory_space<smem>>
    %c0_i32_38 = arith.constant 0 : i32
    %69 = arith.maxsi %68, %c0_i32_38 : i32
    %c15_i32_39 = arith.constant 15 : i32
    %70 = arith.minsi %69, %c15_i32_39 : i32
    %c0_40 = arith.constant 0 : index
    %71 = arith.index_cast %70 : i32 to index
    %c0_41 = arith.constant 0 : index
    %72 = vector.load %arg3[%c0_40, %71, %c0_41] : memref<1x16x256xf32, #tpu.memory_space<vmem>>, vector<1x1x256xf32>
    %73 = vector.shape_cast %72 : vector<1x1x256xf32> to vector<1x256xf32>
    %c5_i32 = arith.constant 5 : i32
    %74 = arith.cmpi sgt, %1, %c5_i32 : i32
    %cst_42 = arith.constant 0.000000e+00 : f32
    %75 = vector.broadcast %cst_42 : f32 to vector<1x256xf32>
    %76 = arith.select %74, %73, %75 : vector<1x256xf32>
    %c0_43 = arith.constant 0 : index
    %c5_44 = arith.constant 5 : index
    %c0_45 = arith.constant 0 : index
    %77 = vector.load %arg4[%c0_43, %c5_44, %c0_45] : memref<1x8x256xf32, #tpu.memory_space<vmem>>, vector<1x1x256xf32>
    %78 = vector.shape_cast %77 : vector<1x1x256xf32> to vector<1x256xf32>
    %79 = vector.shape_cast %76 : vector<1x256xf32> to vector<1x1x256xf32>
    tpu.vector_store %arg4[%c0_43, %c5_44, %c0_45], %79 {strides = array<i32>} : memref<1x8x256xf32, #tpu.memory_space<vmem>>, vector<1x1x256xf32>,
    %80 = arith.index_cast %arg0 : i32 to index
    %c6 = arith.constant 6 : index
    %81 = memref.load %arg1[%80, %c6] : memref<2x8xi32, #tpu.memory_space<smem>>
    %c0_i32_46 = arith.constant 0 : i32
    %82 = arith.maxsi %81, %c0_i32_46 : i32
    %c15_i32_47 = arith.constant 15 : i32
    %83 = arith.minsi %82, %c15_i32_47 : i32
    %c0_48 = arith.constant 0 : index
    %84 = arith.index_cast %83 : i32 to index
    %c0_49 = arith.constant 0 : index
    %85 = vector.load %arg3[%c0_48, %84, %c0_49] : memref<1x16x256xf32, #tpu.memory_space<vmem>>, vector<1x1x256xf32>
    %86 = vector.shape_cast %85 : vector<1x1x256xf32> to vector<1x256xf32>
    %c6_i32 = arith.constant 6 : i32
    %87 = arith.cmpi sgt, %1, %c6_i32 : i32
    %cst_50 = arith.constant 0.000000e+00 : f32
    %88 = vector.broadcast %cst_50 : f32 to vector<1x256xf32>
    %89 = arith.select %87, %86, %88 : vector<1x256xf32>
    %c0_51 = arith.constant 0 : index
    %c6_52 = arith.constant 6 : index
    %c0_53 = arith.constant 0 : index
    %90 = vector.load %arg4[%c0_51, %c6_52, %c0_53] : memref<1x8x256xf32, #tpu.memory_space<vmem>>, vector<1x1x256xf32>
    %91 = vector.shape_cast %90 : vector<1x1x256xf32> to vector<1x256xf32>
    %92 = vector.shape_cast %89 : vector<1x256xf32> to vector<1x1x256xf32>
    tpu.vector_store %arg4[%c0_51, %c6_52, %c0_53], %92 {strides = array<i32>} : memref<1x8x256xf32, #tpu.memory_space<vmem>>, vector<1x1x256xf32>,
    %93 = arith.index_cast %arg0 : i32 to index
    %c7 = arith.constant 7 : index
    %94 = memref.load %arg1[%93, %c7] : memref<2x8xi32, #tpu.memory_space<smem>>
    %c0_i32_54 = arith.constant 0 : i32
    %95 = arith.maxsi %94, %c0_i32_54 : i32
    %c15_i32_55 = arith.constant 15 : i32
    %96 = arith.minsi %95, %c15_i32_55 : i32
    %c0_56 = arith.constant 0 : index
    %97 = arith.index_cast %96 : i32 to index
    %c0_57 = arith.constant 0 : index
    %98 = vector.load %arg3[%c0_56, %97, %c0_57] : memref<1x16x256xf32, #tpu.memory_space<vmem>>, vector<1x1x256xf32>
    %99 = vector.shape_cast %98 : vector<1x1x256xf32> to vector<1x256xf32>
    %c7_i32 = arith.constant 7 : i32
    %100 = arith.cmpi sgt, %1, %c7_i32 : i32
    %cst_58 = arith.constant 0.000000e+00 : f32
    %101 = vector.broadcast %cst_58 : f32 to vector<1x256xf32>
    %102 = arith.select %100, %99, %101 : vector<1x256xf32>
    %c0_59 = arith.constant 0 : index
    %c7_60 = arith.constant 7 : index
    %c0_61 = arith.constant 0 : index
    %103 = vector.load %arg4[%c0_59, %c7_60, %c0_61] : memref<1x8x256xf32, #tpu.memory_space<vmem>>, vector<1x1x256xf32>
    %104 = vector.shape_cast %103 : vector<1x1x256xf32> to vector<1x256xf32>
    %105 = vector.shape_cast %102 : vector<1x256xf32> to vector<1x1x256xf32>
    tpu.vector_store %arg4[%c0_59, %c7_60, %c0_61], %105 {strides = array<i32>} : memref<1x8x256xf32, #tpu.memory_space<vmem>>, vector<1x1x256xf32>,
    return
  }
  func.func @transform_0(%arg0: i32, %arg1: memref<2x8xi32, #tpu.memory_space<smem>>, %arg2: memref<2xi32, #tpu.memory_space<smem>>) -> (i32, i32, i32) {
    %c0_i32 = arith.constant 0 : i32
    %c0_i32_0 = arith.constant 0 : i32
    %c0_i32_1 = arith.constant 0 : i32
    return %arg0, %c0_i32, %c0_i32_0 : i32, i32, i32
  }
  func.func @transform_1(%arg0: i32, %arg1: memref<2x8xi32, #tpu.memory_space<smem>>, %arg2: memref<2xi32, #tpu.memory_space<smem>>) -> (i32, i32, i32) {
    %c0_i32 = arith.constant 0 : i32
    %c0_i32_0 = arith.constant 0 : i32
    %c0_i32_1 = arith.constant 0 : i32
    return %arg0, %c0_i32, %c0_i32_0 : i32, i32, i32
  }
}

module attributes {stable_mosaic.version = 11 : i64} {
  func.func @_fused_encoder_kernel(%arg0: i32, %arg1: memref<32x256xf32, #tpu.memory_space<vmem>>, %arg2: memref<2x1x16xf32, #tpu.memory_space<vmem>>, %arg3: memref<1x256xf32, #tpu.memory_space<vmem>>, %arg4: memref<1x256xf32, #tpu.memory_space<vmem>>, %arg5: memref<1x256x768xbf16, #tpu.memory_space<vmem>>, %arg6: memref<1x1x768xf32, #tpu.memory_space<vmem>>, %arg7: memref<1x256x256xbf16, #tpu.memory_space<vmem>>, %arg8: memref<1x1x256xf32, #tpu.memory_space<vmem>>, %arg9: memref<1x1x256xf32, #tpu.memory_space<vmem>>, %arg10: memref<1x1x256xf32, #tpu.memory_space<vmem>>, %arg11: memref<1x256x512xbf16, #tpu.memory_space<vmem>>, %arg12: memref<1x1x512xf32, #tpu.memory_space<vmem>>, %arg13: memref<1x512x256xbf16, #tpu.memory_space<vmem>>, %arg14: memref<1x1x256xf32, #tpu.memory_space<vmem>>, %arg15: memref<1x1x256xf32, #tpu.memory_space<vmem>>, %arg16: memref<1x1x256xf32, #tpu.memory_space<vmem>>, %arg17: memref<256x256xbf16, #tpu.memory_space<vmem>>, %arg18: memref<1x256xf32, #tpu.memory_space<vmem>>, %arg19: memref<32x256xf32, #tpu.memory_space<vmem>>, %arg20: memref<2x256xf32, #tpu.memory_space<vmem>>, %arg21: memref<32x256xf32, #tpu.memory_space<vmem>>, %arg22: memref<32x256xf32, #tpu.memory_space<vmem>>) attributes {dimension_semantics = [#tpu.dimension_semantics<arbitrary>], iteration_bounds = array<i64: 2>, scalar_prefetch = 0 : i64, scratch_operands = 2 : i64, tpu.core_type = #tpu.core_type<tc>, window_params = [{pipeline_mode = #tpu.pipeline_mode<synchronous>, transform_indices = @transform_0, window_bounds = array<i64: 32, 256>}, {pipeline_mode = #tpu.pipeline_mode<synchronous>, transform_indices = @transform_1, window_bounds = array<i64: 2, 1, 16>}, {pipeline_mode = #tpu.pipeline_mode<synchronous>, transform_indices = @transform_2, window_bounds = array<i64: 1, 256>}, {pipeline_mode = #tpu.pipeline_mode<synchronous>, transform_indices = @transform_3, window_bounds = array<i64: 1, 256>}, {transform_indices = @transform_4, window_bounds = array<i64: 1, 256, 768>}, {transform_indices = @transform_5, window_bounds = array<i64: 1, 1, 768>}, {transform_indices = @transform_6, window_bounds = array<i64: 1, 256, 256>}, {transform_indices = @transform_7, window_bounds = array<i64: 1, 1, 256>}, {transform_indices = @transform_8, window_bounds = array<i64: 1, 1, 256>}, {transform_indices = @transform_9, window_bounds = array<i64: 1, 1, 256>}, {transform_indices = @transform_10, window_bounds = array<i64: 1, 256, 512>}, {transform_indices = @transform_11, window_bounds = array<i64: 1, 1, 512>}, {transform_indices = @transform_12, window_bounds = array<i64: 1, 512, 256>}, {transform_indices = @transform_13, window_bounds = array<i64: 1, 1, 256>}, {transform_indices = @transform_14, window_bounds = array<i64: 1, 1, 256>}, {transform_indices = @transform_15, window_bounds = array<i64: 1, 1, 256>}, {pipeline_mode = #tpu.pipeline_mode<synchronous>, transform_indices = @transform_16, window_bounds = array<i64: 256, 256>}, {pipeline_mode = #tpu.pipeline_mode<synchronous>, transform_indices = @transform_17, window_bounds = array<i64: 1, 256>}, {pipeline_mode = #tpu.pipeline_mode<synchronous>, transform_indices = @transform_18, window_bounds = array<i64: 32, 256>}, {pipeline_mode = #tpu.pipeline_mode<synchronous>, transform_indices = @transform_19, window_bounds = array<i64: 2, 256>}]} {
    %c0_i32 = arith.constant 0 : i32
    %0 = arith.cmpi eq, %arg0, %c0_i32 : i32
    %1 = arith.extui %0 : i1 to i32
    %c0_i32_0 = arith.constant 0 : i32
    %2 = arith.cmpi ne, %1, %c0_i32_0 : i32
    scf.if %2 {
      %c0_93 = arith.constant 0 : index
      %c0_94 = arith.constant 0 : index
      %226 = vector.load %arg1[%c0_93, %c0_94] : memref<32x256xf32, #tpu.memory_space<vmem>>, vector<32x256xf32>
      %c0_95 = arith.constant 0 : index
      %c0_96 = arith.constant 0 : index
      %227 = vector.load %arg3[%c0_95, %c0_96] : memref<1x256xf32, #tpu.memory_space<vmem>>, vector<1x256xf32>
      %c0_97 = arith.constant 0 : index
      %c0_98 = arith.constant 0 : index
      %228 = vector.load %arg4[%c0_97, %c0_98] : memref<1x256xf32, #tpu.memory_space<vmem>>, vector<1x256xf32>
      %cst_99 = arith.constant dense<0.000000e+00> : vector<32xf32>
      %229 = vector.multi_reduction <add>, %226, %cst_99 [1] : vector<32x256xf32> to vector<32xf32>
      %230 = vector.shape_cast %229 : vector<32xf32> to vector<32x1xf32>
      %cst_100 = arith.constant 2.560000e+02 : f32
      %231 = vector.broadcast %cst_100 : f32 to vector<32x1xf32>
      %232 = arith.divf %230, %231 : vector<32x1xf32>
      %233 = vector.broadcast %232 : vector<32x1xf32> to vector<32x256xf32>
      %234 = arith.subf %226, %233 : vector<32x256xf32>
      %235 = arith.mulf %234, %234 : vector<32x256xf32>
      %cst_101 = arith.constant dense<0.000000e+00> : vector<32xf32>
      %236 = vector.multi_reduction <add>, %235, %cst_101 [1] : vector<32x256xf32> to vector<32xf32>
      %237 = vector.shape_cast %236 : vector<32xf32> to vector<32x1xf32>
      %cst_102 = arith.constant 2.560000e+02 : f32
      %238 = vector.broadcast %cst_102 : f32 to vector<32x1xf32>
      %239 = arith.divf %237, %238 : vector<32x1xf32>
      %cst_103 = arith.constant 9.99999974E-6 : f32
      %240 = vector.broadcast %cst_103 : f32 to vector<32x1xf32>
      %241 = arith.addf %239, %240 : vector<32x1xf32>
      %242 = math.rsqrt %241 : vector<32x1xf32>
      %243 = vector.broadcast %242 : vector<32x1xf32> to vector<32x256xf32>
      %244 = arith.mulf %234, %243 : vector<32x256xf32>
      %245 = vector.broadcast %227 : vector<1x256xf32> to vector<32x256xf32>
      %246 = arith.mulf %244, %245 : vector<32x256xf32>
      %247 = vector.broadcast %228 : vector<1x256xf32> to vector<32x256xf32>
      %248 = arith.addf %246, %247 : vector<32x256xf32>
      %c0_104 = arith.constant 0 : index
      %c0_105 = arith.constant 0 : index
      %249 = vector.load %arg21[%c0_104, %c0_105] : memref<32x256xf32, #tpu.memory_space<vmem>>, vector<32x256xf32>
      tpu.vector_store %arg21[%c0_104, %c0_105], %248 {strides = array<i32>} : memref<32x256xf32, #tpu.memory_space<vmem>>, vector<32x256xf32>,
    } else {
    }
    %c0 = arith.constant 0 : index
    %c0_1 = arith.constant 0 : index
    %3 = vector.load %arg21[%c0, %c0_1] : memref<32x256xf32, #tpu.memory_space<vmem>>, vector<32x256xf32>
    %4 = arith.truncf %3 : vector<32x256xf32> to vector<32x256xbf16>
    %c0_2 = arith.constant 0 : index
    %c0_3 = arith.constant 0 : index
    %c0_4 = arith.constant 0 : index
    %5 = vector.load %arg5[%c0_2, %c0_3, %c0_4] : memref<1x256x768xbf16, #tpu.memory_space<vmem>>, vector<1x256x768xbf16>
    %6 = vector.shape_cast %5 : vector<1x256x768xbf16> to vector<256x768xbf16>
    %c0_5 = arith.constant 0 : index
    %c0_6 = arith.constant 0 : index
    %c0_7 = arith.constant 0 : index
    %7 = vector.load %arg7[%c0_5, %c0_6, %c0_7] : memref<1x256x256xbf16, #tpu.memory_space<vmem>>, vector<1x256x256xbf16>
    %8 = vector.shape_cast %7 : vector<1x256x256xbf16> to vector<256x256xbf16>
    %c0_8 = arith.constant 0 : index
    %c0_9 = arith.constant 0 : index
    %c0_10 = arith.constant 0 : index
    %9 = vector.load %arg11[%c0_8, %c0_9, %c0_10] : memref<1x256x512xbf16, #tpu.memory_space<vmem>>, vector<1x256x512xbf16>
    %10 = vector.shape_cast %9 : vector<1x256x512xbf16> to vector<256x512xbf16>
    %c0_11 = arith.constant 0 : index
    %c0_12 = arith.constant 0 : index
    %c0_13 = arith.constant 0 : index
    %11 = vector.load %arg13[%c0_11, %c0_12, %c0_13] : memref<1x512x256xbf16, #tpu.memory_space<vmem>>, vector<1x512x256xbf16>
    %12 = vector.shape_cast %11 : vector<1x512x256xbf16> to vector<512x256xbf16>
    %c0_14 = arith.constant 0 : index
    %c0_15 = arith.constant 0 : index
    %c0_16 = arith.constant 0 : index
    %13 = vector.load %arg6[%c0_14, %c0_15, %c0_16] : memref<1x1x768xf32, #tpu.memory_space<vmem>>, vector<1x1x768xf32>
    %14 = vector.shape_cast %13 : vector<1x1x768xf32> to vector<1x768xf32>
    %c0_17 = arith.constant 0 : index
    %c0_18 = arith.constant 0 : index
    %c0_19 = arith.constant 0 : index
    %15 = vector.load %arg8[%c0_17, %c0_18, %c0_19] : memref<1x1x256xf32, #tpu.memory_space<vmem>>, vector<1x1x256xf32>
    %16 = vector.shape_cast %15 : vector<1x1x256xf32> to vector<1x256xf32>
    %c0_20 = arith.constant 0 : index
    %c0_21 = arith.constant 0 : index
    %c0_22 = arith.constant 0 : index
    %17 = vector.load %arg12[%c0_20, %c0_21, %c0_22] : memref<1x1x512xf32, #tpu.memory_space<vmem>>, vector<1x1x512xf32>
    %18 = vector.shape_cast %17 : vector<1x1x512xf32> to vector<1x512xf32>
    %c0_23 = arith.constant 0 : index
    %c0_24 = arith.constant 0 : index
    %c0_25 = arith.constant 0 : index
    %19 = vector.load %arg14[%c0_23, %c0_24, %c0_25] : memref<1x1x256xf32, #tpu.memory_space<vmem>>, vector<1x1x256xf32>
    %20 = vector.shape_cast %19 : vector<1x1x256xf32> to vector<1x256xf32>
    %cst = arith.constant dense<0.000000e+00> : vector<32x768xf32>
    %21 = tpu.matmul %4, %6, %cst {dimension_numbers = #tpu.dot_dimension_numbers<[1], [0], [0], [1], [0, 0, 1, 1], [], []>} : vector<32x256xbf16>, vector<256x768xbf16>, vector<32x768xf32> -> vector<32x768xf32>
    %22 = vector.broadcast %14 : vector<1x768xf32> to vector<32x768xf32>
    %23 = arith.addf %21, %22 : vector<32x768xf32>
    %c0_26 = arith.constant 0 : index
    %c0_27 = arith.constant 0 : index
    %c0_28 = arith.constant 0 : index
    %24 = vector.load %arg2[%c0_26, %c0_27, %c0_28] : memref<2x1x16xf32, #tpu.memory_space<vmem>>, vector<1x1x16xf32>
    %25 = vector.shape_cast %24 : vector<1x1x16xf32> to vector<1x16xf32>
    %26 = vector.shape_cast %25 : vector<1x16xf32> to vector<1x16xf32>
    %27 = vector.broadcast %26 : vector<1x16xf32> to vector<16x16xf32>
    %28 = vector.extract_strided_slice %23 {offsets = [0, 0], sizes = [16, 256], strides = [1, 1]} : vector<32x768xf32> to vector<16x256xf32>
    %29 = vector.extract_strided_slice %23 {offsets = [0, 256], sizes = [16, 256], strides = [1, 1]} : vector<32x768xf32> to vector<16x256xf32>
    %30 = vector.extract_strided_slice %23 {offsets = [0, 512], sizes = [16, 256], strides = [1, 1]} : vector<32x768xf32> to vector<16x256xf32>
    %cst_29 = arith.constant 0.000000e+00 : f32
    %31 = vector.broadcast %cst_29 : f32 to vector<16x256xf32>
    %32 = vector.extract_strided_slice %28 {offsets = [0, 0], sizes = [16, 128], strides = [1, 1]} : vector<16x256xf32> to vector<16x128xf32>
    %cst_30 = arith.constant 0.0883883461 : f32
    %33 = vector.broadcast %cst_30 : f32 to vector<16x128xf32>
    %34 = arith.mulf %32, %33 : vector<16x128xf32>
    %35 = arith.truncf %34 : vector<16x128xf32> to vector<16x128xbf16>
    %36 = vector.extract_strided_slice %29 {offsets = [0, 0], sizes = [16, 128], strides = [1, 1]} : vector<16x256xf32> to vector<16x128xf32>
    %37 = arith.truncf %36 : vector<16x128xf32> to vector<16x128xbf16>
    %38 = vector.extract_strided_slice %30 {offsets = [0, 0], sizes = [16, 128], strides = [1, 1]} : vector<16x256xf32> to vector<16x128xf32>
    %39 = arith.truncf %38 : vector<16x128xf32> to vector<16x128xbf16>
    %cst_31 = arith.constant dense<0.000000e+00> : vector<16x16xf32>
    %40 = tpu.matmul %35, %37, %cst_31 {dimension_numbers = #tpu.dot_dimension_numbers<[1], [1], [0], [0], [0, 0, 1, 0], [], []>} : vector<16x128xbf16>, vector<16x128xbf16>, vector<16x16xf32> -> vector<16x16xf32>
    %41 = arith.addf %40, %27 : vector<16x16xf32>
    %cst_32 = arith.constant dense<0xFF800000> : vector<16xf32>
    %42 = vector.multi_reduction <maximumf>, %41, %cst_32 [1] : vector<16x16xf32> to vector<16xf32>
    %43 = vector.shape_cast %42 : vector<16xf32> to vector<16x1xf32>
    %44 = vector.broadcast %43 : vector<16x1xf32> to vector<16x16xf32>
    %45 = arith.subf %41, %44 : vector<16x16xf32>
    %46 = math.exp %45 : vector<16x16xf32>
    %cst_33 = arith.constant dense<0.000000e+00> : vector<16xf32>
    %47 = vector.multi_reduction <add>, %46, %cst_33 [1] : vector<16x16xf32> to vector<16xf32>
    %48 = vector.shape_cast %47 : vector<16xf32> to vector<16x1xf32>
    %49 = tpu.reciprocal %48 {approx = true} : vector<16x1xf32> -> vector<16x1xf32>
    %50 = vector.broadcast %49 : vector<16x1xf32> to vector<16x16xf32>
    %51 = arith.mulf %46, %50 : vector<16x16xf32>
    %52 = arith.truncf %51 : vector<16x16xf32> to vector<16x16xbf16>
    %cst_34 = arith.constant dense<0.000000e+00> : vector<16x128xf32>
    %53 = tpu.matmul %52, %39, %cst_34 {dimension_numbers = #tpu.dot_dimension_numbers<[1], [0], [0], [1], [0, 0, 1, 1], [], []>} : vector<16x16xbf16>, vector<16x128xbf16>, vector<16x128xf32> -> vector<16x128xf32>
    %54 = arith.truncf %53 : vector<16x128xf32> to vector<16x128xbf16>
    %55 = vector.extract_strided_slice %8 {offsets = [0, 0], sizes = [128, 256], strides = [1, 1]} : vector<256x256xbf16> to vector<128x256xbf16>
    %cst_35 = arith.constant dense<0.000000e+00> : vector<16x256xf32>
    %56 = tpu.matmul %54, %55, %cst_35 {dimension_numbers = #tpu.dot_dimension_numbers<[1], [0], [0], [1], [0, 0, 1, 1], [], []>} : vector<16x128xbf16>, vector<128x256xbf16>, vector<16x256xf32> -> vector<16x256xf32>
    %57 = arith.addf %31, %56 : vector<16x256xf32>
    %58 = vector.extract_strided_slice %28 {offsets = [0, 128], sizes = [16, 128], strides = [1, 1]} : vector<16x256xf32> to vector<16x128xf32>
    %cst_36 = arith.constant 0.0883883461 : f32
    %59 = vector.broadcast %cst_36 : f32 to vector<16x128xf32>
    %60 = arith.mulf %58, %59 : vector<16x128xf32>
    %61 = arith.truncf %60 : vector<16x128xf32> to vector<16x128xbf16>
    %62 = vector.extract_strided_slice %29 {offsets = [0, 128], sizes = [16, 128], strides = [1, 1]} : vector<16x256xf32> to vector<16x128xf32>
    %63 = arith.truncf %62 : vector<16x128xf32> to vector<16x128xbf16>
    %64 = vector.extract_strided_slice %30 {offsets = [0, 128], sizes = [16, 128], strides = [1, 1]} : vector<16x256xf32> to vector<16x128xf32>
    %65 = arith.truncf %64 : vector<16x128xf32> to vector<16x128xbf16>
    %cst_37 = arith.constant dense<0.000000e+00> : vector<16x16xf32>
    %66 = tpu.matmul %61, %63, %cst_37 {dimension_numbers = #tpu.dot_dimension_numbers<[1], [1], [0], [0], [0, 0, 1, 0], [], []>} : vector<16x128xbf16>, vector<16x128xbf16>, vector<16x16xf32> -> vector<16x16xf32>
    %67 = arith.addf %66, %27 : vector<16x16xf32>
    %cst_38 = arith.constant dense<0xFF800000> : vector<16xf32>
    %68 = vector.multi_reduction <maximumf>, %67, %cst_38 [1] : vector<16x16xf32> to vector<16xf32>
    %69 = vector.shape_cast %68 : vector<16xf32> to vector<16x1xf32>
    %70 = vector.broadcast %69 : vector<16x1xf32> to vector<16x16xf32>
    %71 = arith.subf %67, %70 : vector<16x16xf32>
    %72 = math.exp %71 : vector<16x16xf32>
    %cst_39 = arith.constant dense<0.000000e+00> : vector<16xf32>
    %73 = vector.multi_reduction <add>, %72, %cst_39 [1] : vector<16x16xf32> to vector<16xf32>
    %74 = vector.shape_cast %73 : vector<16xf32> to vector<16x1xf32>
    %75 = tpu.reciprocal %74 {approx = true} : vector<16x1xf32> -> vector<16x1xf32>
    %76 = vector.broadcast %75 : vector<16x1xf32> to vector<16x16xf32>
    %77 = arith.mulf %72, %76 : vector<16x16xf32>
    %78 = arith.truncf %77 : vector<16x16xf32> to vector<16x16xbf16>
    %cst_40 = arith.constant dense<0.000000e+00> : vector<16x128xf32>
    %79 = tpu.matmul %78, %65, %cst_40 {dimension_numbers = #tpu.dot_dimension_numbers<[1], [0], [0], [1], [0, 0, 1, 1], [], []>} : vector<16x16xbf16>, vector<16x128xbf16>, vector<16x128xf32> -> vector<16x128xf32>
    %80 = arith.truncf %79 : vector<16x128xf32> to vector<16x128xbf16>
    %81 = vector.extract_strided_slice %8 {offsets = [128, 0], sizes = [128, 256], strides = [1, 1]} : vector<256x256xbf16> to vector<128x256xbf16>
    %cst_41 = arith.constant dense<0.000000e+00> : vector<16x256xf32>
    %82 = tpu.matmul %80, %81, %cst_41 {dimension_numbers = #tpu.dot_dimension_numbers<[1], [0], [0], [1], [0, 0, 1, 1], [], []>} : vector<16x128xbf16>, vector<128x256xbf16>, vector<16x256xf32> -> vector<16x256xf32>
    %83 = arith.addf %57, %82 : vector<16x256xf32>
    %84 = vector.broadcast %16 : vector<1x256xf32> to vector<16x256xf32>
    %85 = arith.addf %83, %84 : vector<16x256xf32>
    %c0_42 = arith.constant 0 : index
    %c0_43 = arith.constant 0 : index
    %86 = vector.load %arg22[%c0_42, %c0_43] : memref<32x256xf32, #tpu.memory_space<vmem>>, vector<16x256xf32>
    tpu.vector_store %arg22[%c0_42, %c0_43], %85 {strides = array<i32>} : memref<32x256xf32, #tpu.memory_space<vmem>>, vector<16x256xf32>,
    %c1 = arith.constant 1 : index
    %c0_44 = arith.constant 0 : index
    %c0_45 = arith.constant 0 : index
    %87 = vector.load %arg2[%c1, %c0_44, %c0_45] : memref<2x1x16xf32, #tpu.memory_space<vmem>>, vector<1x1x16xf32>
    %88 = vector.shape_cast %87 : vector<1x1x16xf32> to vector<1x16xf32>
    %89 = vector.shape_cast %88 : vector<1x16xf32> to vector<1x16xf32>
    %90 = vector.broadcast %89 : vector<1x16xf32> to vector<16x16xf32>
    %91 = vector.extract_strided_slice %23 {offsets = [16, 0], sizes = [16, 256], strides = [1, 1]} : vector<32x768xf32> to vector<16x256xf32>
    %92 = vector.extract_strided_slice %23 {offsets = [16, 256], sizes = [16, 256], strides = [1, 1]} : vector<32x768xf32> to vector<16x256xf32>
    %93 = vector.extract_strided_slice %23 {offsets = [16, 512], sizes = [16, 256], strides = [1, 1]} : vector<32x768xf32> to vector<16x256xf32>
    %cst_46 = arith.constant 0.000000e+00 : f32
    %94 = vector.broadcast %cst_46 : f32 to vector<16x256xf32>
    %95 = vector.extract_strided_slice %91 {offsets = [0, 0], sizes = [16, 128], strides = [1, 1]} : vector<16x256xf32> to vector<16x128xf32>
    %cst_47 = arith.constant 0.0883883461 : f32
    %96 = vector.broadcast %cst_47 : f32 to vector<16x128xf32>
    %97 = arith.mulf %95, %96 : vector<16x128xf32>
    %98 = arith.truncf %97 : vector<16x128xf32> to vector<16x128xbf16>
    %99 = vector.extract_strided_slice %92 {offsets = [0, 0], sizes = [16, 128], strides = [1, 1]} : vector<16x256xf32> to vector<16x128xf32>
    %100 = arith.truncf %99 : vector<16x128xf32> to vector<16x128xbf16>
    %101 = vector.extract_strided_slice %93 {offsets = [0, 0], sizes = [16, 128], strides = [1, 1]} : vector<16x256xf32> to vector<16x128xf32>
    %102 = arith.truncf %101 : vector<16x128xf32> to vector<16x128xbf16>
    %cst_48 = arith.constant dense<0.000000e+00> : vector<16x16xf32>
    %103 = tpu.matmul %98, %100, %cst_48 {dimension_numbers = #tpu.dot_dimension_numbers<[1], [1], [0], [0], [0, 0, 1, 0], [], []>} : vector<16x128xbf16>, vector<16x128xbf16>, vector<16x16xf32> -> vector<16x16xf32>
    %104 = arith.addf %103, %90 : vector<16x16xf32>
    %cst_49 = arith.constant dense<0xFF800000> : vector<16xf32>
    %105 = vector.multi_reduction <maximumf>, %104, %cst_49 [1] : vector<16x16xf32> to vector<16xf32>
    %106 = vector.shape_cast %105 : vector<16xf32> to vector<16x1xf32>
    %107 = vector.broadcast %106 : vector<16x1xf32> to vector<16x16xf32>
    %108 = arith.subf %104, %107 : vector<16x16xf32>
    %109 = math.exp %108 : vector<16x16xf32>
    %cst_50 = arith.constant dense<0.000000e+00> : vector<16xf32>
    %110 = vector.multi_reduction <add>, %109, %cst_50 [1] : vector<16x16xf32> to vector<16xf32>
    %111 = vector.shape_cast %110 : vector<16xf32> to vector<16x1xf32>
    %112 = tpu.reciprocal %111 {approx = true} : vector<16x1xf32> -> vector<16x1xf32>
    %113 = vector.broadcast %112 : vector<16x1xf32> to vector<16x16xf32>
    %114 = arith.mulf %109, %113 : vector<16x16xf32>
    %115 = arith.truncf %114 : vector<16x16xf32> to vector<16x16xbf16>
    %cst_51 = arith.constant dense<0.000000e+00> : vector<16x128xf32>
    %116 = tpu.matmul %115, %102, %cst_51 {dimension_numbers = #tpu.dot_dimension_numbers<[1], [0], [0], [1], [0, 0, 1, 1], [], []>} : vector<16x16xbf16>, vector<16x128xbf16>, vector<16x128xf32> -> vector<16x128xf32>
    %117 = arith.truncf %116 : vector<16x128xf32> to vector<16x128xbf16>
    %118 = vector.extract_strided_slice %8 {offsets = [0, 0], sizes = [128, 256], strides = [1, 1]} : vector<256x256xbf16> to vector<128x256xbf16>
    %cst_52 = arith.constant dense<0.000000e+00> : vector<16x256xf32>
    %119 = tpu.matmul %117, %118, %cst_52 {dimension_numbers = #tpu.dot_dimension_numbers<[1], [0], [0], [1], [0, 0, 1, 1], [], []>} : vector<16x128xbf16>, vector<128x256xbf16>, vector<16x256xf32> -> vector<16x256xf32>
    %120 = arith.addf %94, %119 : vector<16x256xf32>
    %121 = vector.extract_strided_slice %91 {offsets = [0, 128], sizes = [16, 128], strides = [1, 1]} : vector<16x256xf32> to vector<16x128xf32>
    %cst_53 = arith.constant 0.0883883461 : f32
    %122 = vector.broadcast %cst_53 : f32 to vector<16x128xf32>
    %123 = arith.mulf %121, %122 : vector<16x128xf32>
    %124 = arith.truncf %123 : vector<16x128xf32> to vector<16x128xbf16>
    %125 = vector.extract_strided_slice %92 {offsets = [0, 128], sizes = [16, 128], strides = [1, 1]} : vector<16x256xf32> to vector<16x128xf32>
    %126 = arith.truncf %125 : vector<16x128xf32> to vector<16x128xbf16>
    %127 = vector.extract_strided_slice %93 {offsets = [0, 128], sizes = [16, 128], strides = [1, 1]} : vector<16x256xf32> to vector<16x128xf32>
    %128 = arith.truncf %127 : vector<16x128xf32> to vector<16x128xbf16>
    %cst_54 = arith.constant dense<0.000000e+00> : vector<16x16xf32>
    %129 = tpu.matmul %124, %126, %cst_54 {dimension_numbers = #tpu.dot_dimension_numbers<[1], [1], [0], [0], [0, 0, 1, 0], [], []>} : vector<16x128xbf16>, vector<16x128xbf16>, vector<16x16xf32> -> vector<16x16xf32>
    %130 = arith.addf %129, %90 : vector<16x16xf32>
    %cst_55 = arith.constant dense<0xFF800000> : vector<16xf32>
    %131 = vector.multi_reduction <maximumf>, %130, %cst_55 [1] : vector<16x16xf32> to vector<16xf32>
    %132 = vector.shape_cast %131 : vector<16xf32> to vector<16x1xf32>
    %133 = vector.broadcast %132 : vector<16x1xf32> to vector<16x16xf32>
    %134 = arith.subf %130, %133 : vector<16x16xf32>
    %135 = math.exp %134 : vector<16x16xf32>
    %cst_56 = arith.constant dense<0.000000e+00> : vector<16xf32>
    %136 = vector.multi_reduction <add>, %135, %cst_56 [1] : vector<16x16xf32> to vector<16xf32>
    %137 = vector.shape_cast %136 : vector<16xf32> to vector<16x1xf32>
    %138 = tpu.reciprocal %137 {approx = true} : vector<16x1xf32> -> vector<16x1xf32>
    %139 = vector.broadcast %138 : vector<16x1xf32> to vector<16x16xf32>
    %140 = arith.mulf %135, %139 : vector<16x16xf32>
    %141 = arith.truncf %140 : vector<16x16xf32> to vector<16x16xbf16>
    %cst_57 = arith.constant dense<0.000000e+00> : vector<16x128xf32>
    %142 = tpu.matmul %141, %128, %cst_57 {dimension_numbers = #tpu.dot_dimension_numbers<[1], [0], [0], [1], [0, 0, 1, 1], [], []>} : vector<16x16xbf16>, vector<16x128xbf16>, vector<16x128xf32> -> vector<16x128xf32>
    %143 = arith.truncf %142 : vector<16x128xf32> to vector<16x128xbf16>
    %144 = vector.extract_strided_slice %8 {offsets = [128, 0], sizes = [128, 256], strides = [1, 1]} : vector<256x256xbf16> to vector<128x256xbf16>
    %cst_58 = arith.constant dense<0.000000e+00> : vector<16x256xf32>
    %145 = tpu.matmul %143, %144, %cst_58 {dimension_numbers = #tpu.dot_dimension_numbers<[1], [0], [0], [1], [0, 0, 1, 1], [], []>} : vector<16x128xbf16>, vector<128x256xbf16>, vector<16x256xf32> -> vector<16x256xf32>
    %146 = arith.addf %120, %145 : vector<16x256xf32>
    %147 = vector.broadcast %16 : vector<1x256xf32> to vector<16x256xf32>
    %148 = arith.addf %146, %147 : vector<16x256xf32>
    %c16 = arith.constant 16 : index
    %c0_59 = arith.constant 0 : index
    %149 = vector.load %arg22[%c16, %c0_59] : memref<32x256xf32, #tpu.memory_space<vmem>>, vector<16x256xf32>
    tpu.vector_store %arg22[%c16, %c0_59], %148 {strides = array<i32>} : memref<32x256xf32, #tpu.memory_space<vmem>>, vector<16x256xf32>,
    %c0_60 = arith.constant 0 : index
    %c0_61 = arith.constant 0 : index
    %150 = vector.load %arg22[%c0_60, %c0_61] : memref<32x256xf32, #tpu.memory_space<vmem>>, vector<32x256xf32>
    %151 = arith.addf %3, %150 : vector<32x256xf32>
    %c0_62 = arith.constant 0 : index
    %c0_63 = arith.constant 0 : index
    %c0_64 = arith.constant 0 : index
    %152 = vector.load %arg9[%c0_62, %c0_63, %c0_64] : memref<1x1x256xf32, #tpu.memory_space<vmem>>, vector<1x1x256xf32>
    %153 = vector.shape_cast %152 : vector<1x1x256xf32> to vector<1x256xf32>
    %c0_65 = arith.constant 0 : index
    %c0_66 = arith.constant 0 : index
    %c0_67 = arith.constant 0 : index
    %154 = vector.load %arg10[%c0_65, %c0_66, %c0_67] : memref<1x1x256xf32, #tpu.memory_space<vmem>>, vector<1x1x256xf32>
    %155 = vector.shape_cast %154 : vector<1x1x256xf32> to vector<1x256xf32>
    %cst_68 = arith.constant dense<0.000000e+00> : vector<32xf32>
    %156 = vector.multi_reduction <add>, %151, %cst_68 [1] : vector<32x256xf32> to vector<32xf32>
    %157 = vector.shape_cast %156 : vector<32xf32> to vector<32x1xf32>
    %cst_69 = arith.constant 2.560000e+02 : f32
    %158 = vector.broadcast %cst_69 : f32 to vector<32x1xf32>
    %159 = arith.divf %157, %158 : vector<32x1xf32>
    %160 = vector.broadcast %159 : vector<32x1xf32> to vector<32x256xf32>
    %161 = arith.subf %151, %160 : vector<32x256xf32>
    %162 = arith.mulf %161, %161 : vector<32x256xf32>
    %cst_70 = arith.constant dense<0.000000e+00> : vector<32xf32>
    %163 = vector.multi_reduction <add>, %162, %cst_70 [1] : vector<32x256xf32> to vector<32xf32>
    %164 = vector.shape_cast %163 : vector<32xf32> to vector<32x1xf32>
    %cst_71 = arith.constant 2.560000e+02 : f32
    %165 = vector.broadcast %cst_71 : f32 to vector<32x1xf32>
    %166 = arith.divf %164, %165 : vector<32x1xf32>
    %cst_72 = arith.constant 9.99999974E-6 : f32
    %167 = vector.broadcast %cst_72 : f32 to vector<32x1xf32>
    %168 = arith.addf %166, %167 : vector<32x1xf32>
    %169 = math.rsqrt %168 : vector<32x1xf32>
    %170 = vector.broadcast %169 : vector<32x1xf32> to vector<32x256xf32>
    %171 = arith.mulf %161, %170 : vector<32x256xf32>
    %172 = vector.broadcast %153 : vector<1x256xf32> to vector<32x256xf32>
    %173 = arith.mulf %171, %172 : vector<32x256xf32>
    %174 = vector.broadcast %155 : vector<1x256xf32> to vector<32x256xf32>
    %175 = arith.addf %173, %174 : vector<32x256xf32>
    %176 = arith.truncf %175 : vector<32x256xf32> to vector<32x256xbf16>
    %cst_73 = arith.constant dense<0.000000e+00> : vector<32x512xf32>
    %177 = tpu.matmul %176, %10, %cst_73 {dimension_numbers = #tpu.dot_dimension_numbers<[1], [0], [0], [1], [0, 0, 1, 1], [], []>} : vector<32x256xbf16>, vector<256x512xbf16>, vector<32x512xf32> -> vector<32x512xf32>
    %178 = vector.broadcast %18 : vector<1x512xf32> to vector<32x512xf32>
    %179 = arith.addf %177, %178 : vector<32x512xf32>
    %cst_74 = arith.constant 5.000000e-01 : f32
    %180 = vector.broadcast %cst_74 : f32 to vector<32x512xf32>
    %181 = arith.mulf %180, %179 : vector<32x512xf32>
    %cst_75 = arith.constant 4.471500e-02 : f32
    %182 = vector.broadcast %cst_75 : f32 to vector<32x512xf32>
    %183 = arith.mulf %182, %179 : vector<32x512xf32>
    %184 = arith.mulf %183, %179 : vector<32x512xf32>
    %185 = arith.mulf %184, %179 : vector<32x512xf32>
    %186 = arith.addf %179, %185 : vector<32x512xf32>
    %cst_76 = arith.constant 0.797884583 : f32
    %187 = vector.broadcast %cst_76 : f32 to vector<32x512xf32>
    %188 = arith.mulf %187, %186 : vector<32x512xf32>
    %189 = math.tanh %188 : vector<32x512xf32>
    %cst_77 = arith.constant 1.000000e+00 : f32
    %190 = vector.broadcast %cst_77 : f32 to vector<32x512xf32>
    %191 = arith.addf %190, %189 : vector<32x512xf32>
    %192 = arith.mulf %181, %191 : vector<32x512xf32>
    %193 = arith.truncf %192 : vector<32x512xf32> to vector<32x512xbf16>
    %cst_78 = arith.constant dense<0.000000e+00> : vector<32x256xf32>
    %194 = tpu.matmul %193, %12, %cst_78 {dimension_numbers = #tpu.dot_dimension_numbers<[1], [0], [0], [1], [0, 0, 1, 1], [], []>} : vector<32x512xbf16>, vector<512x256xbf16>, vector<32x256xf32> -> vector<32x256xf32>
    %195 = vector.broadcast %20 : vector<1x256xf32> to vector<32x256xf32>
    %196 = arith.addf %194, %195 : vector<32x256xf32>
    %197 = arith.addf %175, %196 : vector<32x256xf32>
    %c0_79 = arith.constant 0 : index
    %c0_80 = arith.constant 0 : index
    %c0_81 = arith.constant 0 : index
    %198 = vector.load %arg15[%c0_79, %c0_80, %c0_81] : memref<1x1x256xf32, #tpu.memory_space<vmem>>, vector<1x1x256xf32>
    %199 = vector.shape_cast %198 : vector<1x1x256xf32> to vector<1x256xf32>
    %c0_82 = arith.constant 0 : index
    %c0_83 = arith.constant 0 : index
    %c0_84 = arith.constant 0 : index
    %200 = vector.load %arg16[%c0_82, %c0_83, %c0_84] : memref<1x1x256xf32, #tpu.memory_space<vmem>>, vector<1x1x256xf32>
    %201 = vector.shape_cast %200 : vector<1x1x256xf32> to vector<1x256xf32>
    %cst_85 = arith.constant dense<0.000000e+00> : vector<32xf32>
    %202 = vector.multi_reduction <add>, %197, %cst_85 [1] : vector<32x256xf32> to vector<32xf32>
    %203 = vector.shape_cast %202 : vector<32xf32> to vector<32x1xf32>
    %cst_86 = arith.constant 2.560000e+02 : f32
    %204 = vector.broadcast %cst_86 : f32 to vector<32x1xf32>
    %205 = arith.divf %203, %204 : vector<32x1xf32>
    %206 = vector.broadcast %205 : vector<32x1xf32> to vector<32x256xf32>
    %207 = arith.subf %197, %206 : vector<32x256xf32>
    %208 = arith.mulf %207, %207 : vector<32x256xf32>
    %cst_87 = arith.constant dense<0.000000e+00> : vector<32xf32>
    %209 = vector.multi_reduction <add>, %208, %cst_87 [1] : vector<32x256xf32> to vector<32xf32>
    %210 = vector.shape_cast %209 : vector<32xf32> to vector<32x1xf32>
    %cst_88 = arith.constant 2.560000e+02 : f32
    %211 = vector.broadcast %cst_88 : f32 to vector<32x1xf32>
    %212 = arith.divf %210, %211 : vector<32x1xf32>
    %cst_89 = arith.constant 9.99999974E-6 : f32
    %213 = vector.broadcast %cst_89 : f32 to vector<32x1xf32>
    %214 = arith.addf %212, %213 : vector<32x1xf32>
    %215 = math.rsqrt %214 : vector<32x1xf32>
    %216 = vector.broadcast %215 : vector<32x1xf32> to vector<32x256xf32>
    %217 = arith.mulf %207, %216 : vector<32x256xf32>
    %218 = vector.broadcast %199 : vector<1x256xf32> to vector<32x256xf32>
    %219 = arith.mulf %217, %218 : vector<32x256xf32>
    %220 = vector.broadcast %201 : vector<1x256xf32> to vector<32x256xf32>
    %221 = arith.addf %219, %220 : vector<32x256xf32>
    %c0_90 = arith.constant 0 : index
    %c0_91 = arith.constant 0 : index
    %222 = vector.load %arg21[%c0_90, %c0_91] : memref<32x256xf32, #tpu.memory_space<vmem>>, vector<32x256xf32>
    tpu.vector_store %arg21[%c0_90, %c0_91], %221 {strides = array<i32>} : memref<32x256xf32, #tpu.memory_space<vmem>>, vector<32x256xf32>,
    %c1_i32 = arith.constant 1 : i32
    %223 = arith.cmpi eq, %arg0, %c1_i32 : i32
    %224 = arith.extui %223 : i1 to i32
    %c0_i32_92 = arith.constant 0 : i32
    %225 = arith.cmpi ne, %224, %c0_i32_92 : i32
    scf.if %225 {
      %c0_93 = arith.constant 0 : index
      %c0_94 = arith.constant 0 : index
      %226 = vector.load %arg19[%c0_93, %c0_94] : memref<32x256xf32, #tpu.memory_space<vmem>>, vector<32x256xf32>
      tpu.vector_store %arg19[%c0_93, %c0_94], %221 {strides = array<i32>} : memref<32x256xf32, #tpu.memory_space<vmem>>, vector<32x256xf32>,
      %227 = vector.extract_strided_slice %221 {offsets = [0, 0], sizes = [1, 256], strides = [1, 1]} : vector<32x256xf32> to vector<1x256xf32>
      %228 = vector.extract_strided_slice %221 {offsets = [16, 0], sizes = [1, 256], strides = [1, 1]} : vector<32x256xf32> to vector<1x256xf32>
      %229 = tpu.concatenate %227, %228 in 0 : vector<1x256xf32>, vector<1x256xf32> -> vector<2x256xf32>
      %230 = arith.truncf %229 : vector<2x256xf32> to vector<2x256xbf16>
      %c0_95 = arith.constant 0 : index
      %c0_96 = arith.constant 0 : index
      %231 = vector.load %arg17[%c0_95, %c0_96] : memref<256x256xbf16, #tpu.memory_space<vmem>>, vector<256x256xbf16>
      %cst_97 = arith.constant dense<0.000000e+00> : vector<2x256xf32>
      %232 = tpu.matmul %230, %231, %cst_97 {dimension_numbers = #tpu.dot_dimension_numbers<[1], [0], [0], [1], [0, 0, 1, 1], [], []>} : vector<2x256xbf16>, vector<256x256xbf16>, vector<2x256xf32> -> vector<2x256xf32>
      %c0_98 = arith.constant 0 : index
      %c0_99 = arith.constant 0 : index
      %233 = vector.load %arg18[%c0_98, %c0_99] : memref<1x256xf32, #tpu.memory_space<vmem>>, vector<1x256xf32>
      %234 = vector.broadcast %233 : vector<1x256xf32> to vector<2x256xf32>
      %235 = arith.addf %232, %234 : vector<2x256xf32>
      %236 = math.tanh %235 : vector<2x256xf32>
      %c0_100 = arith.constant 0 : index
      %c0_101 = arith.constant 0 : index
      %237 = vector.load %arg20[%c0_100, %c0_101] : memref<2x256xf32, #tpu.memory_space<vmem>>, vector<2x256xf32>
      tpu.vector_store %arg20[%c0_100, %c0_101], %236 {strides = array<i32>} : memref<2x256xf32, #tpu.memory_space<vmem>>, vector<2x256xf32>,
    } else {
    }
    return
  }
  func.func @transform_0(%arg0: i32) -> (i32, i32) {
    %c0_i32 = arith.constant 0 : i32
    %c0_i32_0 = arith.constant 0 : i32
    %c0_i32_1 = arith.constant 0 : i32
    return %c0_i32, %c0_i32_0 : i32, i32
  }
  func.func @transform_1(%arg0: i32) -> (i32, i32, i32) {
    %c0_i32 = arith.constant 0 : i32
    %c0_i32_0 = arith.constant 0 : i32
    %c0_i32_1 = arith.constant 0 : i32
    %c0_i32_2 = arith.constant 0 : i32
    return %c0_i32, %c0_i32_0, %c0_i32_1 : i32, i32, i32
  }
  func.func @transform_2(%arg0: i32) -> (i32, i32) {
    %c0_i32 = arith.constant 0 : i32
    %c0_i32_0 = arith.constant 0 : i32
    %c0_i32_1 = arith.constant 0 : i32
    return %c0_i32, %c0_i32_0 : i32, i32
  }
  func.func @transform_3(%arg0: i32) -> (i32, i32) {
    %c0_i32 = arith.constant 0 : i32
    %c0_i32_0 = arith.constant 0 : i32
    %c0_i32_1 = arith.constant 0 : i32
    return %c0_i32, %c0_i32_0 : i32, i32
  }
  func.func @transform_4(%arg0: i32) -> (i32, i32, i32) {
    %c0_i32 = arith.constant 0 : i32
    %c0_i32_0 = arith.constant 0 : i32
    %c0_i32_1 = arith.constant 0 : i32
    return %arg0, %c0_i32, %c0_i32_0 : i32, i32, i32
  }
  func.func @transform_5(%arg0: i32) -> (i32, i32, i32) {
    %c0_i32 = arith.constant 0 : i32
    %c0_i32_0 = arith.constant 0 : i32
    %c0_i32_1 = arith.constant 0 : i32
    return %arg0, %c0_i32, %c0_i32_0 : i32, i32, i32
  }
  func.func @transform_6(%arg0: i32) -> (i32, i32, i32) {
    %c0_i32 = arith.constant 0 : i32
    %c0_i32_0 = arith.constant 0 : i32
    %c0_i32_1 = arith.constant 0 : i32
    return %arg0, %c0_i32, %c0_i32_0 : i32, i32, i32
  }
  func.func @transform_7(%arg0: i32) -> (i32, i32, i32) {
    %c0_i32 = arith.constant 0 : i32
    %c0_i32_0 = arith.constant 0 : i32
    %c0_i32_1 = arith.constant 0 : i32
    return %arg0, %c0_i32, %c0_i32_0 : i32, i32, i32
  }
  func.func @transform_8(%arg0: i32) -> (i32, i32, i32) {
    %c0_i32 = arith.constant 0 : i32
    %c0_i32_0 = arith.constant 0 : i32
    %c0_i32_1 = arith.constant 0 : i32
    return %arg0, %c0_i32, %c0_i32_0 : i32, i32, i32
  }
  func.func @transform_9(%arg0: i32) -> (i32, i32, i32) {
    %c0_i32 = arith.constant 0 : i32
    %c0_i32_0 = arith.constant 0 : i32
    %c0_i32_1 = arith.constant 0 : i32
    return %arg0, %c0_i32, %c0_i32_0 : i32, i32, i32
  }
  func.func @transform_10(%arg0: i32) -> (i32, i32, i32) {
    %c0_i32 = arith.constant 0 : i32
    %c0_i32_0 = arith.constant 0 : i32
    %c0_i32_1 = arith.constant 0 : i32
    return %arg0, %c0_i32, %c0_i32_0 : i32, i32, i32
  }
  func.func @transform_11(%arg0: i32) -> (i32, i32, i32) {
    %c0_i32 = arith.constant 0 : i32
    %c0_i32_0 = arith.constant 0 : i32
    %c0_i32_1 = arith.constant 0 : i32
    return %arg0, %c0_i32, %c0_i32_0 : i32, i32, i32
  }
  func.func @transform_12(%arg0: i32) -> (i32, i32, i32) {
    %c0_i32 = arith.constant 0 : i32
    %c0_i32_0 = arith.constant 0 : i32
    %c0_i32_1 = arith.constant 0 : i32
    return %arg0, %c0_i32, %c0_i32_0 : i32, i32, i32
  }
  func.func @transform_13(%arg0: i32) -> (i32, i32, i32) {
    %c0_i32 = arith.constant 0 : i32
    %c0_i32_0 = arith.constant 0 : i32
    %c0_i32_1 = arith.constant 0 : i32
    return %arg0, %c0_i32, %c0_i32_0 : i32, i32, i32
  }
  func.func @transform_14(%arg0: i32) -> (i32, i32, i32) {
    %c0_i32 = arith.constant 0 : i32
    %c0_i32_0 = arith.constant 0 : i32
    %c0_i32_1 = arith.constant 0 : i32
    return %arg0, %c0_i32, %c0_i32_0 : i32, i32, i32
  }
  func.func @transform_15(%arg0: i32) -> (i32, i32, i32) {
    %c0_i32 = arith.constant 0 : i32
    %c0_i32_0 = arith.constant 0 : i32
    %c0_i32_1 = arith.constant 0 : i32
    return %arg0, %c0_i32, %c0_i32_0 : i32, i32, i32
  }
  func.func @transform_16(%arg0: i32) -> (i32, i32) {
    %c0_i32 = arith.constant 0 : i32
    %c0_i32_0 = arith.constant 0 : i32
    %c0_i32_1 = arith.constant 0 : i32
    return %c0_i32, %c0_i32_0 : i32, i32
  }
  func.func @transform_17(%arg0: i32) -> (i32, i32) {
    %c0_i32 = arith.constant 0 : i32
    %c0_i32_0 = arith.constant 0 : i32
    %c0_i32_1 = arith.constant 0 : i32
    return %c0_i32, %c0_i32_0 : i32, i32
  }
  func.func @transform_18(%arg0: i32) -> (i32, i32) {
    %c0_i32 = arith.constant 0 : i32
    %c0_i32_0 = arith.constant 0 : i32
    %c0_i32_1 = arith.constant 0 : i32
    return %c0_i32, %c0_i32_0 : i32, i32
  }
  func.func @transform_19(%arg0: i32) -> (i32, i32) {
    %c0_i32 = arith.constant 0 : i32
    %c0_i32_0 = arith.constant 0 : i32
    %c0_i32_1 = arith.constant 0 : i32
    return %c0_i32, %c0_i32_0 : i32, i32
  }
}

</mosaic_0001>

<bundles_post_ra>
// kernel: bert_encoder_forward.3
= control target key start
LH: loop header
LB: loop body
LE: loop exit
PB: predicated region body
PF: predicated region fallthrough
CT: control target
= control target key end

     0   :  { %s859_s0 = inlined_call_operand.vmem [shape: s32[2,8], index: 0, kind: input, shape index: {}]   ;;  %s860_s2 = inlined_call_operand.vmem [shape: f32[2,16,256], index: 2, kind: input, shape index: {}]   ;;  %s861_s3 = inlined_call_operand.hbm [shape: f32[2,8,256], index: 3, kind: output, shape index: {}]   ;;  %s862_s1 = inlined_call_operand.vmem [shape: s32[2], index: 1, kind: input, shape index: {}]  }
   0x1   :  { %s8_s14 = sshll.u32 %s859_s0, 4  ;;  %s12_s17 = sshll.u32 %s862_s1, 4  ;;  %s9_s14 = int_to_ptr.vmem [resolvable:$true] %s8_s14  ;;  %s13_s17 = int_to_ptr.vmem [resolvable:$true] %s12_s17 }
   0x2   :  { %s556_s18 = scalar_lea.vmem %s9_s14, 32  ;;  %p561_p1 = scmp.lt.s32.totalorder %s9_s14, %s9_s14 }
   0x3   :  { %p557_p0 = scmp.ne.s32.totalorder %s9_s14, %s556_s18  ;;  %p562_p2 = scmp.lt.s32.totalorder %s556_s18, %s556_s18 }
   0x5   :  { %p563_p3 = por %p562_p2, %p561_p1 }
   0x7   :  { %p564_p4 = pnand %p563_p3, %p557_p0 }
   0x9   :  { %567 = shalt.err (!%p564_p4)  }
   0xa   :  { %s646_s19 = smov [#allocation3]   ;;  %s568_s20 = scalar_lea.vmem %s13_s17, 16 }
   0xb   :  { %11 = dma.vmem_to_smem %s9_s14, 32, %s646_s19, [#allocation2] }
   0xc   :  { %p569_p5 = scmp.ne.s32.totalorder %s13_s17, %s568_s20  ;;  %p573_p6 = scmp.lt.s32.totalorder %s13_s17, %s13_s17 }
   0xd   :  { %p574_p7 = scmp.lt.s32.totalorder %s568_s20, %s568_s20 }
   0xf   :  { %p575_p8 = por %p574_p7, %p573_p6 }
  0x11   :  { %p576_p9 = pnand %p575_p8, %p569_p5 }
  0x13   :  { %579 = shalt.err (!%p576_p9)  }
  0x14   :  { %s647_s0 = smov [#allocation4]  }
  0x15   :  { %15 = dma.vmem_to_smem %s13_s17, 16, %s647_s0, [#allocation2] }
  0x16   :  { %624 = dma.done.wait [#allocation2], 48 }
  0x17   :  { %625 = vsyncadd [#allocation2], 4294967248 }
  0x18   :  { %17 = sfence }
  0x19   :  { %18 = vsyncpa [#allocation6], 0 }
  0x1a   :  { %20 = vsyncpa [#allocation6 + $0x1], 0  ;;  %s675_s1 = smov 0   ;;  %s677_s21 = smov 0  }
  0x1b   :  { %s679_s22 = smov 0   ;;  %s681_s23 = smov 0  }
  0x1c LB: > { %s696_s24 = sadd.s32 4294967295, %s644_s23   ;;  %s413_s25 = sadd.s32 4294967294, %s644_s23   ;;  %s644_s23 = sphi %s681_s23, %s870_s23   ;;  %s640_s22 = sphi %s679_s22, %s869_s22   ;;  %s636_s21 = sphi %s677_s21, %s868_s21   ;;  %s632_s1 = sphi %s675_s1, %s867_s1  }
  0x1d   : > { %s700_s26 = sadd.s32 1, %s644_s23   ;;  %s59_s27 = sadd.s32 1, %s640_s22 }
  0x1e   : > { %s56_s28 = ssub.s32 %s644_s23, %s700_s26  ;;  %p69_p10 = scmp.ne.s32.totalorder %s640_s22, %s636_s21 }
  0x1f   : > { %p57_p11 = scmp.eq.s32.totalorder %s56_s28, 0  ;;  %p70_p12 = scmp.eq.s32.totalorder %s696_s24, 1 }
  0x20   : > { %p75_p13 = scmp.ne.s32.totalorder %s636_s21, %s632_s1  ;;  %p76_p0 = scmp.eq.s32.totalorder %s413_s25, 1 }
  0x21   : > { %s711_s29 = scalar_select %p57_p11, %s640_s22, %s59_s27  }
  0x22   : > { %p713_p1 = por %p70_p12, %p69_p10  ;;  %p717_p2 = por %p76_p0, %p75_p13 }
  0x23   : > { %p416_p3 = scmp.ge.s32.totalorder %s644_s23, 1  ;;  %p102_p4 = scmp.lt.s32.totalorder %s644_s23, 3 }
  0x25   : > { %p103_p5 = pnand %p416_p3, %p102_p4 }
  0x26   : > { %s119_s5 = sand.u32 (!%p103_p5), 1, %s636_s21   ;;  %p122_p6 = scmp.lt.s32.totalorder (!%p103_p5), %s696_s24, 1  ;;  %v148_v1 = vlaneseq (!%p103_p5) }
  0x27   : > { %106 = sbr.rel (%p103_p5) target bundleno = 127 (0x7f), region = 24  ;;  %s727_s6 = sshll.u32 (!%p103_p5), %s119_s5, 4 }
  0x28   : > { %s730_s7 = sld [smem:[#allocation4 + %s696_s24]] (!%p103_p5)  ;;  %s733_s8 = sshll.u32 (!%p103_p5), %s696_s24, 7  ;;  %vm751_vm1 = vcmp.lt.s32.totalorder (!%p103_p5), %v148_v1, 256 }
  0x29   : > { %s129_s10 = sld [smem:[#allocation3 + %s733_s8]] (!%p103_p5)  ;;  %s154_s12 = sadd.s32 (!%p103_p5), 1, %s733_s8 }
  0x2a   : > { %s155_s16 = sld [smem:[#allocation3 + %s154_s12]] (!%p103_p5)  ;;  %s177_s17 = sadd.s32 (!%p103_p5), 2, %s733_s8 }
  0x2b   : > { %s178_s28 = sld [smem:[#allocation3 + %s177_s17]] (!%p103_p5)  ;;  %s762_s14 = scalar_lea.vmem (!%p103_p5), [#allocation5], %s727_s6 }
  0x2e   : > { %s123_s9 = scalar_select %p122_p6, %s696_s24, 1 }
  0x2f   : > { %p143_p7 = scmp.gt.s32.totalorder %s730_s7, 0  ;;  %p169_p8 = scmp.gt.s32.totalorder %s730_s7, 1 }
  0x30   : > { %s489_s11 = sshll.u32 %s123_s9, 5  ;;  %p192_p9 = scmp.gt.s32.totalorder %s730_s7, 2 }
  0x31   : > { %s741_s15 = scalar_lea.vmem %s860_s2, %s489_s11  ;;  %p130_p10 = scmp.gt.s32.totalorder %s129_s10, 0 }
  0x32   : > { %s144_s18 = scalar_select %p143_p7, 1, 0 }
  0x33   : > { %p421_p11 = scmp.lt.s32.totalorder %s129_s10, 15  ;;  %s872_s10 = smov (!%p130_p10, %s129_s10), 0 }
  0x34   : > { %s747_s19 = scalar_select %p169_p8, 1, 0  ;;  %v145_v0 = vstv %s144_s18 }
  0x35   : > { %p156_p12 = scmp.gt.s32.totalorder %s155_s16, 0  ;;  %p428_p13 = scmp.lt.s32.totalorder %s155_s16, 15  ;;  %vm146_vm0 = vcmp.eq.s32.totalorder %v145_v0, 1 }
  0x36   : > { %s874_s10 = smov (!%p421_p11, %s872_s10), 15  ;;  %s200_s11 = sadd.s32 3, %s733_s8  ;;  %v171_v5 = vstv %s747_s19 }
  0x37   : > { %s157_s20 = scalar_select %p156_p12, %s155_s16, 0  ;;  %vm172_vm2 = vcmp.eq.s32.totalorder %v171_v5, 1 }
  0x38   : > { %s134_s0 = sshra.s32 %s874_s10, 3  ;;  %s137_s25 = sand.u32 7, %s874_s10 }
  0x39   : > { %s492_s27 = sshll.u32 %s134_s0, 4  ;;  %s755_s13 = sld [smem:[#allocation3 + %s200_s11]] }
  0x3a   : > { %s140_s9 = sadd.s32 %s492_s27, %s137_s25  ;;  %s876_s20 = smov (!%p428_p13, %s157_s20), 15 }
  0x3b   : > { %s141_s12 = scalar_lea.vmem %s741_s15, %s140_s9  ;;  %s160_s17 = sshra.s32 %s876_s20, 3 }
  0x3c   : > { %v142_v3 = vld [vmem:[%s141_s12] ss:$8 sm:$0x3]  ;;  %s193_s10 = scalar_select %p192_p9, 1, 0 }
  0x3d   : > { %v147_v4 = vsel %vm146_vm0, %v142_v3, 0.0  ;;  %s163_s18 = sand.u32 7, %s876_s20  ;;  %s495_s0 = sshll.u32 %s160_s17, 4 }
  0x3e   : > { %152 = vst.msk [vmem:[%s762_s14] ss:$8 sm:$0x3] %vm751_vm1, %v147_v4  ;;  %p179_p0 = scmp.gt.s32.totalorder %s178_s28, 0  ;;  %s166_s16 = sadd.s32 %s495_s0, %s163_s18  ;;  %v194_v8 = vstv %s193_s10 }
  0x3f   : > { %p436_p3 = scmp.lt.s32.totalorder %s178_s28, 15  ;;  %s167_s19 = scalar_lea.vmem %s741_s15, %s166_s16  ;;  %vm195_vm3 = vcmp.eq.s32.totalorder %v194_v8, 1 }
  0x40   : > { %p202_p4 = scmp.gt.s32.totalorder %s755_s13, 0  ;;  %v168_v6 = vld [vmem:[%s167_s19] ss:$8 sm:$0x3]  ;;  %s878_s28 = smov (!%p179_p0, %s178_s28), 0 }
  0x41   : > { %v173_v7 = vsel %vm172_vm2, %v168_v6, 0.0  ;;  %s880_s28 = smov (!%p436_p3, %s878_s28), 15  ;;  %p444_p5 = scmp.lt.s32.totalorder %s755_s13, 15 }
  0x42   : > { %s203_s6 = scalar_select %p202_p4, %s755_s13, 0  ;;  %435 = vst.msk [vmem:[%s762_s14 + $0x1] ss:$8 sm:$0x3] %vm751_vm1, %v173_v7 }
  0x43   : > { %p215_p6 = scmp.gt.s32.totalorder %s730_s7, 3  ;;  %s183_s20 = sshra.s32 %s880_s28, 3 }
  0x44   : > { %s186_s25 = sand.u32 7, %s880_s28  ;;  %s498_s27 = sshll.u32 %s183_s20, 4 }
  0x45   : > { %s223_s9 = sadd.s32 4, %s733_s8  ;;  %s189_s11 = sadd.s32 %s498_s27, %s186_s25 }
  0x46   : > { %s224_s12 = sld [smem:[#allocation3 + %s223_s9]]  ;;  %s190_s17 = scalar_lea.vmem %s741_s15, %s189_s11 }
  0x47   : > { %p238_p7 = scmp.gt.s32.totalorder %s730_s7, 4  ;;  %v191_v9 = vld [vmem:[%s190_s17] ss:$8 sm:$0x3]  ;;  %s882_s6 = smov (!%p444_p5, %s203_s6), 15 }
  0x48   : > { %v196_v10 = vsel %vm195_vm3, %v191_v9, 0.0  ;;  %s216_s18 = scalar_select %p215_p6, 1, 0 }
  0x49   : > { %443 = vst.msk [vmem:[%s762_s14 + $0x2] ss:$8 sm:$0x3] %vm751_vm1, %v196_v10  ;;  %s206_s13 = sshra.s32 %s882_s6, 3  ;;  %s209_s28 = sand.u32 7, %s882_s6 }
  0x4a   : > { %s501_s10 = sshll.u32 %s206_s13, 4  ;;  %v217_v11 = vstv %s216_s18  ;;  %s246_s0 = sadd.s32 5, %s733_s8 }
  0x4b   : > { %s212_s16 = sadd.s32 %s501_s10, %s209_s28  ;;  %vm218_vm4 = vcmp.eq.s32.totalorder %v217_v11, 1  ;;  %s247_s6 = sld [smem:[#allocation3 + %s246_s0]] }
  0x4c   : > { %p225_p8 = scmp.gt.s32.totalorder %s224_s12, 0  ;;  %s213_s19 = scalar_lea.vmem %s741_s15, %s212_s16 }
  0x4d   : > { %p452_p9 = scmp.lt.s32.totalorder %s224_s12, 15  ;;  %v214_v12 = vld [vmem:[%s213_s19] ss:$8 sm:$0x3]  ;;  %p261_p10 = scmp.gt.s32.totalorder %s730_s7, 5 }
  0x4e   : > { %s884_s12 = smov (!%p225_p8, %s224_s12), 0  ;;  %v219_v13 = vsel %vm218_vm4, %v214_v12, 0.0  ;;  %s269_s11 = sadd.s32 6, %s733_s8 }
  0x4f   : > { %s239_s20 = scalar_select %p238_p7, 1, 0  ;;  %451 = vst.msk [vmem:[%s762_s14 + $0x3] ss:$8 sm:$0x3] %vm751_vm1, %v219_v13 }
  0x50   : > { %s886_s12 = smov (!%p452_p9, %s884_s12), 15  ;;  %s270_s18 = sld [smem:[#allocation3 + %s269_s11]] }
  0x51   : > { %v240_v14 = vstv %s239_s20  ;;  %s229_s25 = sshra.s32 %s886_s12, 3  ;;  %s232_s27 = sand.u32 7, %s886_s12 }
  0x52   : > { %s504_s9 = sshll.u32 %s229_s25, 4  ;;  %vm241_vm5 = vcmp.eq.s32.totalorder %v240_v14, 1  ;;  %p284_p11 = scmp.gt.s32.totalorder %s730_s7, 6 }
  0x53   : > { %s235_s17 = sadd.s32 %s504_s9, %s232_s27  ;;  %p248_p12 = scmp.gt.s32.totalorder %s247_s6, 0 }
  0x54   : > { %s236_s13 = scalar_lea.vmem %s741_s15, %s235_s17  ;;  %p460_p13 = scmp.lt.s32.totalorder %s247_s6, 15 }
  0x55   : > { %v237_v15 = vld [vmem:[%s236_s13] ss:$8 sm:$0x3]  ;;  %s262_s28 = scalar_select %p261_p10, 1, 0 }
  0x56   : > { %v242_v16 = vsel %vm241_vm5, %v237_v15, 0.0  ;;  %s285_s10 = scalar_select %p284_p11, 1, 0 }
  0x57   : > { %459 = vst.msk [vmem:[%s762_s14 + $0x4] ss:$8 sm:$0x3] %vm751_vm1, %v242_v16  ;;  %s888_s6 = smov (!%p248_p12, %s247_s6), 0  ;;  %p271_p0 = scmp.gt.s32.totalorder %s270_s18, 0  ;;  %v263_v17 = vstv %s262_s28 }
  0x58   : > { %p468_p3 = scmp.lt.s32.totalorder %s270_s18, 15  ;;  %s890_s6 = smov (!%p460_p13, %s888_s6), 15  ;;  %vm264_vm6 = vcmp.eq.s32.totalorder %v263_v17, 1  ;;  %v286_v20 = vstv %s285_s10 }
  0x59   : > { %s272_s12 = scalar_select %p271_p0, %s270_s18, 0  ;;  %vm287_vm7 = vcmp.eq.s32.totalorder %v286_v20, 1 }
  0x5a   : > { %s252_s0 = sshra.s32 %s890_s6, 3  ;;  %s255_s16 = sand.u32 7, %s890_s6 }
  0x5b   : > { %s507_s19 = sshll.u32 %s252_s0, 4  ;;  %s292_s20 = sadd.s32 7, %s733_s8 }
  0x5c   : > { %s258_s25 = sadd.s32 %s507_s19, %s255_s16  ;;  %s293_s27 = sld [smem:[#allocation3 + %s292_s20]] }
  0x5d   : > { %s259_s9 = scalar_lea.vmem %s741_s15, %s258_s25  ;;  %p307_p4 = scmp.gt.s32.totalorder %s730_s7, 7 }
  0x5e   : > { %v260_v18 = vld [vmem:[%s259_s9] ss:$8 sm:$0x3]  ;;  %s892_s12 = smov (!%p468_p3, %s272_s12), 15  ;;  %s514_s18 = sshll.u32 %s696_s24, 8 }
  0x5f   : > { %v265_v19 = vsel %vm264_vm6, %v260_v18, 0.0  ;;  %s308_s11 = scalar_select %p307_p4, 1, 0 }
  0x60   : > { %467 = vst.msk [vmem:[%s762_s14 + $0x5] ss:$8 sm:$0x3] %vm751_vm1, %v265_v19  ;;  %s275_s6 = sshra.s32 %s892_s12, 3  ;;  %s278_s17 = sand.u32 7, %s892_s12 }
  0x61   : > { %s510_s8 = sshll.u32 %s275_s6, 4  ;;  %v309_v23 = vstv %s308_s11  ;;  %s330_s0 = sshll.u32 %s762_s14, 4  ;;  %s814_s0 = int_to_ptr.vmem [resolvable:$true] %s330_s0 }
  0x62   : > { %s281_s13 = sadd.s32 %s510_s8, %s278_s17  ;;  %p294_p5 = scmp.gt.s32.totalorder %s293_s27, 0  ;;  %vm310_vm8 = vcmp.eq.s32.totalorder %v309_v23, 1 }
  0x63   : > { %s282_s7 = scalar_lea.vmem %s741_s15, %s281_s13  ;;  %p476_p6 = scmp.lt.s32.totalorder %s293_s27, 15 }
  0x64   : > { %v283_v21 = vld [vmem:[%s282_s7] ss:$8 sm:$0x3]  ;;  %s894_s27 = smov (!%p294_p5, %s293_s27), 0  ;;  %s812_s9 = scalar_lea.hbm %s861_s3, %s514_s18 }
  0x65   : > { %v288_v22 = vsel %vm287_vm7, %v283_v21, 0.0  ;;  %s896_s27 = smov (!%p476_p6, %s894_s27), 15  ;;  %s316_s24 = scalar_lea.sflag [#allocation6], %s119_s5 }
  0x66   : > { %475 = vst.msk [vmem:[%s762_s14 + $0x6] ss:$8 sm:$0x3] %vm751_vm1, %v288_v22  ;;  %s298_s28 = sshra.s32 %s896_s27, 3  ;;  %s301_s10 = sand.u32 7, %s896_s27 }
  0x67   : > { %s513_s12 = sshll.u32 %s298_s28, 4  ;;  %s580_s27 = scalar_lea.vmem %s814_s0, 256 }
  0x68   : > { %s304_s16 = sadd.s32 %s513_s12, %s301_s10  ;;  %p581_p7 = scmp.ne.s32.totalorder %s814_s0, %s580_s27 }
  0x69   : > { %s305_s19 = scalar_lea.vmem %s741_s15, %s304_s16  ;;  %s648_s15 = smov [#allocation5]  }
  0x6a   : > { %v306_v24 = vld [vmem:[%s305_s19] ss:$8 sm:$0x3]  ;;  %p582_p8 = pnand %p581_p7, %p713_p1  ;;  %s584_s11 = sshll.u32 %s648_s15, 4  ;;  %s585_s11 = int_to_ptr.vmem [resolvable:$false] %s584_s11 }
  0x6b   : > { %v311_v25 = vsel %vm310_vm8, %v306_v24, 0.0  ;;  %s586_s6 = scalar_lea.vmem %s585_s11, 512  ;;  %p587_p10 = scmp.lt.s32.totalorder %s814_s0, %s585_s11 }
  0x6c   : > { %483 = vst.msk [vmem:[%s762_s14 + $0x7] ss:$8 sm:$0x3] %vm751_vm1, %v311_v25  ;;  %p583_p9 = pneg %p582_p8  ;;  %p588_p11 = scmp.lt.s32.totalorder %s586_s6, %s580_s27 }
  0x6e   : > { %p589_p12 = por %p588_p11, %p587_p10 }
  0x70   : > { %p590_p13 = pnand %p589_p12, %p583_p9 }
  0x72   : > { %593 = shalt.err (!%p590_p13)
}
  0x73   : > { %s594_s5 = scalar_lea.hbm %s812_s9, 256  ;;  %s598_s8 = scalar_lea.hbm %s861_s3, 512 }
  0x74   : > { %p595_p0 = scmp.ne.s32.totalorder %s812_s9, %s594_s5  ;;  %p599_p5 = scmp.lt.u32.totalorder %s812_s9, %s861_s3 }
  0x75   : > { %p600_p6 = scmp.lt.u32.totalorder %s598_s8, %s594_s5  ;;  %p602_p8 = scmp.lt.u32.totalorder %s594_s5, %s812_s9 }
  0x76   : > { %p596_p3 = pnand %p595_p0, %p713_p1 }
  0x77   : > { %p601_p7 = por %p600_p6, %p599_p5 }
  0x78   : > { %p597_p4 = pneg %p596_p3 }
  0x79   : > { %p603_p9 = por %p602_p8, %p601_p7 }
  0x7b   : > { %p604_p10 = pnand %p603_p9, %p597_p4 }
  0x7d   : > { %607 = shalt.err (!%p604_p10)
}
  0x7e   : > { %515 = dma.vmem_to_hbm [thread:$0]  (%p713_p1), %s814_s0, 256, %s812_s9, %s316_s24  }
  0x7f PF: > { %p521_p11 = scmp.ge.s32.totalorder %s644_s23, 2  ;;  %s342_s18 = sand.u32 1, %s632_s1  }
  0x80   : > { %s343_s28 = scalar_lea.sflag [#allocation6], %s342_s18 }
  0x81   : > { %p518_p12 = pnand %p521_p11, %p717_p2 }
  0x83   : > { %627 = dma.done.wait (!%p518_p12), %s343_s28, 256  }
  0x84   : > { %629 = vsyncadd (!%p518_p12), %s343_s28, 4294967040  ;;  %p23_p13 = scmp.ge.s32.totalorder %s700_s26, 4   ;;  %s867_s1 = smov %s636_s21 }
  0x85   : > { %s868_s21 = smov %s640_s22  ;;  %s869_s22 = smov %s711_s29 }
  0x86   : > { %s870_s23 = smov %s700_s26  ;;  %25 = sbr.rel (!%p23_p13) target bundleno = 28 (0x1c), region = 74 }
  0x8d   :  { %348 = vsyncpa [#allocation6], 1 }
  0x8e   :  { %350 = vsyncpa [#allocation6 + $0x1], 1 }

// kernel: bert_encoder_forward.2
= control target key start
LH: loop header
LB: loop body
LE: loop exit
PB: predicated region body
PF: predicated region fallthrough
CT: control target
= control target key end

     0   :  { %s7151_s0 = inlined_call_operand.vmem [shape: f32[32,256], index: 0, kind: input, shape index: {}]   ;;  %s7152_s1 = inlined_call_operand.vmem [shape: f32[2,1,16], index: 1, kind: input, shape index: {}]   ;;  %s7153_s2 = inlined_call_operand.vmem [shape: f32[1,256], index: 2, kind: input, shape index: {}]   ;;  %s7154_s3 = inlined_call_operand.vmem [shape: f32[1,256], index: 3, kind: input, shape index: {}]   ;;  %s7155_s4 = inlined_call_operand.hbm [shape: bf16[2,256,768], index: 4, kind: input, shape index: {}]   ;;  %s7156_s5 = inlined_call_operand.vmem [shape: f32[2,1,768], index: 5, kind: input, shape index: {}]   ;;  %s7157_s6 = inlined_call_operand.hbm [shape: bf16[2,256,256], index: 6, kind: input, shape index: {}]   ;;  %s7158_s7 = inlined_call_operand.vmem [shape: f32[2,1,256], index: 7, kind: input, shape index: {}]   ;;  %s7159_s8 = inlined_call_operand.vmem [shape: f32[2,1,256], index: 8, kind: input, shape index: {}]   ;;  %s7160_s9 = inlined_call_operand.vmem [shape: f32[2,1,256], index: 9, kind: input, shape index: {}]   ;;  %s7161_s10 = inlined_call_operand.vmem [shape: bf16[2,256,512], index: 10, kind: input, shape index: {}]   ;;  %s7162_s11 = inlined_call_operand.vmem [shape: f32[2,1,512], index: 11, kind: input, shape index: {}]   ;;  %s7163_s12 = inlined_call_operand.hbm [shape: bf16[2,512,256], index: 12, kind: input, shape index: {}]   ;;  %s7164_s13 = inlined_call_operand.vmem [shape: f32[2,1,256], index: 13, kind: input, shape index: {}]   ;;  %s7165_s14 = inlined_call_operand.vmem [shape: f32[2,1,256], index: 14, kind: input, shape index: {}]   ;;  %s7166_s15 = inlined_call_operand.vmem [shape: f32[2,1,256], index: 15, kind: input, shape index: {}]   ;;  %s7167_s16 = inlined_call_operand.vmem [shape: bf16[256,256], index: 16, kind: input, shape index: {}]   ;;  %s7168_s17 = inlined_call_operand.vmem [shape: f32[1,256], index: 17, kind: input, shape index: {}]   ;;  %s7169_s18 = inlined_call_operand.vmem [shape: f32[32,256], index: 18, kind: output, shape index: {0}]   ;;  %s7170_s19 = inlined_call_operand.hbm [shape: f32[2,256], index: 19, kind: output, shape index: {1}]  }
   0x1   :  { %7187 = sst [smem:[#allocation18_spill]] %s7151_s0 }
   0x2   :  { %7188 = sst [smem:[#allocation19_spill]] %s7152_s1 }
   0x3   :  { %7189 = sst [smem:[#allocation20_spill]] %s7153_s2 }
   0x4   :  { %7190 = sst [smem:[#allocation21_spill]] %s7154_s3 }
   0x5   :  { %7191 = sst [smem:[#allocation22_spill]] %s7155_s4 }
   0x6   :  { %7192 = sst [smem:[#allocation23_spill]] %s7156_s5 }
   0x7   :  { %7193 = sst [smem:[#allocation24_spill]] %s7157_s6 }
   0x8   :  { %7194 = sst [smem:[#allocation25_spill]] %s7163_s12 }
   0x9   :  { %7195 = sst [smem:[#allocation26_spill]] %s7166_s15 }
   0xa   :  { %7196 = sst [smem:[#allocation27_spill]] %s7167_s16 }
   0xb   :  { %7197 = sst [smem:[#allocation28_spill]] %s7168_s17 }
   0xc   :  { %7198 = sst [smem:[#allocation29_spill]] %s7169_s18 }
   0xd   :  { %7199 = sst [smem:[#allocation30_spill]] %s7170_s19 }
   0xe   :  { %25 = vsyncpa [#allocation5], 0 }
   0xf   :  { %27 = vsyncpa [#allocation5 + $0x1], 0 }
  0x10   :  { %28 = vsyncpa [#allocation8], 0 }
  0x11   :  { %30 = vsyncpa [#allocation8 + $0x1], 0 }
  0x12   :  { %31 = vsyncpa [#allocation6], 0  ;;  %s5801_s0 = smov 0   ;;  %s5803_s30 = smov 0  }
  0x13   :  { %s5805_s20 = smov 0   ;;  %s5807_s21 = smov 0  }
  0x14 LB: > { %7200 = sst [smem:[#allocation14_spill]] %s5680_s30  ;;  %s5820_s1 = sadd.s32 4294967295, %s5688_s21   ;;  %s5688_s21 = sphi %s5807_s21, %s7233_s21   ;;  %s5684_s20 = sphi %s5805_s20, %s7236_s20   ;;  %s5680_s30 = sphi %s5803_s30, %s7235_s30   ;;  %s5676_s0 = sphi %s5801_s0, %s7234_s0  }
  0x15   : > { %7201 = sst [smem:[#allocation15_spill]] %s5684_s20  ;;  %s5823_s22 = sadd.s32 1, %s5688_s21  }
  0x16   : > { %7202 = sst [smem:[#allocation16_spill]] %s5823_s22  ;;  %s125_s2 = ssub.s32 %s5688_s21, %s5823_s22 }
  0x17   : > { %s128_s23 = sadd.s32 1, %s5684_s20  ;;  %p126_p0 = scmp.eq.s32.totalorder %s125_s2, 0 }
  0x18   : > { %p135_p1 = scmp.ne.s32.totalorder %s5684_s20, %s5680_s30  ;;  %p136_p2 = scmp.eq.s32.totalorder %s5688_s21, 0 }
  0x19   : > { %p141_p3 = scmp.ne.s32.totalorder %s5680_s30, %s5676_s0  ;;  %p142_p5 = scmp.eq.s32.totalorder %s5820_s1, 0 }
  0x1a   : > { %s5833_s24 = scalar_select %p126_p0, %s5684_s20, %s128_s23  }
  0x1b   : > { %p137_p4 = por %p136_p2, %p135_p1  ;;  %p4955_p6 = scmp.lt.s32.totalorder %s5688_s21, 2 }
  0x1c   : > { %7203 = sst [smem:[#allocation17_spill]] %s5833_s24  ;;  %p5837_p7 = por %p142_p5, %p141_p3 }
  0x1d   : > { %s5842_s3 = sand.u32 1, %s5684_s20   ;;  %p5844_p8 = pnand %p4955_p6, %p137_p4 }
  0x1e   : > { %s7204_s25 = scalar_select %p5837_p7, 1, 0 }
  0x1f   : > { %s581_s27 = sand.u32 1, %s5688_s21   ;;  %s4520_s28 = sshll.u32 %s5842_s3, 8 }
  0x20   : > { %s4840_s29 = sshll.u32 %s5688_s21, 12  ;;  %s585_s0 = scalar_lea.vmem [#allocation7], %s4520_s28 }
  0x21   : > { %s592_s2 = sshll.u32 %s585_s0, 4  ;;  %s7206_s6 = sld [smem:[#allocation24_spill]]  ;;  %s5856_s2 = int_to_ptr.vmem [resolvable:$true] %s592_s2 }
  0x22   : > { %s5858_s20 = scalar_lea.sflag [#allocation8], %s581_s27  ;;  %p5864_p10 = pneg %p5844_p8 }
  0x27   : > { %s5854_s22 = scalar_lea.hbm %s7206_s6, %s4840_s29  ;;  %s5535_s29 = scalar_lea.hbm %s7206_s6, 8192 }
  0x28   : > { %s5530_s19 = scalar_lea.hbm %s5854_s22, 4096  ;;  %p5536_p13 = scmp.lt.u32.totalorder %s5854_s22, %s7206_s6 }
  0x29   : > { %p5531_p9 = scmp.ne.s32.totalorder %s5854_s22, %s5530_s19  ;;  %p5537_p0 = scmp.lt.u32.totalorder %s5535_s29, %s5530_s19 }
  0x2a   : > { %p5539_p2 = scmp.lt.u32.totalorder %s5530_s19, %s5854_s22 }
  0x2b   : > { %p5533_p11 = pnand %p5864_p10, %p5531_p9  ;;  %p5538_p1 = por %p5537_p0, %p5536_p13 }
  0x2d   : > { %p5534_p12 = pneg %p5533_p11  ;;  %p5540_p3 = por %p5539_p2, %p5538_p1 }
  0x2f   : > { %p5541_p4 = pnand %p5540_p3, %p5534_p12 }
  0x31   : > { %5544 = shalt.err (!%p5541_p4)
}
  0x32   : > { %s5545_s27 = scalar_lea.vmem %s5856_s2, 4096  ;;  %s5690_s24 = smov [#allocation7]  }
  0x33   : > { %p5546_p5 = scmp.ne.s32.totalorder %s5856_s2, %s5545_s27  ;;  %s5550_s28 = sshll.u32 %s5690_s24, 4  ;;  %s5551_s28 = int_to_ptr.vmem [resolvable:$false] %s5550_s28 }
  0x34   : > { %s5552_s0 = scalar_lea.vmem %s5551_s28, 8192  ;;  %p5553_p11 = scmp.lt.s32.totalorder %s5856_s2, %s5551_s28 }
  0x35   : > { %p5548_p6 = pnand %p5546_p5, %p5864_p10  ;;  %p5554_p7 = scmp.lt.s32.totalorder %s5552_s0, %s5545_s27 }
  0x37   : > { %p5549_p9 = pneg %p5548_p6  ;;  %p5555_p13 = por %p5554_p7, %p5553_p11 }
  0x39   : > { %p5556_p0 = pnand %p5555_p13, %p5549_p9 }
  0x3b   : > { %5559 = shalt.err (!%p5556_p0)
}
  0x3c   : > { %s7180_s19 = smov 128   ;;  %s7181_s29 = smov 8  }
  0x3d   : > { %4951 = dma.hbm_to_vmem [thread:$0]  (!%p5844_p8), %s5854_s22, 4096, %s5856_s2, %s5858_s20, %s7180_s19, %s7180_s19, %s7181_s29  }
  0x3e   : > { %p4526_p7 = scmp.ge.s32.totalorder %s5688_s21, 1  ;;  %p678_p12 = scmp.lt.s32.totalorder %s5688_s21, 3 }
  0x3f   : > { %s4931_s23 = smul.u32 768, %s5842_s3  ;;  %s7209_s4 = sld [smem:[#allocation22_spill]] }
  0x40   : > { %p5894_p1 = pnand %p4526_p7, %p678_p12  ;;  %s4932_s24 = smul.u32 12288, %s5688_s21 }
  0x41   : > { %s557_s16 = scalar_lea.vmem [#allocation4], %s4931_s23  ;;  %s554_s22 = scalar_lea.sflag [#allocation5], %s5842_s3 }
  0x42   : > { %s7208_s27 = scalar_select %p5894_p1, 1, 0 }
  0x43   : > { %s564_s18 = sshll.u32 %s557_s16, 4  ;;  %s5904_s18 = int_to_ptr.vmem [resolvable:$true] %s564_s18 }
  0x45   : > { %s5902_s6 = scalar_lea.hbm %s7209_s4, %s4932_s24  ;;  %s5565_s28 = scalar_lea.hbm %s7209_s4, 24576 }
  0x46   : > { %s5560_s2 = scalar_lea.hbm %s5902_s6, 12288  ;;  %p5566_p5 = scmp.lt.u32.totalorder %s5902_s6, %s7209_s4 }
  0x47   : > { %p5561_p2 = scmp.ne.s32.totalorder %s5902_s6, %s5560_s2  ;;  %p5567_p6 = scmp.lt.u32.totalorder %s5565_s28, %s5560_s2 }
  0x48   : > { %p5569_p11 = scmp.lt.u32.totalorder %s5560_s2, %s5902_s6 }
  0x49   : > { %p5563_p3 = pnand %p5561_p2, %p5864_p10  ;;  %p5568_p9 = por %p5567_p6, %p5566_p5 }
  0x4b   : > { %p5564_p4 = pneg %p5563_p3  ;;  %p5570_p13 = por %p5569_p11, %p5568_p9 }
  0x4d   : > { %p5571_p0 = pnand %p5570_p13, %p5564_p4 }
  0x4f   : > { %5574 = shalt.err (!%p5571_p0)
}
  0x50   : > { %s5575_s16 = scalar_lea.vmem %s5904_s18, 12288  ;;  %s5693_s19 = smov [#allocation4]  }
  0x51   : > { %p5576_p7 = scmp.ne.s32.totalorder %s5904_s18, %s5575_s16  ;;  %s5580_s29 = sshll.u32 %s5693_s19, 4  ;;  %s5581_s29 = int_to_ptr.vmem [resolvable:$false] %s5580_s29 }
  0x52   : > { %s5582_s23 = scalar_lea.vmem %s5581_s29, 24576  ;;  %p5583_p3 = scmp.lt.s32.totalorder %s5904_s18, %s5581_s29 }
  0x53   : > { %p5578_p12 = pnand %p5576_p7, %p5864_p10  ;;  %p5584_p1 = scmp.lt.s32.totalorder %s5582_s23, %s5575_s16 }
  0x55   : > { %p5579_p2 = pneg %p5578_p12  ;;  %p5585_p5 = por %p5584_p1, %p5583_p3 }
  0x57   : > { %p5586_p6 = pnand %p5585_p5, %p5579_p2 }
  0x59   : > { %5589 = shalt.err (!%p5586_p6)
}
  0x5a   : > { %s5694_s2 = smov 384   ;;  %s5695_s28 = smov 24  }
  0x5b   : > { %4948 = dma.hbm_to_vmem [thread:$0]  (!%p5844_p8), %s5902_s6, 12288, %s5904_s18, %s554_s22, %s5694_s2, %s5694_s2, %s5695_s28  }
  0x5c   : > { %s4523_s24 = sshll.u32 %s5842_s3, 9  ;;  %s4841_s0 = sshll.u32 %s5688_s21, 13 }
  0x5d   : > { %s7210_s12 = sld [smem:[#allocation25_spill]]  ;;  %s642_s23 = scalar_lea.vmem [#allocation9], %s4523_s24 }
  0x5e   : > { %s649_s4 = sshll.u32 %s642_s23, 4  ;;  %s5937_s4 = int_to_ptr.vmem [resolvable:$true] %s649_s4 }
  0x63   : > { %s5935_s16 = scalar_lea.hbm %s7210_s12, %s4841_s0  ;;  %s5595_s21 = scalar_lea.hbm %s7210_s12, 16384 }
  0x64   : > { %s5590_s15 = scalar_lea.hbm %s5935_s16, 8192  ;;  %p5596_p11 = scmp.lt.u32.totalorder %s5935_s16, %s7210_s12 }
  0x65   : > { %p5591_p1 = scmp.ne.s32.totalorder %s5935_s16, %s5590_s15  ;;  %p5597_p13 = scmp.lt.u32.totalorder %s5595_s21, %s5590_s15 }
  0x66   : > { %p5599_p7 = scmp.lt.u32.totalorder %s5590_s15, %s5935_s16 }
  0x67   : > { %p5593_p4 = pnand %p5591_p1, %p5864_p10  ;;  %p5598_p0 = por %p5597_p13, %p5596_p11 }
  0x69   : > { %p5594_p9 = pneg %p5593_p4  ;;  %p5600_p12 = por %p5599_p7, %p5598_p0 }
  0x6b   : > { %p5601_p2 = pnand %p5600_p12, %p5594_p9 }
  0x6d   : > { %5604 = shalt.err (!%p5601_p2)
}
  0x6e   : > { %s5605_s2 = scalar_lea.vmem %s5937_s4, 8192  ;;  %s5696_s28 = smov [#allocation9]  }
  0x6f   : > { %p5606_p3 = scmp.ne.s32.totalorder %s5937_s4, %s5605_s2  ;;  %s5610_s24 = sshll.u32 %s5696_s28, 4  ;;  %s5611_s24 = int_to_ptr.vmem [resolvable:$false] %s5610_s24 }
  0x70   : > { %s5612_s0 = scalar_lea.vmem %s5611_s24, 16384  ;;  %p5613_p1 = scmp.lt.s32.totalorder %s5937_s4, %s5611_s24 }
  0x71   : > { %p5608_p5 = pnand %p5606_p3, %p5864_p10  ;;  %p5614_p4 = scmp.lt.s32.totalorder %s5612_s0, %s5605_s2 }
  0x73   : > { %p5609_p6 = pneg %p5608_p5  ;;  %p5615_p11 = por %p5614_p4, %p5613_p1 }
  0x75   : > { %p5616_p13 = pnand %p5615_p11, %p5609_p6 }
  0x77   : > { %5619 = shalt.err (!%p5616_p13)
}
  0x78   : > { %s7211_s15 = smov 8   ;;  %s7212_s19 = smov 128  }
  0x79   : > { %4954 = dma.hbm_to_vmem [thread:$0]  (!%p5844_p8), %s5935_s16, 8192, %s5937_s4, %s5858_s20, %s7212_s19, %s7212_s19, %s7211_s15  }
  0x7a   : > { %p7213_p10 = scmp.ne.s32.totalorder %s7208_s27, 0 }
  0x7b   : > { %s684_s17 = sand.u32 (!%p7213_p10), 1, %s5680_s30   ;;  %p7214_p9 = scmp.ne.s32.totalorder (!%p7213_p10), %s7204_s25, 0 }
  0x7c   : > { %682 = sbr.rel (%p7213_p10) target bundleno = 5027 (0x13a3), region = 92  ;;  %s685_s23 = scalar_lea.sflag (!%p7213_p10), [#allocation5], %s684_s17 }
  0x7d   : > { %s4933_s29 = smul.u32 (!%p7213_p10), 768, %s684_s17 }
  0x7f   : > { %s5967_s6 = scalar_lea.vmem (!%p7213_p10), [#allocation4], %s4933_s29 }
  0x83   : > { %5663 = dma.done.wait (%p7214_p9), %s685_s23, 12288  }
  0x84   : > { %5665 = vsyncadd (%p7214_p9), %s685_s23, 4294955008  ;;  %s693_s26 = sand.u32 1, %s5820_s1   ;;  %s4527_s18 = sshll.u32 %s684_s17, 8 }
  0x85   : > { %s694_s4 = scalar_lea.sflag [#allocation8], %s693_s26  ;;  %s5974_s20 = scalar_lea.vmem [#allocation7], %s4527_s18 }
  0x86   : > { %5667 = dma.done.wait (%p7214_p9), %s694_s4, 12288  }
  0x87   : > { %5669 = vsyncadd (%p7214_p9), %s694_s4, 4294955008  ;;  %s4528_s27 = sshll.u32 %s684_s17, 9  ;;  %p803_p8 = scmp.lt.s32.totalorder %s5820_s1, 1 }
  0x88   : > { %s7215_s5 = sld [smem:[#allocation23_spill]]  ;;  %s7216_s26 = sld [smem:[#allocation26_spill]] }
  0x89   : > { %s804_s16 = scalar_select %p803_p8, %s5820_s1, 1 }
  0x8a   : > { %s6023_s22 = scalar_lea.vmem [#allocation9], %s4528_s27  ;;  %p4538_p0 = scmp.ne.s32.totalorder %s5820_s1, 0 }
  0x8b   : > { %s4934_s21 = smul.u32 6, %s804_s16  ;;  %s5982_s3 = sshll.u32 %s804_s16, 1  ;;  %v921_v42 = vlaneseq (!%p4538_p0) }
  0x8c   : > { %s4842_s18 = sshll.u32 %s804_s16, 9  ;;  %s4534_s4 = sshll.u32 %s804_s16, 2 }
  0x8d   : > { %s6004_s12 = scalar_lea.vmem %s7161_s10, %s4842_s18  ;;  %s6009_s25 = scalar_lea.vmem %s7162_s11, %s4534_s4  ;;  %v922_v48 = vshrl.u32 (!%p4538_p0), %v921_v42, 7 }
  0x8e   : > { %s5995_s17 = scalar_lea.vmem %s7215_s5, %s4934_s21  ;;  %s831_s21 = scalar_lea.vmem %s7164_s13, %s5982_s3 }
  0x8f   : > { %s835_s29 = scalar_lea.vmem %s7165_s14, %s5982_s3  ;;  %s839_s5 = scalar_lea.vmem %s7216_s26, %s5982_s3  ;;  %v923_v53 = vsub.s32 (!%p4538_p0), 0, %v922_v48  ;;  %v927_v54 = vsub.s32 (!%p4538_p0), 1, %v922_v48 }
  0x90   : > { %844 = sbr.rel (%p4538_p0) target bundleno = 475 (0x1db), region = 108  ;;  %s7217_s18 = sld [smem:[#allocation18_spill]] (!%p4538_p0) }
  0x91   : > { %s7218_s15 = sld [smem:[#allocation20_spill]] (!%p4538_p0)  ;;  %s7219_s19 = sld [smem:[#allocation21_spill]] (!%p4538_p0) }
  0x96   : > { %v845_v0 = vld [vmem:[%s7217_s18] sm:$0xff] (!%p4538_p0)  ;;  %v846_v1 = vld [vmem:[%s7217_s18 + $0x8] sm:$0xff] (!%p4538_p0)  ;;  %v847_v5 = vld [vmem:[%s7217_s18 + $0x10] sm:$0xff] (!%p4538_p0) }
  0x97   : > { %v849_v2 = vld [vmem:[%s7217_s18 + $0x20] sm:$0xff]  ;;  %v855_v3 = vadd.f32 %v846_v1, %v845_v0  ;;  %v850_v4 = vld [vmem:[%s7217_s18 + $0x28] sm:$0xff]  ;;  %v848_v6 = vld [vmem:[%s7217_s18 + $0x18] sm:$0xff] }
  0x98   : > { %v861_v7 = vadd.f32 %v850_v4, %v849_v2  ;;  %v851_v8 = vld [vmem:[%s7217_s18 + $0x30] sm:$0xff]  ;;  %v852_v9 = vld [vmem:[%s7217_s18 + $0x38] sm:$0xff]  ;;  %v858_v10 = vadd.f32 %v848_v6, %v847_v5  ;;  %v853_v55 = vld [vmem:[%s7218_s15] sm:$0x3] }
  0x99   : > { %856 = vadd.xlane.f32.xlu0 %v855_v3  ;;  %v864_v11 = vadd.f32 %v852_v9, %v851_v8  ;;  %v854_v57 = vld [vmem:[%s7219_s19] sm:$0x3]  ;;  %v924_v58 = vrot.slane %v853_v55, %v923_v53  ;;  %v928_v59 = vrot.slane %v853_v55, %v927_v54 }
  0x9a   : > { %862 = vadd.xlane.f32.xlu1 %v861_v7  ;;  %v943_v61 = vrot.slane %v854_v57, %v923_v53  ;;  %v947_v62 = vrot.slane %v854_v57, %v927_v54 }
  0x9d   : > { %859 = vadd.xlane.f32.xlu0 %v858_v10 }
  0x9e   : > { %865 = vadd.xlane.f32.xlu1 %v864_v11 }
 0x126   : > { %v857_v12 = vpop.xlane.xlu0 %856 }
 0x127   : > { %v868_v13 = vmul.f32 0.00390625, %v857_v12  ;;  %v863_v14 = vpop.xlane.xlu1 %862 }
 0x128   : > { %v870_v15 = vmul.f32 0.00390625, %v863_v14 }
 0x129   : > { %v872_v16 = vsub.f32 %v845_v0, %v868_v13  ;;  %v873_v17 = vsub.f32 %v846_v1, %v868_v13 }
 0x12a   : > { %v6050_v18 = vsub.f32 %v849_v2, %v870_v15  ;;  %v6052_v19 = vsub.f32 %v850_v4, %v870_v15  ;;  %v860_v20 = vpop.xlane.xlu0 %859 }
 0x12b   : > { %v869_v21 = vmul.f32 0.00390625, %v860_v20  ;;  %v866_v22 = vpop.xlane.xlu1 %865  ;;  %v880_v23 = vmul.f32 %v872_v16, %v872_v16  ;;  %v881_v24 = vmul.f32 %v873_v17, %v873_v17 }
 0x12c   : > { %v871_v25 = vmul.f32 0.00390625, %v866_v22  ;;  %v884_v26 = vmul.f32 %v6050_v18, %v6050_v18  ;;  %v885_v27 = vmul.f32 %v6052_v19, %v6052_v19 }
 0x12d   : > { %v874_v28 = vsub.f32 %v847_v5, %v869_v21  ;;  %v875_v29 = vsub.f32 %v848_v6, %v869_v21  ;;  %v888_v30 = vadd.f32 %v881_v24, %v880_v23 }
 0x12e   : > { %v878_v31 = vsub.f32 %v851_v8, %v871_v25  ;;  %v879_v32 = vsub.f32 %v852_v9, %v871_v25  ;;  %v894_v33 = vadd.f32 %v885_v27, %v884_v26 }
 0x12f   : > { %889 = vadd.xlane.f32.xlu0 %v888_v30  ;;  %v882_v34 = vmul.f32 %v874_v28, %v874_v28  ;;  %v883_v35 = vmul.f32 %v875_v29, %v875_v29 }
 0x130   : > { %v886_v36 = vmul.f32 %v878_v31, %v878_v31  ;;  %v887_v37 = vmul.f32 %v879_v32, %v879_v32 }
 0x131   : > { %v891_v38 = vadd.f32 %v883_v35, %v882_v34 }
 0x132   : > { %v897_v39 = vadd.f32 %v887_v37, %v886_v36 }
 0x133   : > { %895 = vadd.xlane.f32.xlu0 %v894_v33  ;;  %892 = vadd.xlane.f32.xlu1 %v891_v38 }
 0x137   : > { %898 = vadd.xlane.f32.xlu1 %v897_v39 }
 0x1bc   : > { %v890_v40 = vpop.xlane.xlu0 %889 }
 0x1bd   : > { %v900_v41 = vmul.f32 0.00390625, %v890_v40 }
 0x1bf   : > { %v904_v43 = vadd.f32 1e-05, %v900_v41 }
 0x1c0   : > { %v893_v44 = vpop.xlane.xlu1 %892  ;;  %v896_v45 = vpop.xlane.xlu0 %895 }
 0x1c1   : > { %4998 = vrsqrt.f32 %v904_v43  ;;  %v901_v46 = vmul.f32 0.00390625, %v893_v44  ;;  %v902_v47 = vmul.f32 0.00390625, %v896_v45 }
 0x1c3   : > { %v905_v49 = vadd.f32 1e-05, %v901_v46  ;;  %v906_v50 = vadd.f32 1e-05, %v902_v47 }
 0x1c4   : > { %v899_v51 = vpop.xlane.xlu1 %898 }
 0x1c5   : > { %5000 = vrsqrt.f32 %v905_v49  ;;  %v903_v52 = vmul.f32 0.00390625, %v899_v51 }
 0x1c6   : > { %5002 = vrsqrt.f32 %v906_v50 }
 0x1c7   : > { %v907_v56 = vadd.f32 1e-05, %v903_v52 }
 0x1c9   : > { %5004 = vrsqrt.f32 %v907_v56 }
 0x1cb   : > { %v4999_v60 = vpop.eup %4998 }
 0x1cc   : > { %v912_v63 = vmul.f32 %v4999_v60, %v872_v16  ;;  %v913_v0 = vmul.f32 %v4999_v60, %v873_v17 }
 0x1ce   : > { %v931_v1 = vmul.f32 %v924_v58, %v912_v63  ;;  %v932_v2 = vmul.f32 %v928_v59, %v913_v0 }
 0x1cf   : > { %v5001_v3 = vpop.eup %5000 }
 0x1d0   : > { %v5003_v4 = vpop.eup %5002  ;;  %v950_v5 = vadd.f32 %v943_v61, %v931_v1  ;;  %v951_v6 = vadd.f32 %v947_v62, %v932_v2  ;;  %v914_v7 = vmul.f32 %v5001_v3, %v874_v28  ;;  %v915_v8 = vmul.f32 %v5001_v3, %v875_v29 }
 0x1d1   : > { %v916_v9 = vmul.f32 %v5003_v4, %v6050_v18  ;;  %v917_v10 = vmul.f32 %v5003_v4, %v6052_v19 }
 0x1d2   : > { %958 = vst [vmem:[#allocation2] sm:$0xff] %v950_v5  ;;  %959 = vst [vmem:[#allocation2 + $0x8] sm:$0xff] %v951_v6  ;;  %v933_v11 = vmul.f32 %v924_v58, %v914_v7  ;;  %v934_v12 = vmul.f32 %v928_v59, %v915_v8 }
 0x1d3   : > { %v5005_v13 = vpop.eup %5004  ;;  %v935_v14 = vmul.f32 %v924_v58, %v916_v9  ;;  %v936_v15 = vmul.f32 %v928_v59, %v917_v10 }
 0x1d4   : > { %v952_v16 = vadd.f32 %v943_v61, %v933_v11  ;;  %v953_v17 = vadd.f32 %v947_v62, %v934_v12  ;;  %v918_v20 = vmul.f32 %v5005_v13, %v878_v31  ;;  %v919_v21 = vmul.f32 %v5005_v13, %v879_v32 }
 0x1d5   : > { %v954_v22 = vadd.f32 %v943_v61, %v935_v14  ;;  %v955_v23 = vadd.f32 %v947_v62, %v936_v15 }
 0x1d6   : > { %960 = vst [vmem:[#allocation2 + $0x10] sm:$0xff] %v952_v16  ;;  %961 = vst [vmem:[#allocation2 + $0x18] sm:$0xff] %v953_v17  ;;  %v937_v24 = vmul.f32 %v924_v58, %v918_v20  ;;  %v938_v25 = vmul.f32 %v928_v59, %v919_v21 }
 0x1d7   : > { %962 = vst [vmem:[#allocation2 + $0x20] sm:$0xff] %v954_v22  ;;  %963 = vst [vmem:[#allocation2 + $0x28] sm:$0xff] %v955_v23 }
 0x1d8   : > { %v956_v18 = vadd.f32 %v943_v61, %v937_v24  ;;  %v957_v19 = vadd.f32 %v947_v62, %v938_v25 }
 0x1da   : > { %964 = vst [vmem:[#allocation2 + $0x30] sm:$0xff] %v956_v18  ;;  %965 = vst [vmem:[#allocation2 + $0x38] sm:$0xff] %v957_v19 }
 0x1db PF: > { %v5006_v26 = vld [vmem:[%s5967_s6 + $0xc] ss:$24 sps:$4 sm:$0xff]   ;;  %v5008_v27 = vld [vmem:[%s5967_s6 + $0x8] ss:$24 sps:$4 sm:$0xff]   ;;  %v5009_v28 = vld [vmem:[%s5967_s6 + $0x3c] ss:$24 sps:$4 sm:$0xff]   ;;  %s7222_s4 = scalar_lea.vmem %s7158_s7, %s5982_s3  ;;  %s7224_s24 = scalar_lea.vmem %s7159_s8, %s5982_s3 }
 0x1dc   : > { %1802 = vmatprep.subr.bf16.mxu1 %v5006_v26  ;;  %v5011_v29 = vld [vmem:[%s5967_s6 + $0x4] ss:$24 sps:$4 sm:$0xff]   ;;  %v5013_v30 = vld [vmem:[%s5967_s6 + $0x38] ss:$24 sps:$4 sm:$0xff]   ;;  %v5017_v33 = vld [vmem:[%s5967_s6 + $0x34] ss:$24 sps:$4 sm:$0xff]   ;;  %s7225_s26 = scalar_lea.vmem %s7160_s9, %s5982_s3 }
 0x1dd   : > { %1803 = vmatpush1.bf16.msra.mxu1 %v5008_v27  ;;  %v5014_v31 = vld [vmem:[%s5967_s6] ss:$24 sps:$4 sm:$0xff]   ;;  %v5015_v32 = vld [vmem:[%s5967_s6 + $0x6c] ss:$24 sps:$4 sm:$0xff]   ;;  %1749 = vmatprep.subr.bf16.mxu0 %v5011_v29  ;;  %v5020_v34 = vld [vmem:[%s5967_s6 + $0x30] ss:$24 sps:$4 sm:$0xff]  }
 0x1de   : > { %1804 = vmatprep.subr.bf16.mxu1 %v5009_v28  ;;  %1750 = vmatpush1.bf16.msra.mxu0 %v5014_v31  ;;  %v5019_v35 = vld [vmem:[%s5967_s6 + $0x68] ss:$24 sps:$4 sm:$0xff]   ;;  %v5021_v36 = vld [vmem:[%s5967_s6 + $0x9c] ss:$24 sps:$4 sm:$0xff]   ;;  %v5025_v39 = vld [vmem:[%s5967_s6 + $0x98] ss:$24 sps:$4 sm:$0xff]  }
 0x1df   : > { %1751 = vmatprep.subr.bf16.mxu0 %v5017_v33  ;;  %v5023_v37 = vld [vmem:[%s5967_s6 + $0x64] ss:$24 sps:$4 sm:$0xff]   ;;  %v5026_v38 = vld [vmem:[%s5967_s6 + $0x60] ss:$24 sps:$4 sm:$0xff]   ;;  %v5029_v40 = vld [vmem:[%s5967_s6 + $0x94] ss:$24 sps:$4 sm:$0xff]  }
 0x1e0   : > { %v5027_v41 = vld [vmem:[%s5967_s6 + $0xcc] ss:$24 sps:$4 sm:$0xff]   ;;  %v5031_v42 = vld [vmem:[%s5967_s6 + $0xc8] ss:$24 sps:$4 sm:$0xff]   ;;  %v5033_v45 = vld [vmem:[%s5967_s6 + $0xfc] ss:$24 sps:$4 sm:$0xff]  }
 0x1e1   : > { %1805 = vmatpush1.bf16.msra.mxu1 %v5013_v30  ;;  %v5032_v43 = vld [vmem:[%s5967_s6 + $0x90] ss:$24 sps:$4 sm:$0xff]   ;;  %v5035_v44 = vld [vmem:[%s5967_s6 + $0xc4] ss:$24 sps:$4 sm:$0xff]   ;;  %v5038_v46 = vld [vmem:[%s5967_s6 + $0xc0] ss:$24 sps:$4 sm:$0xff]  }
 0x1e2   : > { %1806 = vmatprep.subr.bf16.mxu1 %v5015_v32  ;;  %1752 = vmatpush1.bf16.msra.mxu0 %v5020_v34  ;;  %v5037_v47 = vld [vmem:[%s5967_s6 + $0xf8] ss:$24 sps:$4 sm:$0xff]   ;;  %v5041_v48 = vld [vmem:[%s5967_s6 + $0xf4] ss:$24 sps:$4 sm:$0xff]   ;;  %v5043_v50 = vld [vmem:[%s5967_s6 + $0x128] ss:$24 sps:$4 sm:$0xff]  }
 0x1e3   : > { %1753 = vmatprep.subr.bf16.mxu0 %v5023_v37  ;;  %v5039_v49 = vld [vmem:[%s5967_s6 + $0x12c] ss:$24 sps:$4 sm:$0xff]   ;;  %v5044_v51 = vld [vmem:[%s5967_s6 + $0xf0] ss:$24 sps:$4 sm:$0xff]   ;;  %v5045_v53 = vld [vmem:[%s5967_s6 + $0x15c] ss:$24 sps:$4 sm:$0xff]  }
 0x1e4   : > { %v5047_v52 = vld [vmem:[%s5967_s6 + $0x124] ss:$24 sps:$4 sm:$0xff]   ;;  %v5050_v54 = vld [vmem:[%s5967_s6 + $0x120] ss:$24 sps:$4 sm:$0xff]   ;;  %v5053_v56 = vld [vmem:[%s5967_s6 + $0x154] ss:$24 sps:$4 sm:$0xff]  }
 0x1e5   : > { %1807 = vmatpush1.bf16.msra.mxu1 %v5019_v35  ;;  %v5049_v55 = vld [vmem:[%s5967_s6 + $0x158] ss:$24 sps:$4 sm:$0xff]   ;;  %v5051_v57 = vld [vmem:[%s5967_s6 + $0x18c] ss:$24 sps:$4 sm:$0xff]   ;;  %v5055_v58 = vld [vmem:[%s5967_s6 + $0x188] ss:$24 sps:$4 sm:$0xff]  }
 0x1e6   : > { %1808 = vmatprep.subr.bf16.mxu1 %v5021_v36  ;;  %1754 = vmatpush1.bf16.msra.mxu0 %v5026_v38  ;;  %v5056_v59 = vld [vmem:[%s5967_s6 + $0x150] ss:$24 sps:$4 sm:$0xff]   ;;  %v5059_v60 = vld [vmem:[%s5967_s6 + $0x184] ss:$24 sps:$4 sm:$0xff]   ;;  %v5062_v62 = vld [vmem:[%s5967_s6 + $0x180] ss:$24 sps:$4 sm:$0xff]  }
 0x1e7   : > { %1755 = vmatprep.subr.bf16.mxu0 %v5029_v40  ;;  %v5057_v61 = vld [vmem:[%s5967_s6 + $0x1bc] ss:$24 sps:$4 sm:$0xff]   ;;  %v5061_v63 = vld [vmem:[%s5967_s6 + $0x1b8] ss:$24 sps:$4 sm:$0xff]   ;;  %v5063_v1 = vld [vmem:[%s5967_s6 + $0x1ec] ss:$24 sps:$4 sm:$0xff]  }
 0x1e8   : > { %v5065_v0 = vld [vmem:[%s5967_s6 + $0x1b4] ss:$24 sps:$4 sm:$0xff]   ;;  %v5067_v2 = vld [vmem:[%s5967_s6 + $0x1e8] ss:$24 sps:$4 sm:$0xff]   ;;  %v5071_v4 = vld [vmem:[%s5967_s6 + $0x1e4] ss:$24 sps:$4 sm:$0xff]  }
 0x1e9   : > { %1809 = vmatpush1.bf16.msra.mxu1 %v5025_v39  ;;  %v5068_v3 = vld [vmem:[%s5967_s6 + $0x1b0] ss:$24 sps:$4 sm:$0xff]   ;;  %v5069_v5 = vld [vmem:[%s5967_s6 + $0x21c] ss:$24 sps:$4 sm:$0xff]   ;;  %v5074_v9 = vld [vmem:[%s5967_s6 + $0x1e0] ss:$24 sps:$4 sm:$0xff]   ;;  %v1239_v39 = vlaneseq }
 0x1ea   : > { %1810 = vmatprep.subr.bf16.mxu1 %v5027_v41  ;;  %1756 = vmatpush1.bf16.msra.mxu0 %v5032_v43  ;;  %v967_v6 = vld [vmem:[#allocation2 + $0x8] sm:$0xff]  ;;  %v969_v7 = vld [vmem:[#allocation2 + $0x18] sm:$0xff]  ;;  %v966_v27 = vld [vmem:[#allocation2] sm:$0xff]  ;;  %v5697_v38 = vmov 0.0   ;;  %vm5698_vm0 = vmmov 0   ;;  %s7220_s16 = sld [smem:[#allocation19_spill]] }
 0x1eb   : > { %1757 = vmatprep.subr.bf16.mxu0 %v5035_v44  ;;  %v5073_v8 = vld [vmem:[%s5967_s6 + $0x218] ss:$24 sps:$4 sm:$0xff]   ;;  %v975_v10 = vpack.c.bf16 %v969_v7, %v967_v6  ;;  %v5075_v11 = vld [vmem:[%s5967_s6 + $0x24c] ss:$24 sps:$4 sm:$0xff]   ;;  %v5079_v14 = vld [vmem:[%s5967_s6 + $0x248] ss:$24 sps:$4 sm:$0xff]  }
 0x1ec   : > { %v5077_v12 = vld [vmem:[%s5967_s6 + $0x214] ss:$24 sps:$4 sm:$0xff]   ;;  %v5080_v13 = vld [vmem:[%s5967_s6 + $0x210] ss:$24 sps:$4 sm:$0xff]   ;;  %v5083_v15 = vld [vmem:[%s5967_s6 + $0x244] ss:$24 sps:$4 sm:$0xff]  }
 0x1ed   : > { %1811 = vmatpush1.bf16.msra.mxu1 %v5031_v42  ;;  %1834 = vmatprep.mubr.bf16.mxu1 %v975_v10  ;;  %v5081_v16 = vld [vmem:[%s5967_s6 + $0x27c] ss:$24 sps:$4 sm:$0xff]   ;;  %v5086_v17 = vld [vmem:[%s5967_s6 + $0x240] ss:$24 sps:$4 sm:$0xff]   ;;  %v5087_v22 = vld [vmem:[%s5967_s6 + $0x2ac] ss:$24 sps:$4 sm:$0xff]  }
 0x1ee   : > { %1812 = vmatprep.subr.bf16.mxu1 %v5033_v45  ;;  %1758 = vmatpush1.bf16.msra.mxu0 %v5038_v46  ;;  %v5085_v20 = vld [vmem:[%s5967_s6 + $0x278] ss:$24 sps:$4 sm:$0xff]   ;;  %v5089_v21 = vld [vmem:[%s5967_s6 + $0x274] ss:$24 sps:$4 sm:$0xff]   ;;  %v5091_v24 = vld [vmem:[%s5967_s6 + $0x2a8] ss:$24 sps:$4 sm:$0xff]  }
 0x1ef   : > { %1759 = vmatprep.subr.bf16.mxu0 %v5041_v48  ;;  %1781 = vmatprep.mubr.bf16.mxu0 %v975_v10  ;;  %v5092_v23 = vld [vmem:[%s5967_s6 + $0x270] ss:$24 sps:$4 sm:$0xff]   ;;  %v5095_v25 = vld [vmem:[%s5967_s6 + $0x2a4] ss:$24 sps:$4 sm:$0xff]   ;;  %v5098_v19 = vld [vmem:[%s5967_s6 + $0x2a0] ss:$24 sps:$4 sm:$0xff]  }
 0x1f0   : > { %v5093_v18 = vld [vmem:[%s5967_s6 + $0x2dc] ss:$24 sps:$4 sm:$0xff]   ;;  %v5097_v26 = vld [vmem:[%s5967_s6 + $0x2d8] ss:$24 sps:$4 sm:$0xff]   ;;  %v971_v32 = vld [vmem:[#allocation2 + $0x28] sm:$0xff]  ;;  %v6145_v40 = vshrl.u32 %v1239_v39, 7 }
 0x1f1   : > { %1813 = vmatpush1.bf16.msra.mxu1 %v5037_v47  ;;  %v968_v28 = vld [vmem:[#allocation2 + $0x10] sm:$0xff]  ;;  %v973_v33 = vld [vmem:[#allocation2 + $0x38] sm:$0xff]  ;;  %v970_v35 = vld [vmem:[#allocation2 + $0x20] sm:$0xff]  ;;  %vm1961_vm1 = vcmask 130048   ;;  %p4802_p7 = scmp.ne.s32.totalorder %s5820_s1, 1 }
 0x1f2   : > { %1814 = vmatprep.subr.bf16.mxu1 %v5039_v49  ;;  %1760 = vmatpush1.bf16.msra.mxu0 %v5044_v51  ;;  %v5099_v29 = vld [vmem:[%s5967_s6 + $0x2d4] ss:$24 sps:$4 sm:$0xff]   ;;  %v5101_v30 = vld [vmem:[%s5967_s6 + $0x2d0] ss:$24 sps:$4 sm:$0xff]   ;;  %v6130_v31 = vpack.c.bf16 %v968_v28, %v966_v27  ;;  %v6134_v34 = vpack.c.bf16 %v973_v33, %v971_v32  ;;  %v7184_v41 = vsub.s32 2, %v6145_v40  ;;  %v7183_v43 = vsub.s32 3, %v6145_v40 }
 0x1f3   : > { %1761 = vmatprep.subr.bf16.mxu0 %v5047_v52  ;;  %v972_v36 = vld [vmem:[#allocation2 + $0x30] sm:$0xff]  ;;  %v6149_v42 = vld [vmem:[%s5995_s17] sm:$0x3f]  ;;  %v6153_v44 = vsub.s32 0, %v6145_v40  ;;  %v6156_v45 = vsub.s32 1, %v6145_v40  ;;  %s7230_s17 = sld [smem:[#allocation27_spill]] (!%p4802_p7) }
 0x1f4   : > { %v6136_v37 = vpack.c.bf16 %v972_v36, %v970_v35  ;;  %v1250_v46 = vrot.slane %v6149_v42, %v7184_v41  ;;  %v1254_v48 = vrot.slane %v6149_v42, %v7183_v43  ;;  %v5111_v27 = vld [vmem:[%s5967_s6 + $0xa0] ss:$24 sps:$4 sm:$0xff]   ;;  %v5116_v28 = vld [vmem:[%s5967_s6 + $0xd4] ss:$24 sps:$4 sm:$0xff]   ;;  %v5120_v35 = vld [vmem:[%s5967_s6 + $0x130] ss:$24 sps:$4 sm:$0xff]  }
 0x1f5   : > { %1815 = vmatpush1.bf16.msra.mxu1 %v5043_v50  ;;  %v6166_v49 = vrot.slane %v6149_v42, %v6153_v44  ;;  %v6170_v51 = vrot.slane %v6149_v42, %v6156_v45  ;;  %v5117_v32 = vld [vmem:[%s5967_s6 + $0x100] ss:$24 sps:$4 sm:$0xff]   ;;  %v5122_v33 = vld [vmem:[%s5967_s6 + $0x134] ss:$24 sps:$4 sm:$0xff]   ;;  %v5125_v36 = vld [vmem:[%s5967_s6 + $0x164] ss:$24 sps:$4 sm:$0xff]  }
 0x1f6   : > { %1816 = vmatprep.subr.bf16.mxu1 %v5045_v53  ;;  %1762 = vmatpush1.bf16.msra.mxu0 %v5050_v54  ;;  %v5123_v39 = vld [vmem:[%s5967_s6 + $0x160] ss:$24 sps:$4 sm:$0xff]   ;;  %vm4038_vm2 = vcmask (!%p4802_p7), 1040384  }
 0x1f7   : > { %1763 = vmatprep.subr.bf16.mxu0 %v5053_v56 }
 0x1f9   : > { %1817 = vmatpush1.bf16.msra.mxu1 %v5049_v55 }
 0x1fa   : > { %1818 = vmatprep.subr.bf16.mxu1 %v5051_v57  ;;  %1764 = vmatpush1.bf16.msra.mxu0 %v5056_v59 }
 0x1fb   : > { %1765 = vmatprep.subr.bf16.mxu0 %v5059_v60 }
 0x1fd   : > { %1819 = vmatpush1.bf16.msra.mxu1 %v5055_v58 }
 0x1fe   : > { %1820 = vmatprep.subr.bf16.mxu1 %v5057_v61  ;;  %1766 = vmatpush1.bf16.msra.mxu0 %v5062_v62 }
 0x1ff   : > { %1767 = vmatprep.subr.bf16.mxu0 %v5065_v0 }
 0x201   : > { %1821 = vmatpush1.bf16.msra.mxu1 %v5061_v63 }
 0x202   : > { %1822 = vmatprep.subr.bf16.mxu1 %v5063_v1  ;;  %1768 = vmatpush1.bf16.msra.mxu0 %v5068_v3 }
 0x203   : > { %1769 = vmatprep.subr.bf16.mxu0 %v5071_v4 }
 0x205   : > { %1823 = vmatpush1.bf16.msra.mxu1 %v5067_v2 }
 0x206   : > { %1824 = vmatprep.subr.bf16.mxu1 %v5069_v5  ;;  %1770 = vmatpush1.bf16.msra.mxu0 %v5074_v9 }
 0x207   : > { %1771 = vmatprep.subr.bf16.mxu0 %v5077_v12 }
 0x209   : > { %1825 = vmatpush1.bf16.msra.mxu1 %v5073_v8 }
 0x20a   : > { %1826 = vmatprep.subr.bf16.mxu1 %v5075_v11  ;;  %1772 = vmatpush1.bf16.msra.mxu0 %v5080_v13 }
 0x20b   : > { %1773 = vmatprep.subr.bf16.mxu0 %v5083_v15 }
 0x20d   : > { %1827 = vmatpush1.bf16.msra.mxu1 %v5079_v14 }
 0x20e   : > { %1828 = vmatprep.subr.bf16.mxu1 %v5081_v16  ;;  %1774 = vmatpush1.bf16.msra.mxu0 %v5086_v17 }
 0x20f   : > { %1775 = vmatprep.subr.bf16.mxu0 %v5089_v21 }
 0x211   : > { %1829 = vmatpush1.bf16.msra.mxu1 %v5085_v20 }
 0x212   : > { %1830 = vmatprep.subr.bf16.mxu1 %v5087_v22  ;;  %1776 = vmatpush1.bf16.msra.mxu0 %v5092_v23  ;;  %v5102_v22 = vld [vmem:[%s5967_s6 + $0x10] ss:$24 sps:$4 sm:$0xff]   ;;  %v5104_v23 = vld [vmem:[%s5967_s6 + $0x14] ss:$24 sps:$4 sm:$0xff]  }
 0x213   : > { %1777 = vmatprep.subr.bf16.mxu0 %v5095_v25  ;;  %v5105_v25 = vld [vmem:[%s5967_s6 + $0x40] ss:$24 sps:$4 sm:$0xff]  }
 0x215   : > { %1831 = vmatpush1.bf16.msra.mxu1 %v5091_v24  ;;  %v5107_v24 = vld [vmem:[%s5967_s6 + $0x44] ss:$24 sps:$4 sm:$0xff]  }
 0x216   : > { %1832 = vmatprep.subr.bf16.mxu1 %v5093_v18  ;;  %1778 = vmatpush1.bf16.msra.mxu0 %v5098_v19  ;;  %v5110_v18 = vld [vmem:[%s5967_s6 + $0x74] ss:$24 sps:$4 sm:$0xff]   ;;  %v5108_v19 = vld [vmem:[%s5967_s6 + $0x70] ss:$24 sps:$4 sm:$0xff]  }
 0x217   : > { %1779 = vmatprep.subr.bf16.mxu0 %v5099_v29  ;;  %v5114_v29 = vld [vmem:[%s5967_s6 + $0xd0] ss:$24 sps:$4 sm:$0xff]  }
 0x219   : > { %1833 = vmatpush1.bf16.msra.mxu1 %v5097_v26  ;;  %v5113_v26 = vld [vmem:[%s5967_s6 + $0xa4] ss:$24 sps:$4 sm:$0xff]  }
 0x21a   : > { %1780 = vmatpush1.bf16.msra.mxu0 %v5101_v30  ;;  %4859 = vmatprep.subr.bf16.mxu1 %v5697_v38  ;;  %v5119_v30 = vld [vmem:[%s5967_s6 + $0x104] ss:$24 sps:$4 sm:$0xff]  }
 0x21b   : > { %1855 = vmatprep.subr.bf16.mxu0 %v5104_v23 }
 0x21c   : > { %1835 = vmatmul.mubr.bf16.vlgmr.msra.gmra.mrb[0].mxu1 %v6130_v31 }
 0x21d   : > { %1782 = vmatmul.mubr.bf16.vlgmr.msra.gmra.mrb[0].mxu0 %v6130_v31  ;;  %1844 = vmatprep.mubr.bf16.mxu1 %v6134_v34 }
 0x21e   : > { %1791 = vmatprep.mubr.bf16.mxu0 %v6134_v34  ;;  %1856 = vmatpush1.bf16.msra.mxu0 %v5102_v22 }
 0x21f   : > { %1857 = vmatprep.subr.bf16.mxu0 %v5107_v24 }
 0x222   : > { %1858 = vmatpush1.bf16.msra.mxu0 %v5105_v25 }
 0x223   : > { %1859 = vmatprep.subr.bf16.mxu0 %v5110_v18 }
 0x224   : > { %1845 = vmatmul.mubr.bf16.gmra.mrb[4].mxu1 %v6136_v37 }
 0x225   : > { %1792 = vmatmul.mubr.bf16.gmra.mrb[4].mxu0 %v6136_v37  ;;  %4861 = vmatprep.mubr.msk.bf16.mxu1 %vm5698_vm0, %v5697_v38 }
 0x226   : > { %1887 = vmatprep.mubr.bf16.mxu0 %v975_v10  ;;  %1860 = vmatpush1.bf16.msra.mxu0 %v5108_v19 }
 0x227   : > { %1861 = vmatprep.subr.bf16.mxu0 %v5113_v26 }
 0x22a   : > { %1862 = vmatpush1.bf16.msra.mxu0 %v5111_v27 }
 0x22b   : > { %1863 = vmatprep.subr.bf16.mxu0 %v5116_v28 }
 0x22e   : > { %1864 = vmatpush1.bf16.msra.mxu0 %v5114_v29 }
 0x22f   : > { %1865 = vmatprep.subr.bf16.mxu0 %v5119_v30 }
 0x232   : > { %1866 = vmatpush1.bf16.msra.mxu0 %v5117_v32 }
 0x233   : > { %1867 = vmatprep.subr.bf16.mxu0 %v5122_v33 }
 0x236   : > { %1868 = vmatpush1.bf16.msra.mxu0 %v5120_v35 }
 0x237   : > { %1869 = vmatprep.subr.bf16.mxu0 %v5125_v36 }
 0x23a   : > { %1870 = vmatpush1.bf16.msra.mxu0 %v5123_v39 }
 0x2ef   : > { %v1836_v47 = vpop.f32.mrb[0].mxu1 }
 0x2f0   : > { %v1838_v50 = vpop.f32.mrb[1].mxu1  ;;  %v1837_v53 = vadd.f32 %v1836_v47, %v1250_v46  ;;  %v1783_v56 = vpop.f32.mrb[0].mxu0  ;;  %v5126_v47 = vld [vmem:[%s5967_s6 + $0x190] ss:$24 sps:$4 sm:$0xff]  }
 0x2f1   : > { %v1840_v52 = vpop.f32.mrb[2].mxu1  ;;  %v6172_v57 = vadd.f32 %v1838_v50, %v1254_v48  ;;  %v1784_v59 = vadd.f32 %v1783_v56, %v6166_v49  ;;  %v1785_v60 = vpop.f32.mrb[1].mxu0  ;;  %v5129_v50 = vld [vmem:[%s5967_s6 + $0x1c0] ss:$24 sps:$4 sm:$0xff]   ;;  %v5140_v56 = vld [vmem:[%s5967_s6 + $0x254] ss:$24 sps:$4 sm:$0xff]  }
 0x2f2   : > { %v1841_v54 = vadd.f32 %v1840_v52, %v1250_v46  ;;  %v1842_v55 = vpop.f32.mrb[3].mxu1  ;;  %v1786_v62 = vadd.f32 %v1785_v60, %v6170_v51  ;;  %v1787_v63 = vpop.f32.mrb[2].mxu0  ;;  %v5134_v52 = vld [vmem:[%s5967_s6 + $0x1f4] ss:$24 sps:$4 sm:$0xff]   ;;  %v5143_v60 = vld [vmem:[%s5967_s6 + $0x284] ss:$24 sps:$4 sm:$0xff]  }
 0x2f3   : > { %v6174_v58 = vadd.f32 %v1842_v55, %v1254_v48  ;;  %v1915_v1 = vmul.f32 0.088388346, %v1784_v59  ;;  %v1788_v2 = vadd.f32 %v1787_v63, %v6166_v49  ;;  %v1789_v3 = vpop.f32.mrb[3].mxu0  ;;  %v5135_v55 = vld [vmem:[%s5967_s6 + $0x220] ss:$24 sps:$4 sm:$0xff]  }
 0x2f4   : > { %v1918_v61 = vpack.c.bf16 %v1841_v54, %v1837_v53  ;;  %v6181_v4 = vmul.f32 0.088388346, %v1786_v62  ;;  %v1790_v5 = vadd.f32 %v1789_v3, %v6170_v51  ;;  %v5132_v53 = vld [vmem:[%s5967_s6 + $0x1f0] ss:$24 sps:$4 sm:$0xff]   ;;  %v5137_v54 = vld [vmem:[%s5967_s6 + $0x224] ss:$24 sps:$4 sm:$0xff]  }
 0x2f5   : > { %v2033_v0 = vpack.c.bf16 %v6174_v58, %v6172_v57  ;;  %v1916_v6 = vmul.f32 0.088388346, %v1788_v2  ;;  %v5138_v59 = vld [vmem:[%s5967_s6 + $0x250] ss:$24 sps:$4 sm:$0xff]   ;;  %v5146_v62 = vld [vmem:[%s5967_s6 + $0x2b4] ss:$24 sps:$4 sm:$0xff]  }
 0x2f6   : > { %4860 = vmatpush3.bf16.xpose.msra.mxu1 %v1918_v61  ;;  %v6185_v7 = vmul.f32 0.088388346, %v1790_v5  ;;  %v5141_v61 = vld [vmem:[%s5967_s6 + $0x280] ss:$24 sps:$4 sm:$0xff]   ;;  %v5144_v63 = vld [vmem:[%s5967_s6 + $0x2b0] ss:$24 sps:$4 sm:$0xff]  }
 0x2f7   : > { %4865 = vmatprep.subr.bf16.mxu1 %v5697_v38  ;;  %v1917_v8 = vpack.c.bf16 %v1916_v6, %v1915_v1  ;;  %v1846_v10 = vpop.f32.mrb[4].mxu1  ;;  %v5149_v1 = vld [vmem:[%s5967_s6 + $0x2e4] ss:$24 sps:$4 sm:$0xff]   ;;  %v5147_v2 = vld [vmem:[%s5967_s6 + $0x2e0] ss:$24 sps:$4 sm:$0xff]  }
 0x2f8   : > { %v2032_v9 = vpack.c.bf16 %v6185_v7, %v6181_v4  ;;  %v6191_v11 = vadd.f32 %v1846_v10, %v1250_v46  ;;  %v1848_v12 = vpop.f32.mrb[5].mxu1  ;;  %v6241_v3 = vld [vmem:[%s7220_s16] ss:$0 sm:$0xff] }
 0x2f9   : > { %v6193_v13 = vadd.f32 %v1848_v12, %v1254_v48  ;;  %v1850_v14 = vpop.f32.mrb[6].mxu1 }
 0x2fa   : > { %v6195_v15 = vadd.f32 %v1850_v14, %v1250_v46  ;;  %v1852_v16 = vpop.f32.mrb[7].mxu1  ;;  %v5128_v46 = vld [vmem:[%s5967_s6 + $0x194] ss:$24 sps:$4 sm:$0xff]  }
 0x2fb   : > { %v6197_v17 = vadd.f32 %v1852_v16, %v1254_v48  ;;  %1871 = vmatprep.subr.bf16.mxu0 %v5128_v46  ;;  %v5131_v48 = vld [vmem:[%s5967_s6 + $0x1c4] ss:$24 sps:$4 sm:$0xff]  }
 0x2fc   : > { %v2420_v20 = vpack.c.bf16 %v6195_v15, %v6191_v11  ;;  %1872 = vmatpush1.bf16.msra.mxu0 %v5126_v47 }
 0x2fd   : > { %4862 = vmatmul.mubr.bf16.vlgmr.msra.gmra.mrb[8].mxu1 %v1917_v8  ;;  %v2534_v21 = vpack.c.bf16 %v6197_v17, %v6193_v13  ;;  %1873 = vmatprep.subr.bf16.mxu0 %v5131_v48 }
 0x2fe   : > { %4867 = vmatprep.mubr.msk.bf16.mxu1 %vm5698_vm0, %v5697_v38 }
 0x300   : > { %1874 = vmatpush1.bf16.msra.mxu0 %v5129_v50 }
 0x301   : > { %1875 = vmatprep.subr.bf16.mxu0 %v5134_v52 }
 0x304   : > { %1876 = vmatpush1.bf16.msra.mxu0 %v5132_v53 }
 0x305   : > { %1877 = vmatprep.subr.bf16.mxu0 %v5137_v54  ;;  %v1257_v54 = vsub.s32 4, %v6145_v40 }
 0x308   : > { %1878 = vmatpush1.bf16.msra.mxu0 %v5135_v55 }
 0x309   : > { %1879 = vmatprep.subr.bf16.mxu0 %v5140_v56  ;;  %v1261_v56 = vsub.s32 5, %v6145_v40 }
 0x30c   : > { %1880 = vmatpush1.bf16.msra.mxu0 %v5138_v59  ;;  %v6271_v59 = vrot.slane %v6149_v42, %v1261_v56  ;;  %v6314_v56 = vld [vmem:[%s5974_s20 + $0x94] ss:$8 sps:$4 sm:$0xff]  }
 0x30d   : > { %1881 = vmatprep.subr.bf16.mxu0 %v5143_v60 }
 0x310   : > { %1882 = vmatpush1.bf16.msra.mxu0 %v5141_v61 }
 0x311   : > { %1883 = vmatprep.subr.bf16.mxu0 %v5146_v62 }
 0x314   : > { %1884 = vmatpush1.bf16.msra.mxu0 %v5144_v63 }
 0x315   : > { %1885 = vmatprep.subr.bf16.mxu0 %v5149_v1 }
 0x318   : > { %1886 = vmatpush1.bf16.msra.mxu0 %v5147_v2 }
 0x31b   : > { %1888 = vmatmul.mubr.bf16.vlgmr.msra.gmra.mrb[8].mxu0 %v6130_v31 }
 0x31c   : > { %1897 = vmatprep.mubr.bf16.mxu0 %v6134_v34 }
 0x323   : > { %1898 = vmatmul.mubr.bf16.gmra.mrb[12].mxu0 %v6136_v37  ;;  %v1793_v37 = vpop.f32.mrb[4].mxu0 }
 0x324   : > { %v1794_v29 = vadd.f32 %v1793_v37, %v6166_v49  ;;  %v1795_v30 = vpop.f32.mrb[5].mxu0 }
 0x325   : > { %v1797_v32 = vpop.f32.mrb[6].mxu0  ;;  %v1796_v36 = vadd.f32 %v1795_v30, %v6170_v51 }
 0x326   : > { %v1799_v33 = vpop.f32.mrb[7].mxu0  ;;  %v6250_v35 = vmul.f32 0.088388346, %v1794_v29  ;;  %v1798_v39 = vadd.f32 %v1797_v32, %v6166_v49 }
 0x327   : > { %v1800_v46 = vadd.f32 %v1799_v33, %v6170_v51  ;;  %v6255_v47 = vmul.f32 0.088388346, %v1796_v36  ;;  %v6268_v51 = vrot.slane %v6149_v42, %v1257_v54  ;;  %v6308_v54 = vld [vmem:[%s5974_s20 + $0x80] ss:$8 sps:$4 sm:$0xff]  }
 0x328   : > { %v6257_v48 = vmul.f32 0.088388346, %v1798_v39  ;;  %v6303_v39 = vld [vmem:[%s5974_s20 + $0x4] ss:$8 sps:$4 sm:$0xff]  }
 0x329   : > { %v6259_v50 = vmul.f32 0.088388346, %v1800_v46  ;;  %v7185_v46 = vmov 0  }
 0x32a   : > { %v2419_v52 = vpack.c.bf16 %v6257_v48, %v6250_v35  ;;  %2256 = vmatprep.mubr.bf16.mxu0 %v7185_v46  ;;  %v4671_v48 = vld [vmem:[%s7220_s16 + $0x1] ss:$0 sm:$0xff] }
 0x32b   : > { %v2533_v53 = vpack.c.bf16 %v6259_v50, %v6255_v47 }
 0x3d0   : > { %v1954_v5 = vpop.f32.mrb[8].mxu1 }
 0x3d1   : > { %v1955_v6 = vadd.f32 %v6241_v3, %v1954_v5  ;;  %v4863_v8 = vpop.f32.mrb[9].mxu1 }
 0x3d2   : > { %v1957_v10 = vpop.f32.mrb[10].mxu1 }
 0x3d3   : > { %v1962_v12 = vsel %vm1961_vm1, %v1955_v6, -inf  ;;  %v1958_v14 = vadd.f32 %v6241_v3, %v1957_v10  ;;  %v4864_v31 = vpop.f32.mrb[11].mxu1 }
 0x3d4   : > { %1963 = vmax.xlane.f32.xlu0 %v1962_v12 }
 0x3d5   : > { %v1965_v34 = vsel %vm1961_vm1, %v1958_v14, -inf }
 0x3d8   : > { %1966 = vmax.xlane.f32.xlu0 %v1965_v34 }
 0x3ee   : > { %v1889_v55 = vpop.f32.mrb[8].mxu0 }
 0x3ef   : > { %v1891_v49 = vpop.f32.mrb[9].mxu0  ;;  %v1890_v62 = vadd.f32 %v1889_v55, %v6268_v51  ;;  %v6311_v55 = vld [vmem:[%s5974_s20 + $0x84] ss:$8 sps:$4 sm:$0xff]  }
 0x3f0   : > { %v1893_v60 = vpop.f32.mrb[10].mxu0  ;;  %v1892_v63 = vadd.f32 %v1891_v49, %v6271_v59  ;;  %2224 = vmatprep.subr.bf16.mxu0 %v6311_v55  ;;  %v6319_v49 = vld [vmem:[%s5974_s20 + $0x90] ss:$8 sps:$4 sm:$0xff]  }
 0x3f1   : > { %v1895_v61 = vpop.f32.mrb[11].mxu0  ;;  %v1894_v1 = vadd.f32 %v1893_v60, %v6268_v51  ;;  %2225 = vmatpush1.bf16.msra.mxu0 %v6308_v54  ;;  %v6323_v60 = vld [vmem:[%s5974_s20 + $0xa4] ss:$8 sps:$4 sm:$0xff]  }
 0x3f2   : > { %v1896_v2 = vadd.f32 %v1895_v61, %v6271_v59  ;;  %2226 = vmatprep.subr.bf16.mxu0 %v6314_v56  ;;  %v6327_v61 = vld [vmem:[%s5974_s20 + $0xa0] ss:$8 sps:$4 sm:$0xff]  }
 0x3f3   : > { %v1919_v5 = vpack.c.bf16 %v1894_v1, %v1890_v62  ;;  %v6331_v62 = vld [vmem:[%s5974_s20 + $0xb4] ss:$8 sps:$4 sm:$0xff]   ;;  %v6339_v1 = vld [vmem:[%s5974_s20 + $0xc4] ss:$8 sps:$4 sm:$0xff]  }
 0x3f5   : > { %4866 = vmatpush3.bf16.msra.mxu1 %v1919_v5  ;;  %2227 = vmatpush1.bf16.msra.mxu0 %v6319_v49  ;;  %v6347_v5 = vld [vmem:[%s5974_s20 + $0xd4] ss:$8 sps:$4 sm:$0xff]  }
 0x3f6   : > { %4871 = vmatprep.subr.bf16.mxu1 %v5697_v38  ;;  %2228 = vmatprep.subr.bf16.mxu0 %v6323_v60 }
 0x3f9   : > { %2229 = vmatpush1.bf16.msra.mxu0 %v6327_v61 }
 0x3fa   : > { %2230 = vmatprep.subr.bf16.mxu0 %v6331_v62 }
 0x461   : > { %v1964_v16 = vpop.xlane.xlu0 %1963 }
 0x462   : > { %v1968_v22 = vsub.f32 %v1955_v6, %v1964_v16  ;;  %v2034_v6 = vpack.c.bf16 %v1896_v2, %v1892_v63  ;;  %v6335_v63 = vld [vmem:[%s5974_s20 + $0xb0] ss:$8 sps:$4 sm:$0xff]   ;;  %v6343_v2 = vld [vmem:[%s5974_s20 + $0xc0] ss:$8 sps:$4 sm:$0xff]  }
 0x463   : > { %2231 = vmatpush1.bf16.msra.mxu0 %v6335_v63 }
 0x464   : > { %v1970_v23 = vmul.f32 1.442695, %v1968_v22  ;;  %2232 = vmatprep.subr.bf16.mxu0 %v6339_v1 }
 0x465   : > { %v1967_v24 = vpop.xlane.xlu0 %1966 }
 0x466   : > { %5390 = vpow2.f32 %v1970_v23  ;;  %v1969_v25 = vsub.f32 %v1958_v14, %v1967_v24 }
 0x467   : > { %2233 = vmatpush1.bf16.msra.mxu0 %v6343_v2 }
 0x468   : > { %v1972_v18 = vmul.f32 1.442695, %v1969_v25  ;;  %2234 = vmatprep.subr.bf16.mxu0 %v6347_v5 }
 0x46a   : > { %5392 = vpow2.f32 %v1972_v18 }
 0x470   : > { %v5391_v19 = vpop.eup %5390 }
 0x471   : > { %v1974_v26 = vsel %vm1961_vm1, %v5391_v19, 0.0 }
 0x472   : > { %1975 = vadd.xlane.f32.xlu1 %v1974_v26 }
 0x474   : > { %v5393_v27 = vpop.eup %5392 }
 0x475   : > { %v1977_v28 = vsel %vm1961_vm1, %v5393_v27, 0.0 }
 0x476   : > { %1978 = vadd.xlane.f32.xlu1 %v1977_v28 }
 0x4ff   : > { %v1976_v8 = vpop.xlane.xlu1 %1975 }
 0x500   : > { %5394 = vrcp.f32 %v1976_v8  ;;  %v6355_v8 = vld [vmem:[%s5974_s20 + $0xe4] ss:$8 sps:$4 sm:$0xff]  }
 0x503   : > { %v1979_v10 = vpop.xlane.xlu1 %1978 }
 0x504   : > { %5396 = vrcp.f32 %v1979_v10  ;;  %v6359_v10 = vld [vmem:[%s5974_s20 + $0xe0] ss:$8 sps:$4 sm:$0xff]  }
 0x50a   : > { %v5395_v42 = vpop.eup %5394 }
 0x50b   : > { %v1982_v14 = vmul.f32 %v5395_v42, %v5391_v19  ;;  %v6363_v42 = vld [vmem:[%s5974_s20 + $0xf4] ss:$8 sps:$4 sm:$0xff]  }
 0x50e   : > { %v5397_v12 = vpop.eup %5396 }
 0x50f   : > { %v1983_v31 = vmul.f32 %v5397_v12, %v5393_v27  ;;  %v6367_v12 = vld [vmem:[%s5974_s20 + $0xf0] ss:$8 sps:$4 sm:$0xff]  }
 0x511   : > { %v1984_v34 = vpack.c.bf16 %v1983_v31, %v1982_v14 }
 0x513   : > { %4868 = vmatmul.mubr.msk.bf16.vlgmr.msra.gmra.mrb[12].mxu1 %vm1961_vm1, %v1984_v34 }
 0x514   : > { %4872 = vmatpush3.bf16.xpose.msra.mxu1 %v2033_v0  ;;  %4873 = vmatprep.mubr.msk.bf16.mxu1 %vm5698_vm0, %v5697_v38 }
 0x515   : > { %4877 = vmatprep.subr.bf16.mxu1 %v5697_v38 }
 0x51b   : > { %4874 = vmatmul.mubr.bf16.vlgmr.msra.gmra.mrb[16].mxu1 %v2032_v9 }
 0x51c   : > { %4878 = vmatpush3.bf16.msra.mxu1 %v2034_v6  ;;  %4879 = vmatprep.mubr.msk.bf16.mxu1 %vm5698_vm0, %v5697_v38  ;;  %v6351_v6 = vld [vmem:[%s5974_s20 + $0xd0] ss:$8 sps:$4 sm:$0xff]  }
 0x51d   : > { %2347 = vmatprep.subr.bf16.mxu1 %v6303_v39  ;;  %2235 = vmatpush1.bf16.msra.mxu0 %v6351_v6 }
 0x51e   : > { %2236 = vmatprep.subr.bf16.mxu0 %v6355_v8 }
 0x521   : > { %2237 = vmatpush1.bf16.msra.mxu0 %v6359_v10 }
 0x522   : > { %2238 = vmatprep.subr.bf16.mxu0 %v6363_v42 }
 0x525   : > { %2239 = vmatpush1.bf16.msra.mxu0 %v6367_v12 }
 0x526   : > { %4883 = vmatprep.subr.bf16.mxu0 %v5697_v38 }
 0x5e6   : > { %v6290_v37 = vpop.f32.mrb[12].mxu1 }
 0x5e7   : > { %v4869_v16 = vpop.f32.mrb[13].mxu1 }
 0x5e8   : > { %v6292_v22 = vpop.f32.mrb[14].mxu1 }
 0x5e9   : > { %v2029_v57 = vpack.c.bf16 %v6292_v22, %v6290_v37  ;;  %v4870_v58 = vpop.f32.mrb[15].mxu1 }
 0x5ee   : > { %v2069_v0 = vpop.f32.mrb[16].mxu1 }
 0x5ef   : > { %v2070_v23 = vadd.f32 %v6241_v3, %v2069_v0  ;;  %v4875_v24 = vpop.f32.mrb[17].mxu1 }
 0x5f0   : > { %v2072_v25 = vpop.f32.mrb[18].mxu1 }
 0x5f1   : > { %v2073_v4 = vadd.f32 %v6241_v3, %v2072_v25  ;;  %v4876_v7 = vpop.f32.mrb[19].mxu1  ;;  %v2076_v9 = vsel %vm1961_vm1, %v2070_v23, -inf  ;;  %v6376_v25 = vld [vmem:[%s5974_s20 + $0x14] ss:$8 sps:$4 sm:$0xff]  }
 0x5f2   : > { %2077 = vmax.xlane.f32.xlu0 %v2076_v9  ;;  %v6386_v7 = vld [vmem:[%s5974_s20 + $0x24] ss:$8 sps:$4 sm:$0xff]   ;;  %v6390_v9 = vld [vmem:[%s5974_s20 + $0x20] ss:$8 sps:$4 sm:$0xff]  }
 0x5f3   : > { %v2079_v18 = vsel %vm1961_vm1, %v2073_v4, -inf }
 0x5f4   : > { %2080 = vmax.xlane.f32.xlu1 %v2079_v18  ;;  %v6394_v18 = vld [vmem:[%s5974_s20 + $0x34] ss:$8 sps:$4 sm:$0xff]  }
 0x67f   : > { %v2078_v19 = vpop.xlane.xlu0 %2077 }
 0x680   : > { %v2082_v26 = vsub.f32 %v2070_v23, %v2078_v19  ;;  %v6373_v23 = vld [vmem:[%s5974_s20] ss:$8 sps:$4 sm:$0xff]   ;;  %v6398_v19 = vld [vmem:[%s5974_s20 + $0x30] ss:$8 sps:$4 sm:$0xff]  }
 0x681   : > { %v2081_v27 = vpop.xlane.xlu1 %2080 }
 0x682   : > { %v2084_v28 = vmul.f32 1.442695, %v2082_v26  ;;  %v2083_v29 = vsub.f32 %v2073_v4, %v2081_v27  ;;  %v6381_v4 = vld [vmem:[%s5974_s20 + $0x10] ss:$8 sps:$4 sm:$0xff]   ;;  %v6402_v26 = vld [vmem:[%s5974_s20 + $0x44] ss:$8 sps:$4 sm:$0xff]  }
 0x683   : > { %v6406_v27 = vld [vmem:[%s5974_s20 + $0x40] ss:$8 sps:$4 sm:$0xff]  }
 0x684   : > { %5398 = vpow2.f32 %v2084_v28  ;;  %v2086_v30 = vmul.f32 1.442695, %v2083_v29  ;;  %v6410_v28 = vld [vmem:[%s5974_s20 + $0x54] ss:$8 sps:$4 sm:$0xff]   ;;  %v6414_v29 = vld [vmem:[%s5974_s20 + $0x50] ss:$8 sps:$4 sm:$0xff]  }
 0x686   : > { %5400 = vpow2.f32 %v2086_v30  ;;  %v6418_v30 = vld [vmem:[%s5974_s20 + $0x64] ss:$8 sps:$4 sm:$0xff]  }
 0x68e   : > { %v5399_v3 = vpop.eup %5398 }
 0x68f   : > { %v2088_v32 = vsel %vm1961_vm1, %v5399_v3, 0.0 }
 0x690   : > { %v5401_v33 = vpop.eup %5400  ;;  %2089 = vadd.xlane.f32.xlu0 %v2088_v32  ;;  %v6426_v32 = vld [vmem:[%s5974_s20 + $0x74] ss:$8 sps:$4 sm:$0xff]  }
 0x691   : > { %v2091_v36 = vsel %vm1961_vm1, %v5401_v33, 0.0 }
 0x692   : > { %2092 = vadd.xlane.f32.xlu1 %v2091_v36  ;;  %v1899_v36 = vpop.f32.mrb[12].mxu0 }
 0x71d   : > { %v2090_v14 = vpop.xlane.xlu0 %2089 }
 0x71e   : > { %5402 = vrcp.f32 %v2090_v14  ;;  %v1900_v14 = vadd.f32 %v1899_v36, %v6268_v51 }
 0x71f   : > { %v2093_v31 = vpop.xlane.xlu1 %2092 }
 0x720   : > { %5404 = vrcp.f32 %v2093_v31  ;;  %v1901_v31 = vpop.f32.mrb[13].mxu0 }
 0x728   : > { %v5403_v34 = vpop.eup %5402 }
 0x729   : > { %v2096_v58 = vmul.f32 %v5403_v34, %v5399_v3  ;;  %v6422_v3 = vld [vmem:[%s5974_s20 + $0x60] ss:$8 sps:$4 sm:$0xff]   ;;  %v6439_v34 = vadd.f32 %v1901_v31, %v6271_v59 }
 0x72a   : > { %v5405_v16 = vpop.eup %5404 }
 0x72b   : > { %v2097_v0 = vmul.f32 %v5405_v16, %v5401_v33  ;;  %v6430_v33 = vld [vmem:[%s5974_s20 + $0x70] ss:$8 sps:$4 sm:$0xff]   ;;  %v1903_v16 = vpop.f32.mrb[14].mxu0 }
 0x72d   : > { %v2098_v24 = vpack.c.bf16 %v2097_v0, %v2096_v58  ;;  %v1904_v58 = vadd.f32 %v1903_v16, %v6268_v51  ;;  %v1905_v0 = vpop.f32.mrb[15].mxu0 }
 0x72f   : > { %4880 = vmatmul.mubr.msk.bf16.vlgmr.msra.gmra.mrb[20].mxu1 %vm1961_vm1, %v2098_v24  ;;  %v6443_v24 = vadd.f32 %v1905_v0, %v6271_v59  ;;  %v2421_v43 = vpack.c.bf16 %v1904_v58, %v1900_v14 }
 0x730   : > { %2348 = vmatpush1.bf16.msra.mxu1 %v6373_v23  ;;  %2379 = vmatprep.mubr.bf16.mxu1 %v7185_v46 }
 0x731   : > { %2349 = vmatprep.subr.bf16.mxu1 %v6376_v25 }
 0x734   : > { %2350 = vmatpush1.bf16.msra.mxu1 %v6381_v4 }
 0x735   : > { %2351 = vmatprep.subr.bf16.mxu1 %v6386_v7 }
 0x738   : > { %2352 = vmatpush1.bf16.msra.mxu1 %v6390_v9 }
 0x739   : > { %2353 = vmatprep.subr.bf16.mxu1 %v6394_v18 }
 0x73c   : > { %2354 = vmatpush1.bf16.msra.mxu1 %v6398_v19 }
 0x73d   : > { %2355 = vmatprep.subr.bf16.mxu1 %v6402_v26 }
 0x740   : > { %2356 = vmatpush1.bf16.msra.mxu1 %v6406_v27 }
 0x741   : > { %2357 = vmatprep.subr.bf16.mxu1 %v6410_v28 }
 0x744   : > { %2358 = vmatpush1.bf16.msra.mxu1 %v6414_v29 }
 0x745   : > { %2359 = vmatprep.subr.bf16.mxu1 %v6418_v30 }
 0x748   : > { %2360 = vmatpush1.bf16.msra.mxu1 %v6422_v3 }
 0x749   : > { %2361 = vmatprep.subr.bf16.mxu1 %v6426_v32 }
 0x74c   : > { %2362 = vmatpush1.bf16.msra.mxu1 %v6430_v33 }
 0x74f   : > { %2380 = vmatmul.mubr.bf16.vlgmr.msra.gmra.mrb[24].mxu1 %v2029_v57 }
 0x802   : > { %v2136_v37 = vpop.f32.mrb[20].mxu1 }
 0x803   : > { %v4881_v22 = vpop.f32.mrb[21].mxu1 }
 0x804   : > { %v2139_v57 = vpop.f32.mrb[22].mxu1 }
 0x805   : > { %v2143_v46 = vpack.c.bf16 %v2139_v57, %v2136_v37  ;;  %v4882_v36 = vpop.f32.mrb[23].mxu1 }
 0x807   : > { %2257 = vmatmul.mubr.bf16.vlgmr.msra.gmra.mrb[16].mxu0 %v2143_v46 }
 0x808   : > { %4884 = vmatpush3.bf16.xpose.msra.mxu0 %v2420_v20  ;;  %4885 = vmatprep.mubr.msk.bf16.mxu0 %vm5698_vm0, %v5697_v38 }
 0x809   : > { %4889 = vmatprep.subr.bf16.mxu0 %v5697_v38 }
 0x80f   : > { %4886 = vmatmul.mubr.bf16.vlgmr.msra.gmra.mrb[20].mxu0 %v2419_v52 }
 0x810   : > { %4890 = vmatpush3.bf16.msra.mxu0 %v2421_v43  ;;  %4891 = vmatprep.mubr.msk.bf16.mxu0 %vm5698_vm0, %v5697_v38 }
 0x811   : > { %4895 = vmatprep.subr.bf16.mxu0 %v5697_v38 }
 0x822   : > { %v2381_v51 = vpop.f32.mrb[24].mxu1 }
 0x823   : > { %v2383_v59 = vpop.f32.mrb[25].mxu1 }
 0x824   : > { %v2385_v46 = vpop.f32.mrb[26].mxu1 }
 0x825   : > { %v2387_v11 = vpop.f32.mrb[27].mxu1 }
 0x8da   : > { %v2258_v15 = vpop.f32.mrb[16].mxu0 }
 0x8db   : > { %v6459_v20 = vadd.f32 %v2381_v51, %v2258_v15  ;;  %v2260_v14 = vpop.f32.mrb[17].mxu0 }
 0x8dc   : > { %v6461_v31 = vadd.f32 %v2383_v59, %v2260_v14  ;;  %v2262_v16 = vpop.f32.mrb[18].mxu0 }
 0x8dd   : > { %v6463_v58 = vadd.f32 %v2385_v46, %v2262_v16  ;;  %v2264_v35 = vpop.f32.mrb[19].mxu0 }
 0x8de   : > { %v6465_v43 = vadd.f32 %v2387_v11, %v2264_v35 }
 0x8e2   : > { %v2456_v52 = vpop.f32.mrb[20].mxu0 }
 0x8e3   : > { %v2457_v0 = vadd.f32 %v4671_v48, %v2456_v52  ;;  %v4887_v37 = vpop.f32.mrb[21].mxu0 }
 0x8e4   : > { %v2459_v22 = vpop.f32.mrb[22].mxu0 }
 0x8e5   : > { %v2460_v57 = vadd.f32 %v4671_v48, %v2459_v22  ;;  %v4888_v36 = vpop.f32.mrb[23].mxu0  ;;  %v2463_v51 = vsel %vm1961_vm1, %v2457_v0, -inf }
 0x8e6   : > { %2464 = vmax.xlane.f32.xlu0 %v2463_v51 }
 0x8e7   : > { %v2466_v59 = vsel %vm1961_vm1, %v2460_v57, -inf }
 0x8e8   : > { %2467 = vmax.xlane.f32.xlu1 %v2466_v59 }
 0x973   : > { %v2465_v46 = vpop.xlane.xlu0 %2464 }
 0x974   : > { %v2469_v15 = vsub.f32 %v2457_v0, %v2465_v46 }
 0x975   : > { %v2468_v11 = vpop.xlane.xlu1 %2467 }
 0x976   : > { %v2471_v14 = vmul.f32 1.442695, %v2469_v15  ;;  %v2470_v16 = vsub.f32 %v2460_v57, %v2468_v11 }
 0x978   : > { %5406 = vpow2.f32 %v2471_v14  ;;  %v2473_v35 = vmul.f32 1.442695, %v2470_v16 }
 0x97a   : > { %5408 = vpow2.f32 %v2473_v35 }
 0x982   : > { %v5407_v41 = vpop.eup %5406 }
 0x983   : > { %v2475_v52 = vsel %vm1961_vm1, %v5407_v41, 0.0 }
 0x984   : > { %v5409_v37 = vpop.eup %5408  ;;  %2476 = vadd.xlane.f32.xlu0 %v2475_v52 }
 0x985   : > { %v2478_v22 = vsel %vm1961_vm1, %v5409_v37, 0.0 }
 0x986   : > { %2479 = vadd.xlane.f32.xlu1 %v2478_v22 }
 0xa11   : > { %v2477_v36 = vpop.xlane.xlu0 %2476 }
 0xa12   : > { %5410 = vrcp.f32 %v2477_v36 }
 0xa13   : > { %v2480_v51 = vpop.xlane.xlu1 %2479 }
 0xa14   : > { %5412 = vrcp.f32 %v2480_v51  ;;  %v1235_v51 = vld [vmem:[%s7222_s4] sm:$0x3]  ;;  %s7231_s4 = sld [smem:[#allocation28_spill]] (!%p4802_p7) }
 0xa1c   : > { %v5411_v59 = vpop.eup %5410 }
 0xa1d   : > { %v2483_v46 = vmul.f32 %v5411_v59, %v5407_v41  ;;  %v7221_v41 = vpack.c.bf16 %v6443_v24, %v6439_v34 }
 0xa1e   : > { %v5413_v0 = vpop.eup %5412 }
 0xa1f   : > { %v2484_v15 = vmul.f32 %v5413_v0, %v5409_v37  ;;  %v6507_v0 = vrot.slane %v1235_v51, %v6156_v45 }
 0xa21   : > { %v2485_v57 = vpack.c.bf16 %v2484_v15, %v2483_v46  ;;  %v2402_v15 = vadd.f32 %v6507_v0, %v6461_v31  ;;  %v5473_v31 = vld [vmem:[#allocation2 + $0x18] sm:$0xff] }
 0xa23   : > { %4892 = vmatmul.mubr.msk.bf16.vlgmr.msra.gmra.mrb[24].mxu0 %vm1961_vm1, %v2485_v57 }
 0xa24   : > { %4896 = vmatpush3.bf16.xpose.msra.mxu0 %v2534_v21  ;;  %4897 = vmatprep.mubr.msk.bf16.mxu0 %vm5698_vm0, %v5697_v38 }
 0xa25   : > { %4901 = vmatprep.subr.bf16.mxu0 %v5697_v38 }
 0xa2b   : > { %4898 = vmatmul.mubr.bf16.vlgmr.msra.gmra.mrb[28].mxu0 %v2533_v53 }
 0xa2c   : > { %4902 = vmatpush3.bf16.msra.mxu0 %v7221_v41  ;;  %4903 = vmatprep.mubr.msk.bf16.mxu0 %vm5698_vm0, %v5697_v38  ;;  %v2404_v41 = vadd.f32 %v6507_v0, %v6465_v43 }
 0xa2d   : > { %2645 = vmatprep.subr.bf16.mxu0 %v6311_v55 }
 0xaf6   : > { %v6490_v13 = vpop.f32.mrb[24].mxu0 }
 0xaf7   : > { %v4893_v17 = vpop.f32.mrb[25].mxu0 }
 0xaf8   : > { %v6492_v21 = vpop.f32.mrb[26].mxu0 }
 0xaf9   : > { %v2530_v11 = vpack.c.bf16 %v6492_v21, %v6490_v13  ;;  %v4894_v14 = vpop.f32.mrb[27].mxu0  ;;  %v5234_v13 = vld [vmem:[%s6004_s12 + $0xc0] ss:$16 sps:$4 sm:$0xff]   ;;  %v5237_v21 = vld [vmem:[%s6004_s12 + $0xc8] ss:$16 sps:$4 sm:$0xff]  }
 0xafa   : > { %v5470_v14 = vld [vmem:[#allocation2] sm:$0xff] }
 0xafe   : > { %v2570_v47 = vpop.f32.mrb[28].mxu0 }
 0xaff   : > { %v2571_v50 = vadd.f32 %v4671_v48, %v2570_v47  ;;  %v4899_v53 = vpop.f32.mrb[29].mxu0 }
 0xb00   : > { %v2573_v34 = vpop.f32.mrb[30].mxu0 }
 0xb01   : > { %v2574_v24 = vadd.f32 %v4671_v48, %v2573_v34  ;;  %v4900_v16 = vpop.f32.mrb[31].mxu0  ;;  %v2577_v38 = vsel %vm1961_vm1, %v2571_v50, -inf  ;;  %v6504_v48 = vrot.slane %v1235_v51, %v6153_v44 }
 0xb02   : > { %2578 = vmax.xlane.f32.xlu0 %v2577_v38  ;;  %v6524_v38 = vadd.f32 %v5473_v31, %v2404_v41  ;;  %v5243_v41 = vld [vmem:[%s6004_s12 + $0xe8] ss:$16 sps:$4 sm:$0xff]  }
 0xb03   : > { %v2580_v55 = vsel %vm1961_vm1, %v2574_v24, -inf  ;;  %v2401_v46 = vadd.f32 %v6504_v48, %v6459_v20  ;;  %v2403_v57 = vadd.f32 %v6504_v48, %v6463_v58  ;;  %v5472_v20 = vld [vmem:[#allocation2 + $0x10] sm:$0xff] }
 0xb04   : > { %2581 = vmax.xlane.f32.xlu1 %v2580_v55 }
 0xb05   : > { %v6517_v47 = vadd.f32 %v5470_v14, %v2401_v46  ;;  %v6522_v16 = vadd.f32 %v5472_v20, %v2403_v57  ;;  %v7223_v46 = vmov 0   ;;  %v5240_v57 = vld [vmem:[%s6004_s12 + $0xe0] ss:$16 sps:$4 sm:$0xff]   ;;  %v5251_v14 = vld [vmem:[%s6004_s12 + $0x10c] ss:$16 sps:$4 sm:$0xff]  }
 0xb07   : > { %v2760_v55 = vadd.f32 %v6524_v38, %v6522_v16 }
 0xb8f   : > { %v2579_v35 = vpop.xlane.xlu0 %2578 }
 0xb90   : > { %v2583_v52 = vsub.f32 %v2571_v50, %v2579_v35  ;;  %v5471_v50 = vld [vmem:[#allocation2 + $0x8] sm:$0xff] }
 0xb91   : > { %v2582_v37 = vpop.xlane.xlu1 %2581  ;;  %v6519_v53 = vadd.f32 %v5471_v50, %v2402_v15  ;;  %v5245_v15 = vld [vmem:[%s6004_s12 + $0xec] ss:$16 sps:$4 sm:$0xff]   ;;  %v5246_v50 = vld [vmem:[%s6004_s12 + $0x100] ss:$16 sps:$4 sm:$0xff]  }
 0xb92   : > { %v2585_v22 = vmul.f32 1.442695, %v2583_v52  ;;  %v2584_v36 = vsub.f32 %v2574_v24, %v2582_v37 }
 0xb93   : > { %v2757_v43 = vadd.f32 %v6519_v53, %v6517_v47 }
 0xb94   : > { %5414 = vpow2.f32 %v2585_v22  ;;  %v2587_v59 = vmul.f32 1.442695, %v2584_v36 }
 0xb96   : > { %5416 = vpow2.f32 %v2587_v59 }
 0xb9e   : > { %v5415_v17 = vpop.eup %5414 }
 0xb9f   : > { %v2589_v34 = vsel %vm1961_vm1, %v5415_v17, 0.0 }
 0xba0   : > { %v5417_v24 = vpop.eup %5416  ;;  %2590 = vadd.xlane.f32.xlu0 %v2589_v34  ;;  %v5249_v34 = vld [vmem:[%s6004_s12 + $0x108] ss:$16 sps:$4 sm:$0xff]  }
 0xba1   : > { %v2592_v58 = vsel %vm1961_vm1, %v5417_v24, 0.0 }
 0xba2   : > { %2593 = vadd.xlane.f32.xlu1 %v2592_v58 }
 0xba4   : > { %2758 = vadd.xlane.f32.xlu0 %v2757_v43 }
 0xba6   : > { %2761 = vadd.xlane.f32.xlu1 %v2760_v55 }
 0xc2d   : > { %v2591_v35 = vpop.xlane.xlu0 %2590 }
 0xc2e   : > { %5418 = vrcp.f32 %v2591_v35 }
 0xc2f   : > { %v2594_v52 = vpop.xlane.xlu1 %2593 }
 0xc30   : > { %5420 = vrcp.f32 %v2594_v52 }
 0xc33   : > { %v2762_v20 = vpop.xlane.xlu1 %2761 }
 0xc34   : > { %v2771_v58 = vmul.f32 0.00390625, %v2762_v20 }
 0xc38   : > { %v5419_v37 = vpop.eup %5418 }
 0xc39   : > { %v2597_v36 = vmul.f32 %v5419_v37, %v5415_v17  ;;  %v5248_v17 = vld [vmem:[%s6004_s12 + $0x104] ss:$16 sps:$4 sm:$0xff]  }
 0xc3a   : > { %v5421_v22 = vpop.eup %5420 }
 0xc3b   : > { %v2598_v51 = vmul.f32 %v5421_v22, %v5417_v24  ;;  %v2759_v24 = vpop.xlane.xlu0 %2758 }
 0xc3c   : > { %v2770_v31 = vmul.f32 0.00390625, %v2759_v24 }
 0xc3d   : > { %v2599_v59 = vpack.c.bf16 %v2598_v51, %v2597_v36  ;;  %v5474_v51 = vld [vmem:[#allocation2 + $0x20] sm:$0xff] }
 0xc3e   : > { %v6606_v52 = vsub.f32 %v6517_v47, %v2770_v31  ;;  %v6609_v37 = vsub.f32 %v6519_v53, %v2770_v31  ;;  %v5475_v47 = vld [vmem:[#allocation2 + $0x28] sm:$0xff] }
 0xc3f   : > { %4904 = vmatmul.mubr.msk.bf16.vlgmr.msra.gmra.mrb[32].mxu0 %vm1961_vm1, %v2599_v59 }
 0xc40   : > { %2646 = vmatpush1.bf16.msra.mxu0 %v6308_v54  ;;  %2677 = vmatprep.mubr.bf16.mxu0 %v7223_v46 }
 0xc41   : > { %2647 = vmatprep.subr.bf16.mxu0 %v6314_v56 }
 0xc44   : > { %2648 = vmatpush1.bf16.msra.mxu0 %v6319_v49 }
 0xc45   : > { %2649 = vmatprep.subr.bf16.mxu0 %v6323_v60 }
 0xc48   : > { %2650 = vmatpush1.bf16.msra.mxu0 %v6327_v61 }
 0xc49   : > { %2651 = vmatprep.subr.bf16.mxu0 %v6331_v62  ;;  %v5200_v62 = vld [vmem:[%s6004_s12 + $0x4] ss:$16 sps:$4 sm:$0xff]  }
 0xc4a   : > { %3205 = vmatprep.subr.bf16.mxu1 %v5200_v62  ;;  %v5477_v62 = vld [vmem:[#allocation2 + $0x38] sm:$0xff] }
 0xc4c   : > { %2652 = vmatpush1.bf16.msra.mxu0 %v6335_v63  ;;  %v5201_v63 = vld [vmem:[%s6004_s12 + $0x8] ss:$16 sps:$4 sm:$0xff]  }
 0xc4d   : > { %2653 = vmatprep.subr.bf16.mxu0 %v6339_v1  ;;  %v5203_v1 = vld [vmem:[%s6004_s12 + $0xc] ss:$16 sps:$4 sm:$0xff]  }
 0xc50   : > { %2654 = vmatpush1.bf16.msra.mxu0 %v6343_v2  ;;  %v5206_v2 = vld [vmem:[%s6004_s12 + $0x24] ss:$16 sps:$4 sm:$0xff]  }
 0xc51   : > { %2655 = vmatprep.subr.bf16.mxu0 %v6347_v5  ;;  %v5209_v5 = vld [vmem:[%s6004_s12 + $0x2c] ss:$16 sps:$4 sm:$0xff]  }
 0xc54   : > { %2656 = vmatpush1.bf16.msra.mxu0 %v6351_v6  ;;  %v5204_v6 = vld [vmem:[%s6004_s12 + $0x20] ss:$16 sps:$4 sm:$0xff]  }
 0xc55   : > { %2657 = vmatprep.subr.bf16.mxu0 %v6355_v8  ;;  %v5207_v8 = vld [vmem:[%s6004_s12 + $0x28] ss:$16 sps:$4 sm:$0xff]  }
 0xc58   : > { %2658 = vmatpush1.bf16.msra.mxu0 %v6359_v10  ;;  %v5212_v10 = vld [vmem:[%s6004_s12 + $0x44] ss:$16 sps:$4 sm:$0xff]  }
 0xc59   : > { %2659 = vmatprep.subr.bf16.mxu0 %v6363_v42  ;;  %v5215_v42 = vld [vmem:[%s6004_s12 + $0x4c] ss:$16 sps:$4 sm:$0xff]  }
 0xc5c   : > { %2660 = vmatpush1.bf16.msra.mxu0 %v6367_v12  ;;  %v5210_v12 = vld [vmem:[%s6004_s12 + $0x40] ss:$16 sps:$4 sm:$0xff]  }
 0xc5d   : > { %2688 = vmatprep.subr.bf16.mxu0 %v6303_v39  ;;  %v5198_v39 = vld [vmem:[%s6004_s12] ss:$16 sps:$4 sm:$0xff]  }
 0xc5e   : > { %3206 = vmatpush1.bf16.msra.mxu1 %v5198_v39 }
 0xc5f   : > { %3207 = vmatprep.subr.bf16.mxu1 %v5206_v2 }
 0xc62   : > { %3208 = vmatpush1.bf16.msra.mxu1 %v5204_v6 }
 0xc63   : > { %3209 = vmatprep.subr.bf16.mxu1 %v5212_v10  ;;  %v5257_v10 = vld [vmem:[%s6004_s12 + $0x12c] ss:$16 sps:$4 sm:$0xff]  }
 0xc66   : > { %3210 = vmatpush1.bf16.msra.mxu1 %v5210_v12  ;;  %v5255_v12 = vld [vmem:[%s6004_s12 + $0x128] ss:$16 sps:$4 sm:$0xff]  }
 0xd12   : > { %v2637_v54 = vpop.f32.mrb[32].mxu0 }
 0xd13   : > { %v4905_v56 = vpop.f32.mrb[33].mxu0 }
 0xd14   : > { %v2640_v49 = vpop.f32.mrb[34].mxu0  ;;  %v6616_v56 = vsub.f32 %v6522_v16, %v2771_v58 }
 0xd15   : > { %v2644_v60 = vpack.c.bf16 %v2640_v49, %v2637_v54  ;;  %v4906_v61 = vpop.f32.mrb[35].mxu0  ;;  %v6619_v49 = vsub.f32 %v6524_v38, %v2771_v58  ;;  %v2782_v38 = vmul.f32 %v6606_v52, %v6606_v52 }
 0xd16   : > { %v5476_v61 = vld [vmem:[#allocation2 + $0x30] sm:$0xff] }
 0xd17   : > { %2678 = vmatmul.mubr.bf16.vlgmr.msra.gmra.mrb[36].mxu0 %v2644_v60  ;;  %v2785_v2 = vmul.f32 %v6619_v49, %v6619_v49 }
 0xd18   : > { %2689 = vmatpush1.bf16.msra.mxu0 %v6373_v23  ;;  %2720 = vmatprep.mubr.bf16.mxu0 %v7223_v46  ;;  %v5213_v23 = vld [vmem:[%s6004_s12 + $0x48] ss:$16 sps:$4 sm:$0xff]  }
 0xd19   : > { %2690 = vmatprep.subr.bf16.mxu0 %v6376_v25  ;;  %v5218_v25 = vld [vmem:[%s6004_s12 + $0x64] ss:$16 sps:$4 sm:$0xff]  }
 0xd1a   : > { %3211 = vmatprep.subr.bf16.mxu1 %v5218_v25  ;;  %v5263_v25 = vld [vmem:[%s6004_s12 + $0x14c] ss:$16 sps:$4 sm:$0xff]  }
 0xd1c   : > { %2691 = vmatpush1.bf16.msra.mxu0 %v6381_v4  ;;  %v5221_v4 = vld [vmem:[%s6004_s12 + $0x6c] ss:$16 sps:$4 sm:$0xff]  }
 0xd1d   : > { %2692 = vmatprep.subr.bf16.mxu0 %v6386_v7  ;;  %v5216_v7 = vld [vmem:[%s6004_s12 + $0x60] ss:$16 sps:$4 sm:$0xff]  }
 0xd1e   : > { %3212 = vmatpush1.bf16.msra.mxu1 %v5216_v7  ;;  %v5261_v7 = vld [vmem:[%s6004_s12 + $0x148] ss:$16 sps:$4 sm:$0xff]  }
 0xd20   : > { %2693 = vmatpush1.bf16.msra.mxu0 %v6390_v9  ;;  %v5219_v9 = vld [vmem:[%s6004_s12 + $0x68] ss:$16 sps:$4 sm:$0xff]  }
 0xd21   : > { %2694 = vmatprep.subr.bf16.mxu0 %v6394_v18  ;;  %v5224_v18 = vld [vmem:[%s6004_s12 + $0x84] ss:$16 sps:$4 sm:$0xff]  }
 0xd22   : > { %3213 = vmatprep.subr.bf16.mxu1 %v5224_v18  ;;  %v5269_v18 = vld [vmem:[%s6004_s12 + $0x16c] ss:$16 sps:$4 sm:$0xff]  }
 0xd24   : > { %2695 = vmatpush1.bf16.msra.mxu0 %v6398_v19  ;;  %v5227_v19 = vld [vmem:[%s6004_s12 + $0x8c] ss:$16 sps:$4 sm:$0xff]  }
 0xd25   : > { %2696 = vmatprep.subr.bf16.mxu0 %v6402_v26  ;;  %v5222_v26 = vld [vmem:[%s6004_s12 + $0x80] ss:$16 sps:$4 sm:$0xff]  }
 0xd26   : > { %3214 = vmatpush1.bf16.msra.mxu1 %v5222_v26  ;;  %v5267_v26 = vld [vmem:[%s6004_s12 + $0x168] ss:$16 sps:$4 sm:$0xff]  }
 0xd28   : > { %2697 = vmatpush1.bf16.msra.mxu0 %v6406_v27  ;;  %v5225_v27 = vld [vmem:[%s6004_s12 + $0x88] ss:$16 sps:$4 sm:$0xff]  }
 0xd29   : > { %2698 = vmatprep.subr.bf16.mxu0 %v6410_v28  ;;  %v5230_v28 = vld [vmem:[%s6004_s12 + $0xa4] ss:$16 sps:$4 sm:$0xff]  }
 0xd2a   : > { %3215 = vmatprep.subr.bf16.mxu1 %v5230_v28  ;;  %v5275_v28 = vld [vmem:[%s6004_s12 + $0x18c] ss:$16 sps:$4 sm:$0xff]  }
 0xd2c   : > { %2699 = vmatpush1.bf16.msra.mxu0 %v6414_v29  ;;  %v5233_v29 = vld [vmem:[%s6004_s12 + $0xac] ss:$16 sps:$4 sm:$0xff]  }
 0xd2d   : > { %2700 = vmatprep.subr.bf16.mxu0 %v6418_v30  ;;  %v5228_v30 = vld [vmem:[%s6004_s12 + $0xa0] ss:$16 sps:$4 sm:$0xff]  }
 0xd2e   : > { %3216 = vmatpush1.bf16.msra.mxu1 %v5228_v30  ;;  %v5273_v30 = vld [vmem:[%s6004_s12 + $0x188] ss:$16 sps:$4 sm:$0xff]  }
 0xd30   : > { %2701 = vmatpush1.bf16.msra.mxu0 %v6422_v3  ;;  %v5231_v3 = vld [vmem:[%s6004_s12 + $0xa8] ss:$16 sps:$4 sm:$0xff]  }
 0xd31   : > { %2702 = vmatprep.subr.bf16.mxu0 %v6426_v32  ;;  %v5236_v32 = vld [vmem:[%s6004_s12 + $0xc4] ss:$16 sps:$4 sm:$0xff]  }
 0xd32   : > { %3217 = vmatprep.subr.bf16.mxu1 %v5236_v32  ;;  %v5281_v32 = vld [vmem:[%s6004_s12 + $0x1ac] ss:$16 sps:$4 sm:$0xff]  }
 0xd33   : > { %3218 = vmatpush1.bf16.msra.mxu1 %v5234_v13  ;;  %v5279_v13 = vld [vmem:[%s6004_s12 + $0x1a8] ss:$16 sps:$4 sm:$0xff]  }
 0xd34   : > { %2703 = vmatpush1.bf16.msra.mxu0 %v6430_v33  ;;  %v5239_v33 = vld [vmem:[%s6004_s12 + $0xcc] ss:$16 sps:$4 sm:$0xff]  }
 0xd35   : > { %3258 = vmatprep.subr.bf16.mxu0 %v5203_v1  ;;  %v2784_v1 = vmul.f32 %v6616_v56, %v6616_v56 }
 0xd37   : > { %2721 = vmatmul.mubr.bf16.vlgmr.msra.gmra.mrb[36].mxu0 %v2530_v11  ;;  %v5242_v11 = vld [vmem:[%s6004_s12 + $0xe4] ss:$16 sps:$4 sm:$0xff]   ;;  %v2793_v6 = vadd.f32 %v2785_v2, %v2784_v1 }
 0xd38   : > { %3259 = vmatpush1.bf16.msra.mxu0 %v5201_v63  ;;  %3219 = vmatprep.subr.bf16.mxu1 %v5242_v11  ;;  %v2783_v63 = vmul.f32 %v6609_v37, %v6609_v37  ;;  %v5284_v11 = vld [vmem:[%s6004_s12 + $0x1c4] ss:$16 sps:$4 sm:$0xff]  }
 0xd39   : > { %3260 = vmatprep.subr.bf16.mxu0 %v5209_v5  ;;  %3220 = vmatpush1.bf16.msra.mxu1 %v5240_v57  ;;  %v5287_v57 = vld [vmem:[%s6004_s12 + $0x1cc] ss:$16 sps:$4 sm:$0xff]  }
 0xd3a   : > { %3221 = vmatprep.subr.bf16.mxu1 %v5248_v17  ;;  %v2790_v5 = vadd.f32 %v2783_v63, %v2782_v38  ;;  %v5293_v17 = vld [vmem:[%s6004_s12 + $0x1ec] ss:$16 sps:$4 sm:$0xff]  }
 0xd3c   : > { %3261 = vmatpush1.bf16.msra.mxu0 %v5207_v8  ;;  %v5254_v8 = vld [vmem:[%s6004_s12 + $0x124] ss:$16 sps:$4 sm:$0xff]  }
 0xd3d   : > { %3262 = vmatprep.subr.bf16.mxu0 %v5215_v42  ;;  %3222 = vmatpush1.bf16.msra.mxu1 %v5246_v50  ;;  %v5252_v42 = vld [vmem:[%s6004_s12 + $0x120] ss:$16 sps:$4 sm:$0xff]   ;;  %v5291_v50 = vld [vmem:[%s6004_s12 + $0x1e8] ss:$16 sps:$4 sm:$0xff]  }
 0xd3e   : > { %3223 = vmatprep.subr.bf16.mxu1 %v5254_v8 }
 0xd40   : > { %3263 = vmatpush1.bf16.msra.mxu0 %v5213_v23  ;;  %v5260_v23 = vld [vmem:[%s6004_s12 + $0x144] ss:$16 sps:$4 sm:$0xff]  }
 0xd41   : > { %3264 = vmatprep.subr.bf16.mxu0 %v5221_v4  ;;  %3224 = vmatpush1.bf16.msra.mxu1 %v5252_v42  ;;  %v5258_v4 = vld [vmem:[%s6004_s12 + $0x140] ss:$16 sps:$4 sm:$0xff]  }
 0xd42   : > { %3225 = vmatprep.subr.bf16.mxu1 %v5260_v23 }
 0xd44   : > { %3265 = vmatpush1.bf16.msra.mxu0 %v5219_v9  ;;  %v5266_v9 = vld [vmem:[%s6004_s12 + $0x164] ss:$16 sps:$4 sm:$0xff]  }
 0xd45   : > { %3266 = vmatprep.subr.bf16.mxu0 %v5227_v19  ;;  %3226 = vmatpush1.bf16.msra.mxu1 %v5258_v4  ;;  %v5264_v19 = vld [vmem:[%s6004_s12 + $0x160] ss:$16 sps:$4 sm:$0xff]  }
 0xd46   : > { %3227 = vmatprep.subr.bf16.mxu1 %v5266_v9 }
 0xd48   : > { %3267 = vmatpush1.bf16.msra.mxu0 %v5225_v27  ;;  %v5272_v27 = vld [vmem:[%s6004_s12 + $0x184] ss:$16 sps:$4 sm:$0xff]  }
 0xd49   : > { %3268 = vmatprep.subr.bf16.mxu0 %v5233_v29  ;;  %3228 = vmatpush1.bf16.msra.mxu1 %v5264_v19  ;;  %v5270_v29 = vld [vmem:[%s6004_s12 + $0x180] ss:$16 sps:$4 sm:$0xff]   ;;  %v5296_v19 = vld [vmem:[%s6023_s22 + $0x4] ss:$8 sps:$4 sm:$0xff]  }
 0xd4a   : > { %3229 = vmatprep.subr.bf16.mxu1 %v5272_v27  ;;  %v5297_v27 = vld [vmem:[%s6023_s22 + $0x10] ss:$8 sps:$4 sm:$0xff]  }
 0xd4c   : > { %3269 = vmatpush1.bf16.msra.mxu0 %v5231_v3  ;;  %v5278_v3 = vld [vmem:[%s6004_s12 + $0x1a4] ss:$16 sps:$4 sm:$0xff]  }
 0xd4d   : > { %3270 = vmatprep.subr.bf16.mxu0 %v5239_v33  ;;  %3230 = vmatpush1.bf16.msra.mxu1 %v5270_v29  ;;  %v5276_v33 = vld [vmem:[%s6004_s12 + $0x1a0] ss:$16 sps:$4 sm:$0xff]  }
 0xd4e   : > { %3231 = vmatprep.subr.bf16.mxu1 %v5278_v3  ;;  %v5300_v29 = vld [vmem:[%s6023_s22 + $0x20] ss:$8 sps:$4 sm:$0xff]   ;;  %v5303_v3 = vld [vmem:[%s6023_s22 + $0x30] ss:$8 sps:$4 sm:$0xff]  }
 0xd50   : > { %3271 = vmatpush1.bf16.msra.mxu0 %v5237_v21  ;;  %v5282_v21 = vld [vmem:[%s6004_s12 + $0x1c0] ss:$16 sps:$4 sm:$0xff]  }
 0xd51   : > { %3272 = vmatprep.subr.bf16.mxu0 %v5245_v15  ;;  %3232 = vmatpush1.bf16.msra.mxu1 %v5276_v33  ;;  %v5285_v15 = vld [vmem:[%s6004_s12 + $0x1c8] ss:$16 sps:$4 sm:$0xff]  }
 0xd52   : > { %3233 = vmatprep.subr.bf16.mxu1 %v5284_v11  ;;  %v5306_v33 = vld [vmem:[%s6023_s22 + $0x40] ss:$8 sps:$4 sm:$0xff]   ;;  %v5314_v11 = vld [vmem:[%s6023_s22 + $0x64] ss:$8 sps:$4 sm:$0xff]  }
 0xd54   : > { %3273 = vmatpush1.bf16.msra.mxu0 %v5243_v41  ;;  %v5290_v41 = vld [vmem:[%s6004_s12 + $0x1e4] ss:$16 sps:$4 sm:$0xff]  }
 0xd55   : > { %3274 = vmatprep.subr.bf16.mxu0 %v5251_v14  ;;  %3234 = vmatpush1.bf16.msra.mxu1 %v5282_v21  ;;  %v5288_v14 = vld [vmem:[%s6004_s12 + $0x1e0] ss:$16 sps:$4 sm:$0xff]  }
 0xd56   : > { %3235 = vmatprep.subr.bf16.mxu1 %v5290_v41  ;;  %v5309_v21 = vld [vmem:[%s6023_s22 + $0x50] ss:$8 sps:$4 sm:$0xff]  }
 0xd57   : > { %v5315_v41 = vld [vmem:[%s6023_s22 + $0x70] ss:$8 sps:$4 sm:$0xff]  }
 0xd58   : > { %3275 = vmatpush1.bf16.msra.mxu0 %v5249_v34 }
 0xd59   : > { %3276 = vmatprep.subr.bf16.mxu0 %v5257_v10  ;;  %3236 = vmatpush1.bf16.msra.mxu1 %v5288_v14  ;;  %v5318_v14 = vld [vmem:[%s6023_s22 + $0x80] ss:$8 sps:$4 sm:$0xff]  }
 0xd5a   : > { %3794 = vmatprep.subr.bf16.mxu1 %v5296_v19  ;;  %v7226_v19 = vsub.s32 2, %v6145_v40 }
 0xd5c   : > { %3277 = vmatpush1.bf16.msra.mxu0 %v5255_v12 }
 0xd5d   : > { %3278 = vmatprep.subr.bf16.mxu0 %v5263_v25 }
 0xd60   : > { %3279 = vmatpush1.bf16.msra.mxu0 %v5261_v7 }
 0xd61   : > { %3280 = vmatprep.subr.bf16.mxu0 %v5269_v18  ;;  %v5294_v18 = vld [vmem:[%s6023_s22] ss:$8 sps:$4 sm:$0xff]  }
 0xd64   : > { %3281 = vmatpush1.bf16.msra.mxu0 %v5267_v26  ;;  %v5299_v26 = vld [vmem:[%s6023_s22 + $0x14] ss:$8 sps:$4 sm:$0xff]  }
 0xd65   : > { %3282 = vmatprep.subr.bf16.mxu0 %v5275_v28  ;;  %v5302_v28 = vld [vmem:[%s6023_s22 + $0x24] ss:$8 sps:$4 sm:$0xff]  }
 0xd68   : > { %3283 = vmatpush1.bf16.msra.mxu0 %v5273_v30  ;;  %v5305_v30 = vld [vmem:[%s6023_s22 + $0x34] ss:$8 sps:$4 sm:$0xff]  }
 0xd69   : > { %3284 = vmatprep.subr.bf16.mxu0 %v5281_v32  ;;  %v5308_v32 = vld [vmem:[%s6023_s22 + $0x44] ss:$8 sps:$4 sm:$0xff]  }
 0xd6c   : > { %3285 = vmatpush1.bf16.msra.mxu0 %v5279_v13  ;;  %v5311_v13 = vld [vmem:[%s6023_s22 + $0x54] ss:$8 sps:$4 sm:$0xff]  }
 0xd6d   : > { %3286 = vmatprep.subr.bf16.mxu0 %v5287_v57  ;;  %v5317_v57 = vld [vmem:[%s6023_s22 + $0x74] ss:$8 sps:$4 sm:$0xff]  }
 0xd70   : > { %3287 = vmatpush1.bf16.msra.mxu0 %v5285_v15  ;;  %v5312_v15 = vld [vmem:[%s6023_s22 + $0x60] ss:$8 sps:$4 sm:$0xff]  }
 0xd71   : > { %3288 = vmatprep.subr.bf16.mxu0 %v5293_v17  ;;  %v5320_v17 = vld [vmem:[%s6023_s22 + $0x84] ss:$8 sps:$4 sm:$0xff]  }
 0xd74   : > { %3289 = vmatpush1.bf16.msra.mxu0 %v5291_v50  ;;  %v5323_v50 = vld [vmem:[%s6023_s22 + $0x94] ss:$8 sps:$4 sm:$0xff]  }
 0xe0a   : > { %v2722_v43 = vpop.f32.mrb[36].mxu0 }
 0xe0b   : > { %v2731_v55 = vadd.f32 %v2722_v43, %v6504_v48  ;;  %v2724_v35 = vpop.f32.mrb[37].mxu0 }
 0xe0c   : > { %v2732_v22 = vadd.f32 %v2724_v35, %v6507_v0  ;;  %v2726_v36 = vpop.f32.mrb[38].mxu0 }
 0xe0d   : > { %v6612_v59 = vadd.f32 %v5474_v51, %v2731_v55  ;;  %v2733_v46 = vadd.f32 %v2726_v36, %v6504_v48  ;;  %v2728_v54 = vpop.f32.mrb[39].mxu0 }
 0xe0e   : > { %v6621_v60 = vadd.f32 %v5475_v47, %v2732_v22  ;;  %v2734_v53 = vadd.f32 %v2728_v54, %v6507_v0 }
 0xe0f   : > { %v6624_v39 = vadd.f32 %v5476_v61, %v2733_v46 }
 0xe10   : > { %v6626_v48 = vadd.f32 %v5477_v62, %v2734_v53  ;;  %v2763_v16 = vadd.f32 %v6621_v60, %v6612_v59 }
 0xe12   : > { %2764 = vadd.xlane.f32.xlu0 %v2763_v16  ;;  %v2766_v0 = vadd.f32 %v6626_v48, %v6624_v39  ;;  %v2756_v16 = vld [vmem:[%s7225_s26] sm:$0x3] }
 0xe13   : > { %v6710_v8 = vrot.slane %v2756_v16, %v6156_v45 }
 0xe14   : > { %2767 = vadd.xlane.f32.xlu1 %v2766_v0 }
 0xe16   : > { %2791 = vadd.xlane.f32.xlu0 %v2790_v5 }
 0xe18   : > { %2794 = vadd.xlane.f32.xlu1 %v2793_v6  ;;  %v6707_v6 = vrot.slane %v2756_v16, %v6153_v44 }
 0xe9f   : > { %v2765_v34 = vpop.xlane.xlu0 %2764 }
 0xea0   : > { %v2772_v24 = vmul.f32 0.00390625, %v2765_v34  ;;  %v5321_v34 = vld [vmem:[%s6023_s22 + $0x90] ss:$8 sps:$4 sm:$0xff]  }
 0xea1   : > { %v2768_v20 = vpop.xlane.xlu1 %2767 }
 0xea2   : > { %v6669_v31 = vsub.f32 %v6612_v59, %v2772_v24  ;;  %v6672_v58 = vsub.f32 %v6621_v60, %v2772_v24  ;;  %v2773_v43 = vmul.f32 0.00390625, %v2768_v20  ;;  %v5326_v24 = vld [vmem:[%s6023_s22 + $0xa4] ss:$8 sps:$4 sm:$0xff]   ;;  %v5324_v20 = vld [vmem:[%s6023_s22 + $0xa0] ss:$8 sps:$4 sm:$0xff]  }
 0xea3   : > { %v2792_v55 = vpop.xlane.xlu0 %2791 }
 0xea4   : > { %v6675_v35 = vsub.f32 %v6624_v39, %v2773_v43  ;;  %v6678_v22 = vsub.f32 %v6626_v48, %v2773_v43  ;;  %v2802_v36 = vmul.f32 0.00390625, %v2792_v55  ;;  %v2786_v51 = vmul.f32 %v6669_v31, %v6669_v31  ;;  %v2755_v48 = vld [vmem:[%s7224_s24] sm:$0x3]  ;;  %v5329_v43 = vld [vmem:[%s6023_s22 + $0xb4] ss:$8 sps:$4 sm:$0xff]  }
 0xea5   : > { %v2795_v46 = vpop.xlane.xlu1 %2794  ;;  %v2787_v59 = vmul.f32 %v6672_v58, %v6672_v58  ;;  %v6699_v38 = vrot.slane %v2755_v48, %v6153_v44  ;;  %v6702_v63 = vrot.slane %v2755_v48, %v6156_v45  ;;  %v5327_v55 = vld [vmem:[%s6023_s22 + $0xb0] ss:$8 sps:$4 sm:$0xff]  }
 0xea6   : > { %v2806_v54 = vadd.f32 1e-05, %v2802_v36  ;;  %v2803_v47 = vmul.f32 0.00390625, %v2795_v46  ;;  %v2788_v60 = vmul.f32 %v6675_v35, %v6675_v35  ;;  %v2789_v53 = vmul.f32 %v6678_v22, %v6678_v22  ;;  %v5332_v36 = vld [vmem:[%s6023_s22 + $0xc4] ss:$8 sps:$4 sm:$0xff]  }
 0xea7   : > { %v2796_v61 = vadd.f32 %v2787_v59, %v2786_v51  ;;  %v5330_v51 = vld [vmem:[%s6023_s22 + $0xc0] ss:$8 sps:$4 sm:$0xff]   ;;  %v5335_v46 = vld [vmem:[%s6023_s22 + $0xd4] ss:$8 sps:$4 sm:$0xff]   ;;  %v5333_v59 = vld [vmem:[%s6023_s22 + $0xd0] ss:$8 sps:$4 sm:$0xff]  }
 0xea8   : > { %5422 = vrsqrt.f32 %v2806_v54  ;;  %v2807_v39 = vadd.f32 1e-05, %v2803_v47  ;;  %v2799_v62 = vadd.f32 %v2789_v53, %v2788_v60  ;;  %v5338_v54 = vld [vmem:[%s6023_s22 + $0xe4] ss:$8 sps:$4 sm:$0xff]   ;;  %v5336_v47 = vld [vmem:[%s6023_s22 + $0xe0] ss:$8 sps:$4 sm:$0xff]  }
 0xea9   : > { %2797 = vadd.xlane.f32.xlu0 %v2796_v61  ;;  %v5341_v60 = vld [vmem:[%s6023_s22 + $0xf4] ss:$8 sps:$4 sm:$0xff]   ;;  %v5339_v53 = vld [vmem:[%s6023_s22 + $0xf0] ss:$8 sps:$4 sm:$0xff]  }
 0xeaa   : > { %5424 = vrsqrt.f32 %v2807_v39  ;;  %2800 = vadd.xlane.f32.xlu1 %v2799_v62  ;;  %v5344_v39 = vld [vmem:[%s6023_s22 + $0x104] ss:$8 sps:$4 sm:$0xff]  }
 0xeb2   : > { %v5423_v0 = vpop.eup %5422 }
 0xeb3   : > { %v2814_v1 = vmul.f32 %v5423_v0, %v6606_v52  ;;  %v2815_v2 = vmul.f32 %v5423_v0, %v6609_v37 }
 0xeb4   : > { %v5425_v5 = vpop.eup %5424 }
 0xeb5   : > { %v2816_v10 = vmul.f32 %v5425_v5, %v6616_v56  ;;  %v2817_v42 = vmul.f32 %v5425_v5, %v6619_v49  ;;  %v2834_v12 = vmul.f32 %v6702_v63, %v2815_v2  ;;  %v2833_v52 = vmul.f32 %v6699_v38, %v2814_v1 }
 0xeb7   : > { %v2836_v37 = vmul.f32 %v6702_v63, %v2817_v42  ;;  %v2835_v23 = vmul.f32 %v6699_v38, %v2816_v10  ;;  %v6719_v25 = vadd.f32 %v6710_v8, %v2834_v12  ;;  %v6725_v56 = vadd.f32 %v6707_v6, %v2833_v52 }
 0xeb9   : > { %v6722_v4 = vadd.f32 %v6710_v8, %v2836_v37  ;;  %v6728_v49 = vadd.f32 %v6707_v6, %v2835_v23 }
 0xebb   : > { %v2861_v7 = vpack.c.bf16 %v6722_v4, %v6719_v25  ;;  %v2860_v9 = vpack.c.bf16 %v6728_v49, %v6725_v56 }
 0xebd   : > { %3237 = vmatprep.mubr.bf16.mxu1 %v2861_v7  ;;  %3290 = vmatprep.mubr.bf16.mxu0 %v2861_v7 }
 0xebe   : > { %3238 = vmatmul.mubr.bf16.vlgmr.msra.gmra.mrb[28].mxu1 %v2860_v9  ;;  %3291 = vmatmul.mubr.bf16.vlgmr.msra.gmra.mrb[40].mxu0 %v2860_v9 }
 0xebf   : > { %3795 = vmatpush1.bf16.msra.mxu1 %v5294_v18 }
 0xec0   : > { %3796 = vmatprep.subr.bf16.mxu1 %v5299_v26 }
 0xec3   : > { %3797 = vmatpush1.bf16.msra.mxu1 %v5297_v27  ;;  %v7227_v27 = vsub.s32 3, %v6145_v40 }
 0xec4   : > { %3798 = vmatprep.subr.bf16.mxu1 %v5302_v28 }
 0xec7   : > { %3799 = vmatpush1.bf16.msra.mxu1 %v5300_v29 }
 0xec8   : > { %3800 = vmatprep.subr.bf16.mxu1 %v5305_v30 }
 0xecb   : > { %3801 = vmatpush1.bf16.msra.mxu1 %v5303_v3 }
 0xecc   : > { %3802 = vmatprep.subr.bf16.mxu1 %v5308_v32 }
 0xecf   : > { %3803 = vmatpush1.bf16.msra.mxu1 %v5306_v33 }
 0xed0   : > { %3804 = vmatprep.subr.bf16.mxu1 %v5311_v13 }
 0xed3   : > { %3805 = vmatpush1.bf16.msra.mxu1 %v5309_v21 }
 0xed4   : > { %3806 = vmatprep.subr.bf16.mxu1 %v5314_v11 }
 0xed7   : > { %3807 = vmatpush1.bf16.msra.mxu1 %v5312_v15 }
 0xed8   : > { %3808 = vmatprep.subr.bf16.mxu1 %v5317_v57 }
 0xedb   : > { %3809 = vmatpush1.bf16.msra.mxu1 %v5315_v41 }
 0xedc   : > { %3810 = vmatprep.subr.bf16.mxu1 %v5320_v17 }
 0xedf   : > { %3811 = vmatpush1.bf16.msra.mxu1 %v5318_v14 }
 0xee0   : > { %3812 = vmatprep.subr.bf16.mxu1 %v5323_v50 }
 0xee3   : > { %3813 = vmatpush1.bf16.msra.mxu1 %v5321_v34 }
 0xee4   : > { %3814 = vmatprep.subr.bf16.mxu1 %v5326_v24 }
 0xee7   : > { %3815 = vmatpush1.bf16.msra.mxu1 %v5324_v20 }
 0xee8   : > { %3816 = vmatprep.subr.bf16.mxu1 %v5329_v43 }
 0xeeb   : > { %3817 = vmatpush1.bf16.msra.mxu1 %v5327_v55 }
 0xeec   : > { %3818 = vmatprep.subr.bf16.mxu1 %v5332_v36 }
 0xeef   : > { %3819 = vmatpush1.bf16.msra.mxu1 %v5330_v51 }
 0xef0   : > { %3820 = vmatprep.subr.bf16.mxu1 %v5335_v46 }
 0xef3   : > { %3821 = vmatpush1.bf16.msra.mxu1 %v5333_v59 }
 0xef4   : > { %3822 = vmatprep.subr.bf16.mxu1 %v5338_v54 }
 0xef7   : > { %3823 = vmatpush1.bf16.msra.mxu1 %v5336_v47 }
 0xef8   : > { %3824 = vmatprep.subr.bf16.mxu1 %v5341_v60 }
 0xefb   : > { %3825 = vmatpush1.bf16.msra.mxu1 %v5339_v53 }
 0xefc   : > { %3847 = vmatprep.subr.bf16.mxu1 %v5344_v39 }
 0xf36   : > { %v2798_v61 = vpop.xlane.xlu0 %2797 }
 0xf37   : > { %v2804_v62 = vmul.f32 0.00390625, %v2798_v61  ;;  %v2801_v48 = vpop.xlane.xlu1 %2800 }
 0xf38   : > { %v2805_v16 = vmul.f32 0.00390625, %v2801_v48 }
 0xf39   : > { %v2808_v0 = vadd.f32 1e-05, %v2804_v62 }
 0xf3a   : > { %v2809_v1 = vadd.f32 1e-05, %v2805_v16 }
 0xf3b   : > { %5426 = vrsqrt.f32 %v2808_v0 }
 0xf3c   : > { %5428 = vrsqrt.f32 %v2809_v1 }
 0xf45   : > { %v5427_v2 = vpop.eup %5426 }
 0xf46   : > { %v5429_v5 = vpop.eup %5428  ;;  %v2819_v10 = vmul.f32 %v5427_v2, %v6672_v58  ;;  %v2818_v42 = vmul.f32 %v5427_v2, %v6669_v31 }
 0xf47   : > { %v2821_v12 = vmul.f32 %v5429_v5, %v6678_v22  ;;  %v2820_v52 = vmul.f32 %v5429_v5, %v6675_v35 }
 0xf48   : > { %v2838_v37 = vmul.f32 %v6702_v63, %v2819_v10  ;;  %v2837_v23 = vmul.f32 %v6699_v38, %v2818_v42 }
 0xf49   : > { %v2840_v7 = vmul.f32 %v6702_v63, %v2821_v12  ;;  %v2839_v9 = vmul.f32 %v6699_v38, %v2820_v52  ;;  %v1236_v38 = vld [vmem:[%s6009_s25] sm:$0xf] }
 0xf4a   : > { %v6776_v18 = vadd.f32 %v6710_v8, %v2838_v37  ;;  %v6782_v31 = vadd.f32 %v6707_v6, %v2837_v23  ;;  %v6797_v26 = vrot.slane %v1236_v38, %v7226_v19  ;;  %v6804_v28 = vrot.slane %v1236_v38, %v7227_v27 }
 0xf4b   : > { %v6779_v58 = vadd.f32 %v6710_v8, %v2840_v7  ;;  %v6785_v22 = vadd.f32 %v6707_v6, %v2839_v9  ;;  %v6793_v8 = vrot.slane %v1236_v38, %v6153_v44  ;;  %v6800_v6 = vrot.slane %v1236_v38, %v6156_v45 }
 0xf4d   : > { %v2863_v35 = vpack.c.bf16 %v6779_v58, %v6776_v18  ;;  %v2862_v63 = vpack.c.bf16 %v6785_v22, %v6782_v31 }
 0xf4f   : > { %3247 = vmatprep.mubr.bf16.mxu1 %v2863_v35  ;;  %3300 = vmatprep.mubr.bf16.mxu0 %v2863_v35 }
 0xf50   : > { %3248 = vmatmul.mubr.bf16.gmra.mrb[32].mxu1 %v2862_v63  ;;  %3301 = vmatmul.mubr.bf16.gmra.mrb[44].mxu0 %v2862_v63 }
 0xf91   : > { %v3239_v29 = vpop.f32.mrb[28].mxu1  ;;  %v3292_v30 = vpop.f32.mrb[40].mxu0 }
 0xf92   : > { %v6807_v3 = vadd.f32 %v3239_v29, %v6793_v8  ;;  %v6810_v32 = vadd.f32 %v3292_v30, %v6797_v26  ;;  %v3241_v33 = vpop.f32.mrb[29].mxu1  ;;  %v3294_v13 = vpop.f32.mrb[41].mxu0 }
 0xf93   : > { %v6813_v21 = vadd.f32 %v3241_v33, %v6800_v6  ;;  %v6816_v11 = vadd.f32 %v3294_v13, %v6804_v28  ;;  %v3243_v15 = vpop.f32.mrb[30].mxu1  ;;  %v3296_v40 = vpop.f32.mrb[42].mxu0 }
 0xf94   : > { %v3327_v57 = vmul.f32 0.044715, %v6807_v3  ;;  %v3329_v41 = vmul.f32 0.044715, %v6810_v32  ;;  %v3244_v50 = vadd.f32 %v3243_v15, %v6793_v8  ;;  %v3297_v34 = vadd.f32 %v3296_v40, %v6797_v26  ;;  %v3245_v24 = vpop.f32.mrb[31].mxu1  ;;  %v3298_v20 = vpop.f32.mrb[43].mxu0 }
 0xf95   : > { %v3328_v17 = vmul.f32 0.044715, %v6813_v21  ;;  %v3330_v14 = vmul.f32 0.044715, %v6816_v11  ;;  %v3246_v36 = vadd.f32 %v3245_v24, %v6800_v6  ;;  %v6828_v51 = vadd.f32 %v3298_v20, %v6804_v28 }
 0xf96   : > { %v3343_v43 = vmul.f32 %v3327_v57, %v6807_v3  ;;  %v3345_v55 = vmul.f32 %v3329_v41, %v6810_v32  ;;  %v3331_v54 = vmul.f32 0.044715, %v3244_v50  ;;  %v3333_v53 = vmul.f32 0.044715, %v3297_v34 }
 0xf97   : > { %v3344_v46 = vmul.f32 %v3328_v17, %v6813_v21  ;;  %v3346_v59 = vmul.f32 %v3330_v14, %v6816_v11  ;;  %v3332_v62 = vmul.f32 0.044715, %v3246_v36  ;;  %v3334_v1 = vmul.f32 0.044715, %v6828_v51 }
 0xf98   : > { %v3359_v47 = vmul.f32 %v3343_v43, %v6807_v3  ;;  %v3361_v60 = vmul.f32 %v3345_v55, %v6810_v32  ;;  %v3347_v39 = vmul.f32 %v3331_v54, %v3244_v50  ;;  %v3349_v0 = vmul.f32 %v3333_v53, %v3297_v34 }
 0xf99   : > { %v3360_v61 = vmul.f32 %v3344_v46, %v6813_v21  ;;  %v3362_v2 = vmul.f32 %v3346_v59, %v6816_v11  ;;  %v3348_v10 = vmul.f32 %v3332_v62, %v3246_v36  ;;  %v3350_v37 = vmul.f32 %v3334_v1, %v6828_v51 }
 0xf9a   : > { %v3375_v48 = vadd.f32 %v3359_v47, %v6807_v3  ;;  %v3377_v16 = vadd.f32 %v3361_v60, %v6810_v32  ;;  %v3363_v5 = vmul.f32 %v3347_v39, %v3244_v50  ;;  %v3365_v52 = vmul.f32 %v3349_v0, %v3297_v34 }
 0xf9b   : > { %v3364_v7 = vmul.f32 %v3348_v10, %v3246_v36  ;;  %v3376_v9 = vadd.f32 %v3360_v61, %v6813_v21  ;;  %v3366_v63 = vmul.f32 %v3350_v37, %v6828_v51  ;;  %v3378_v30 = vadd.f32 %v3362_v2, %v6816_v11  ;;  %v5342_v37 = vld [vmem:[%s6023_s22 + $0x100] ss:$8 sps:$4 sm:$0xff]  }
 0xf9c   : > { %v3391_v42 = vmul.f32 0.7978846, %v3375_v48  ;;  %v3393_v12 = vmul.f32 0.7978846, %v3377_v16  ;;  %v3379_v23 = vadd.f32 %v3363_v5, %v3244_v50  ;;  %v3381_v35 = vadd.f32 %v3365_v52, %v3297_v34 }
 0xf9d   : > { %v3380_v19 = vadd.f32 %v3364_v7, %v3246_v36  ;;  %v3392_v27 = vmul.f32 0.7978846, %v3376_v9  ;;  %v3382_v33 = vadd.f32 %v3366_v63, %v6828_v51  ;;  %v3394_v15 = vmul.f32 0.7978846, %v3378_v30  ;;  %v5348_v63 = vld [vmem:[%s6023_s22 + $0x120] ss:$8 sps:$4 sm:$0xff]  }
 0xf9e   : > { %5430 = vtanh.f32 %v3391_v42  ;;  %v3395_v38 = vmul.f32 0.7978846, %v3379_v23  ;;  %v3397_v29 = vmul.f32 0.7978846, %v3381_v35  ;;  %v3311_v20 = vmul.f32 0.5, %v6807_v3 }
 0xf9f   : > { %5432 = vtanh.f32 %v3393_v12  ;;  %v3396_v13 = vmul.f32 0.7978846, %v3380_v19  ;;  %v3398_v40 = vmul.f32 0.7978846, %v3382_v33  ;;  %v3315_v43 = vmul.f32 0.5, %v3244_v50 }
 0xfa0   : > { %5434 = vtanh.f32 %v3395_v38  ;;  %v3313_v54 = vmul.f32 0.5, %v6810_v32  ;;  %v3317_v47 = vmul.f32 0.5, %v3297_v34  ;;  %v3312_v16 = vmul.f32 0.5, %v6813_v21  ;;  %v5347_v23 = vld [vmem:[%s6023_s22 + $0x114] ss:$8 sps:$4 sm:$0xff]  }
 0xfa1   : > { %5436 = vtanh.f32 %v3397_v29  ;;  %v3316_v0 = vmul.f32 0.5, %v3246_v36  ;;  %v3314_v10 = vmul.f32 0.5, %v6816_v11  ;;  %v3318_v42 = vmul.f32 0.5, %v6828_v51  ;;  %v5345_v51 = vld [vmem:[%s6023_s22 + $0x110] ss:$8 sps:$4 sm:$0xff]  }
 0xfa2   : > { %5438 = vtanh.f32 %v3392_v27  ;;  %v5350_v35 = vld [vmem:[%s6023_s22 + $0x124] ss:$8 sps:$4 sm:$0xff]   ;;  %v5353_v38 = vld [vmem:[%s6023_s22 + $0x134] ss:$8 sps:$4 sm:$0xff]   ;;  %v5351_v19 = vld [vmem:[%s6023_s22 + $0x130] ss:$8 sps:$4 sm:$0xff]  }
 0xfa3   : > { %5440 = vtanh.f32 %v3396_v13  ;;  %v5356_v27 = vld [vmem:[%s6023_s22 + $0x144] ss:$8 sps:$4 sm:$0xff]   ;;  %v5354_v29 = vld [vmem:[%s6023_s22 + $0x140] ss:$8 sps:$4 sm:$0xff]   ;;  %v5359_v30 = vld [vmem:[%s6023_s22 + $0x154] ss:$8 sps:$4 sm:$0xff]  }
 0xfa4   : > { %5442 = vtanh.f32 %v3394_v15  ;;  %v5357_v33 = vld [vmem:[%s6023_s22 + $0x150] ss:$8 sps:$4 sm:$0xff]   ;;  %v5362_v13 = vld [vmem:[%s6023_s22 + $0x164] ss:$8 sps:$4 sm:$0xff]   ;;  %v5360_v15 = vld [vmem:[%s6023_s22 + $0x160] ss:$8 sps:$4 sm:$0xff]  }
 0xfa5   : > { %5444 = vtanh.f32 %v3398_v40  ;;  %v5365_v40 = vld [vmem:[%s6023_s22 + $0x174] ss:$8 sps:$4 sm:$0xff]  }
 0xfa8   : > { %v5431_v57 = vpop.eup %5430 }
 0xfa9   : > { %v5433_v41 = vpop.eup %5432  ;;  %v3423_v17 = vadd.f32 1.0, %v5431_v57  ;;  %v5363_v57 = vld [vmem:[%s6023_s22 + $0x170] ss:$8 sps:$4 sm:$0xff]  }
 0xfaa   : > { %v5435_v14 = vpop.eup %5434  ;;  %v3425_v46 = vadd.f32 1.0, %v5433_v41  ;;  %v5368_v41 = vld [vmem:[%s6023_s22 + $0x184] ss:$8 sps:$4 sm:$0xff]  }
 0xfab   : > { %v5437_v24 = vpop.eup %5436  ;;  %v3427_v55 = vadd.f32 1.0, %v5435_v14  ;;  %v3439_v61 = vmul.f32 %v3423_v17, %v3311_v20  ;;  %v5366_v17 = vld [vmem:[%s6023_s22 + $0x180] ss:$8 sps:$4 sm:$0xff]   ;;  %v5371_v14 = vld [vmem:[%s6023_s22 + $0x194] ss:$8 sps:$4 sm:$0xff]  }
 0xfac   : > { %v5439_v59 = vpop.eup %5438  ;;  %v3429_v62 = vadd.f32 1.0, %v5437_v24  ;;  %v6847_v2 = vmul.f32 %v3425_v46, %v3313_v54  ;;  %v5369_v24 = vld [vmem:[%s6023_s22 + $0x190] ss:$8 sps:$4 sm:$0xff]   ;;  %v5374_v20 = vld [vmem:[%s6023_s22 + $0x1a4] ss:$8 sps:$4 sm:$0xff]  }
 0xfad   : > { %v5441_v60 = vpop.eup %5440  ;;  %v3424_v53 = vadd.f32 1.0, %v5439_v59  ;;  %v3443_v39 = vmul.f32 %v3427_v55, %v3315_v43  ;;  %v5372_v43 = vld [vmem:[%s6023_s22 + $0x1a0] ss:$8 sps:$4 sm:$0xff]   ;;  %v5377_v55 = vld [vmem:[%s6023_s22 + $0x1b4] ss:$8 sps:$4 sm:$0xff]  }
 0xfae   : > { %v5443_v48 = vpop.eup %5442  ;;  %v3428_v1 = vadd.f32 1.0, %v5441_v60  ;;  %v6849_v5 = vmul.f32 %v3429_v62, %v3317_v47  ;;  %v5375_v46 = vld [vmem:[%s6023_s22 + $0x1b0] ss:$8 sps:$4 sm:$0xff]   ;;  %v5380_v59 = vld [vmem:[%s6023_s22 + $0x1c4] ss:$8 sps:$4 sm:$0xff]  }
 0xfaf   : > { %v5445_v3 = vpop.eup %5444  ;;  %v3455_v50 = vpack.c.bf16 %v3443_v39, %v3439_v61  ;;  %v3440_v32 = vmul.f32 %v3424_v53, %v3312_v16  ;;  %v3426_v12 = vadd.f32 1.0, %v5443_v48  ;;  %v5378_v54 = vld [vmem:[%s6023_s22 + $0x1c0] ss:$8 sps:$4 sm:$0xff]   ;;  %v5383_v47 = vld [vmem:[%s6023_s22 + $0x1d4] ss:$8 sps:$4 sm:$0xff]  }
 0xfb0   : > { %v3444_v34 = vmul.f32 %v3428_v1, %v3316_v0  ;;  %v3430_v21 = vadd.f32 1.0, %v5445_v3  ;;  %v3457_v36 = vpack.c.bf16 %v6849_v5, %v6847_v2  ;;  %v5381_v60 = vld [vmem:[%s6023_s22 + $0x1d0] ss:$8 sps:$4 sm:$0xff]   ;;  %v5386_v53 = vld [vmem:[%s6023_s22 + $0x1e4] ss:$8 sps:$4 sm:$0xff]  }
 0xfb1   : > { %v6857_v7 = vmul.f32 %v3426_v12, %v3314_v10  ;;  %v5384_v61 = vld [vmem:[%s6023_s22 + $0x1e0] ss:$8 sps:$4 sm:$0xff]   ;;  %v5389_v39 = vld [vmem:[%s6023_s22 + $0x1f4] ss:$8 sps:$4 sm:$0xff]   ;;  %v5387_v62 = vld [vmem:[%s6023_s22 + $0x1f0] ss:$8 sps:$4 sm:$0xff]  }
 0xfb2   : > { %v3456_v52 = vpack.c.bf16 %v3444_v34, %v3440_v32  ;;  %v6859_v9 = vmul.f32 %v3430_v21, %v3318_v42 }
 0xfb4   : > { %3826 = vmatprep.mubr.bf16.mxu1 %v3456_v52  ;;  %v3458_v11 = vpack.c.bf16 %v6859_v9, %v6857_v7 }
 0xfb5   : > { %3827 = vmatmul.mubr.bf16.vlgmr.msra.gmra.mrb[36].mxu1 %v3455_v50 }
 0xfb6   : > { %3848 = vmatpush1.bf16.msra.mxu1 %v5342_v37 }
 0xfb7   : > { %3849 = vmatprep.subr.bf16.mxu1 %v5347_v23 }
 0xfba   : > { %3850 = vmatpush1.bf16.msra.mxu1 %v5345_v51 }
 0xfbb   : > { %3851 = vmatprep.subr.bf16.mxu1 %v5350_v35 }
 0xfbe   : > { %3852 = vmatpush1.bf16.msra.mxu1 %v5348_v63 }
 0xfbf   : > { %3853 = vmatprep.subr.bf16.mxu1 %v5353_v38 }
 0xfc2   : > { %3854 = vmatpush1.bf16.msra.mxu1 %v5351_v19 }
 0xfc3   : > { %3855 = vmatprep.subr.bf16.mxu1 %v5356_v27 }
 0xfc6   : > { %3856 = vmatpush1.bf16.msra.mxu1 %v5354_v29 }
 0xfc7   : > { %3857 = vmatprep.subr.bf16.mxu1 %v5359_v30 }
 0xfca   : > { %3858 = vmatpush1.bf16.msra.mxu1 %v5357_v33 }
 0xfcb   : > { %3859 = vmatprep.subr.bf16.mxu1 %v5362_v13 }
 0xfce   : > { %3860 = vmatpush1.bf16.msra.mxu1 %v5360_v15 }
 0xfcf   : > { %3861 = vmatprep.subr.bf16.mxu1 %v5365_v40 }
 0xfd2   : > { %3862 = vmatpush1.bf16.msra.mxu1 %v5363_v57 }
 0xfd3   : > { %3863 = vmatprep.subr.bf16.mxu1 %v5368_v41 }
 0xfd6   : > { %3864 = vmatpush1.bf16.msra.mxu1 %v5366_v17 }
 0xfd7   : > { %3865 = vmatprep.subr.bf16.mxu1 %v5371_v14 }
 0xfda   : > { %3866 = vmatpush1.bf16.msra.mxu1 %v5369_v24 }
 0xfdb   : > { %3867 = vmatprep.subr.bf16.mxu1 %v5374_v20 }
 0xfde   : > { %3868 = vmatpush1.bf16.msra.mxu1 %v5372_v43 }
 0xfdf   : > { %3869 = vmatprep.subr.bf16.mxu1 %v5377_v55 }
 0xfe2   : > { %3870 = vmatpush1.bf16.msra.mxu1 %v5375_v46 }
 0xfe3   : > { %3871 = vmatprep.subr.bf16.mxu1 %v5380_v59 }
 0xfe6   : > { %3872 = vmatpush1.bf16.msra.mxu1 %v5378_v54 }
 0xfe7   : > { %3873 = vmatprep.subr.bf16.mxu1 %v5383_v47 }
 0xfea   : > { %3874 = vmatpush1.bf16.msra.mxu1 %v5381_v60 }
 0xfeb   : > { %3875 = vmatprep.subr.bf16.mxu1 %v5386_v53 }
 0xfee   : > { %3876 = vmatpush1.bf16.msra.mxu1 %v5384_v61 }
 0xfef   : > { %3877 = vmatprep.subr.bf16.mxu1 %v5389_v39 }
 0xff2   : > { %3878 = vmatpush1.bf16.msra.mxu1 %v5387_v62 }
0x1023   : > { %v3249_v48 = vpop.f32.mrb[32].mxu1  ;;  %v3302_v16 = vpop.f32.mrb[44].mxu0 }
0x1024   : > { %v6893_v0 = vadd.f32 %v3249_v48, %v6793_v8  ;;  %v6896_v1 = vadd.f32 %v3302_v16, %v6797_v26  ;;  %v3251_v3 = vpop.f32.mrb[33].mxu1  ;;  %v3304_v50 = vpop.f32.mrb[45].mxu0 }
0x1025   : > { %v6899_v32 = vadd.f32 %v3251_v3, %v6800_v6  ;;  %v6902_v34 = vadd.f32 %v3304_v50, %v6804_v28  ;;  %v3253_v10 = vpop.f32.mrb[34].mxu1  ;;  %v3306_v42 = vpop.f32.mrb[46].mxu0 }
0x1026   : > { %v3335_v12 = vmul.f32 0.044715, %v6893_v0  ;;  %v3337_v21 = vmul.f32 0.044715, %v6896_v1  ;;  %v3254_v52 = vadd.f32 %v3253_v10, %v6793_v8  ;;  %v6908_v37 = vadd.f32 %v3306_v42, %v6797_v26  ;;  %v3255_v23 = vpop.f32.mrb[35].mxu1  ;;  %v3308_v51 = vpop.f32.mrb[47].mxu0 }
0x1027   : > { %v3336_v35 = vmul.f32 0.044715, %v6899_v32  ;;  %v3338_v63 = vmul.f32 0.044715, %v6902_v34  ;;  %v3256_v38 = vadd.f32 %v3255_v23, %v6800_v6  ;;  %v6914_v19 = vadd.f32 %v3308_v51, %v6804_v28 }
0x1028   : > { %v3351_v27 = vmul.f32 %v3335_v12, %v6893_v0  ;;  %v3339_v29 = vmul.f32 0.044715, %v3254_v52  ;;  %v3341_v30 = vmul.f32 0.044715, %v6908_v37  ;;  %v3353_v40 = vmul.f32 %v3337_v21, %v6896_v1 }
0x1029   : > { %v3352_v8 = vmul.f32 %v3336_v35, %v6899_v32  ;;  %v3354_v26 = vmul.f32 %v3338_v63, %v6902_v34  ;;  %v3340_v33 = vmul.f32 0.044715, %v3256_v38  ;;  %v3342_v13 = vmul.f32 0.044715, %v6914_v19 }
0x102a   : > { %v3367_v15 = vmul.f32 %v3351_v27, %v6893_v0  ;;  %v3355_v6 = vmul.f32 %v3339_v29, %v3254_v52  ;;  %v3357_v28 = vmul.f32 %v3341_v30, %v6908_v37  ;;  %v3369_v46 = vmul.f32 %v3353_v40, %v6896_v1 }
0x102b   : > { %v3368_v57 = vmul.f32 %v3352_v8, %v6899_v32  ;;  %v3370_v41 = vmul.f32 %v3354_v26, %v6902_v34  ;;  %v3356_v17 = vmul.f32 %v3340_v33, %v3256_v38  ;;  %v3358_v14 = vmul.f32 %v3342_v13, %v6914_v19 }
0x102c   : > { %v3371_v24 = vmul.f32 %v3355_v6, %v3254_v52  ;;  %v3373_v59 = vmul.f32 %v3357_v28, %v6908_v37  ;;  %v3383_v54 = vadd.f32 %v3367_v15, %v6893_v0  ;;  %v3385_v10 = vadd.f32 %v3369_v46, %v6896_v1 }
0x102d   : > { %v3372_v20 = vmul.f32 %v3356_v17, %v3256_v38  ;;  %v3374_v43 = vmul.f32 %v3358_v14, %v6914_v19  ;;  %v3384_v55 = vadd.f32 %v3368_v57, %v6899_v32  ;;  %v3386_v61 = vadd.f32 %v3370_v41, %v6902_v34 }
0x102e   : > { %v3387_v47 = vadd.f32 %v3371_v24, %v3254_v52  ;;  %v3399_v39 = vmul.f32 0.7978846, %v3383_v54  ;;  %v3389_v42 = vadd.f32 %v3373_v59, %v6908_v37  ;;  %v3401_v12 = vmul.f32 0.7978846, %v3385_v10 }
0x102f   : > { %v3388_v60 = vadd.f32 %v3372_v20, %v3256_v38  ;;  %v3400_v53 = vmul.f32 0.7978846, %v3384_v55  ;;  %v3390_v48 = vadd.f32 %v3374_v43, %v6914_v19  ;;  %v3402_v3 = vmul.f32 0.7978846, %v3386_v61 }
0x1030   : > { %v3403_v62 = vmul.f32 0.7978846, %v3387_v47  ;;  %v3405_v21 = vmul.f32 0.7978846, %v3389_v42  ;;  %v3320_v30 = vmul.f32 0.5, %v6899_v32  ;;  %v3324_v8 = vmul.f32 0.5, %v3256_v38 }
0x1031   : > { %v3404_v16 = vmul.f32 0.7978846, %v3388_v60  ;;  %5446 = vtanh.f32 %v3400_v53  ;;  %v3406_v50 = vmul.f32 0.7978846, %v3390_v48  ;;  %v3319_v13 = vmul.f32 0.5, %v6893_v0 }
0x1032   : > { %5448 = vtanh.f32 %v3399_v39  ;;  %v3323_v15 = vmul.f32 0.5, %v3254_v52  ;;  %v3322_v41 = vmul.f32 0.5, %v6902_v34  ;;  %v3326_v43 = vmul.f32 0.5, %v6914_v19 }
0x1033   : > { %5450 = vtanh.f32 %v3404_v16  ;;  %v3321_v46 = vmul.f32 0.5, %v6896_v1  ;;  %v3325_v0 = vmul.f32 0.5, %v6908_v37  ;;  %v1237_v1 = vld [vmem:[%s831_s21] sm:$0x3] }
0x1034   : > { %5452 = vtanh.f32 %v3403_v62  ;;  %v3467_v37 = vrot.slane %v1237_v1, %v6153_v44  ;;  %v3471_v39 = vrot.slane %v1237_v1, %v6156_v45 }
0x1035   : > { %5454 = vtanh.f32 %v3402_v3 }
0x1036   : > { %5456 = vtanh.f32 %v3406_v50 }
0x1037   : > { %5458 = vtanh.f32 %v3401_v12 }
0x1038   : > { %5460 = vtanh.f32 %v3405_v21 }
0x103b   : > { %v5447_v23 = vpop.eup %5446 }
0x103c   : > { %v5449_v51 = vpop.eup %5448  ;;  %v3432_v35 = vadd.f32 1.0, %v5447_v23 }
0x103d   : > { %v5451_v63 = vpop.eup %5450  ;;  %v3431_v27 = vadd.f32 1.0, %v5449_v51 }
0x103e   : > { %v5453_v29 = vpop.eup %5452  ;;  %v3436_v26 = vadd.f32 1.0, %v5451_v63  ;;  %v3448_v28 = vmul.f32 %v3432_v35, %v3320_v30 }
0x103f   : > { %v5455_v33 = vpop.eup %5454  ;;  %v3435_v40 = vadd.f32 1.0, %v5453_v29  ;;  %v3447_v24 = vmul.f32 %v3431_v27, %v3319_v13 }
0x1040   : > { %v5457_v6 = vpop.eup %5456  ;;  %v3452_v57 = vmul.f32 %v3436_v26, %v3324_v8  ;;  %v3434_v17 = vadd.f32 1.0, %v5455_v33 }
0x1041   : > { %v5459_v14 = vpop.eup %5458  ;;  %v3451_v20 = vmul.f32 %v3435_v40, %v3323_v15  ;;  %v3438_v55 = vadd.f32 1.0, %v5457_v6 }
0x1042   : > { %v5461_v32 = vpop.eup %5460  ;;  %v3460_v38 = vpack.c.bf16 %v3452_v57, %v3448_v28  ;;  %v3433_v52 = vadd.f32 1.0, %v5459_v14  ;;  %v3450_v54 = vmul.f32 %v3434_v17, %v3322_v41 }
0x1043   : > { %v3459_v59 = vpack.c.bf16 %v3451_v20, %v3447_v24  ;;  %v3454_v47 = vmul.f32 %v3438_v55, %v3326_v43  ;;  %v3437_v60 = vadd.f32 1.0, %v5461_v32 }
0x1044   : > { %3836 = vmatprep.mubr.bf16.mxu1 %v3460_v38  ;;  %v3449_v53 = vmul.f32 %v3433_v52, %v3321_v46 }
0x1045   : > { %3837 = vmatmul.mubr.bf16.gmra.mrb[40].mxu1 %v3459_v59  ;;  %v3462_v34 = vpack.c.bf16 %v3454_v47, %v3450_v54  ;;  %v3453_v61 = vmul.f32 %v3437_v60, %v3325_v0 }
0x1046   : > { %3879 = vmatprep.mubr.bf16.mxu1 %v3458_v11 }
0x1047   : > { %v3461_v19 = vpack.c.bf16 %v3453_v61, %v3449_v53 }
0x104d   : > { %3880 = vmatmul.mubr.bf16.vlgmr.msra.gmra.mrb[36].mxu1 %v3457_v36 }
0x104e   : > { %3889 = vmatprep.mubr.bf16.mxu1 %v3462_v34 }
0x1055   : > { %3890 = vmatmul.mubr.bf16.gmra.mrb[40].mxu1 %v3461_v19 }
0x1120   : > { %v3881_v62 = vpop.f32.mrb[36].mxu1 }
0x1121   : > { %v4911_v48 = vadd.f32 %v3881_v62, %v3467_v37  ;;  %v3883_v7 = vpop.f32.mrb[37].mxu1 }
0x1122   : > { %v4912_v9 = vadd.f32 %v3883_v7, %v3471_v39  ;;  %v3885_v11 = vpop.f32.mrb[38].mxu1 }
0x1123   : > { %v3900_v16 = vadd.f32 %v4911_v48, %v6725_v56  ;;  %v4913_v2 = vadd.f32 %v3885_v11, %v3467_v37  ;;  %v3887_v5 = vpop.f32.mrb[39].mxu1 }
0x1124   : > { %v3901_v36 = vadd.f32 %v4912_v9, %v6719_v25  ;;  %v4914_v3 = vadd.f32 %v3887_v5, %v3471_v39  ;;  %v3908_v9 = vld [vmem:[%s835_s29] sm:$0x3]  ;;  %s7229_s29 = sld [smem:[#allocation29_spill]] (!%p4802_p7) }
0x1125   : > { %v3902_v50 = vadd.f32 %v4913_v2, %v6728_v49  ;;  %v3909_v2 = vld [vmem:[%s839_s5] sm:$0x3] }
0x1126   : > { %v3903_v10 = vadd.f32 %v4914_v3, %v6722_v4  ;;  %v3910_v42 = vadd.f32 %v3901_v36, %v3900_v16  ;;  %v3982_v3 = vrot.slane %v3908_v9, %v6156_v45 }
0x1128   : > { %v3891_v12 = vpop.f32.mrb[40].mxu1  ;;  %3911 = vadd.xlane.f32.xlu0 %v3910_v42  ;;  %v3913_v21 = vadd.f32 %v3903_v10, %v3902_v50  ;;  %v4001_v42 = vrot.slane %v3909_v2, %v6156_v45 }
0x1129   : > { %v4915_v23 = vadd.f32 %v3891_v12, %v3467_v37  ;;  %v3893_v51 = vpop.f32.mrb[41].mxu1 }
0x112a   : > { %v4916_v35 = vadd.f32 %v3893_v51, %v3471_v39  ;;  %v3895_v63 = vpop.f32.mrb[42].mxu1  ;;  %3914 = vadd.xlane.f32.xlu1 %v3913_v21 }
0x112b   : > { %v3904_v56 = vadd.f32 %v4915_v23, %v6782_v31  ;;  %v4917_v27 = vadd.f32 %v3895_v63, %v3467_v37  ;;  %v3897_v29 = vpop.f32.mrb[43].mxu1 }
0x112c   : > { %v3905_v25 = vadd.f32 %v4916_v35, %v6776_v18  ;;  %v4918_v30 = vadd.f32 %v3897_v29, %v3471_v39 }
0x112d   : > { %v3906_v49 = vadd.f32 %v4917_v27, %v6785_v22 }
0x112e   : > { %v3907_v4 = vadd.f32 %v4918_v30, %v6779_v58  ;;  %v3916_v8 = vadd.f32 %v3905_v25, %v3904_v56 }
0x1130   : > { %3917 = vadd.xlane.f32.xlu0 %v3916_v8  ;;  %v3919_v26 = vadd.f32 %v3907_v4, %v3906_v49 }
0x1132   : > { %3920 = vadd.xlane.f32.xlu1 %v3919_v26 }
0x11b5   : > { %v3912_v33 = vpop.xlane.xlu0 %3911 }
0x11b6   : > { %v3922_v13 = vmul.f32 0.00390625, %v3912_v33 }
0x11b7   : > { %v3915_v15 = vpop.xlane.xlu1 %3914 }
0x11b8   : > { %v3926_v40 = vsub.f32 %v3900_v16, %v3922_v13  ;;  %v3927_v6 = vsub.f32 %v3901_v36, %v3922_v13  ;;  %v3923_v28 = vmul.f32 0.00390625, %v3915_v15  ;;  %v3978_v36 = vrot.slane %v3908_v9, %v6153_v44  ;;  %v5511_v9 = vld [vmem:[%s7230_s17 + $0xb4] ss:$8 sps:$4 sm:$0xff] (!%p4802_p7)  }
0x11ba   : > { %v3928_v31 = vsub.f32 %v3902_v50, %v3923_v28  ;;  %v3929_v57 = vsub.f32 %v3903_v10, %v3923_v28  ;;  %v3934_v41 = vmul.f32 %v3926_v40, %v3926_v40  ;;  %v3935_v17 = vmul.f32 %v3927_v6, %v3927_v6 }
0x11bb   : > { %v3997_v10 = vrot.slane %v3909_v2, %v6153_v44  ;;  %v5516_v2 = vld [vmem:[%s7230_s17 + $0xc0] ss:$8 sps:$4 sm:$0xff] (!%p4802_p7)  }
0x11bc   : > { %v3942_v18 = vadd.f32 %v3935_v17, %v3934_v41  ;;  %v3936_v14 = vmul.f32 %v3928_v31, %v3928_v31  ;;  %v3937_v24 = vmul.f32 %v3929_v57, %v3929_v57 }
0x11bd   : > { %v3918_v22 = vpop.xlane.xlu0 %3917 }
0x11be   : > { %v3924_v20 = vmul.f32 0.00390625, %v3918_v22  ;;  %3943 = vadd.xlane.f32.xlu0 %v3942_v18  ;;  %v3945_v58 = vadd.f32 %v3937_v24, %v3936_v14  ;;  %v5478_v24 = vld [vmem:[%s7230_s17 + $0x4] ss:$8 sps:$4 sm:$0xff] (!%p4802_p7)  }
0x11bf   : > { %v3921_v43 = vpop.xlane.xlu1 %3920  ;;  %4247 = vmatprep.subr.bf16.mxu0 (!%p4802_p7), %v5478_v24 }
0x11c0   : > { %v3930_v55 = vsub.f32 %v3904_v56, %v3924_v20  ;;  %v3931_v32 = vsub.f32 %v3905_v25, %v3924_v20  ;;  %v3925_v38 = vmul.f32 0.00390625, %v3921_v43  ;;  %3946 = vadd.xlane.f32.xlu1 %v3945_v58  ;;  %v5480_v20 = vld [vmem:[%s7230_s17] ss:$8 sps:$4 sm:$0xff] (!%p4802_p7)   ;;  %v5481_v58 = vld [vmem:[%s7230_s17 + $0x14] ss:$8 sps:$4 sm:$0xff] (!%p4802_p7)  }
0x11c1   : > { %4248 = vmatpush1.bf16.msra.mxu0 (!%p4802_p7), %v5480_v20 }
0x11c2   : > { %v3932_v46 = vsub.f32 %v3906_v49, %v3925_v38  ;;  %v3933_v0 = vsub.f32 %v3907_v4, %v3925_v38  ;;  %v3938_v52 = vmul.f32 %v3930_v55, %v3930_v55  ;;  %v3939_v59 = vmul.f32 %v3931_v32, %v3931_v32  ;;  %4249 = vmatprep.subr.bf16.mxu0 (!%p4802_p7), %v5481_v58  ;;  %v5484_v38 = vld [vmem:[%s7230_s17 + $0x24] ss:$8 sps:$4 sm:$0xff] (!%p4802_p7)  }
0x11c4   : > { %v3948_v54 = vadd.f32 %v3939_v59, %v3938_v52  ;;  %v3940_v47 = vmul.f32 %v3932_v46, %v3932_v46  ;;  %v3941_v60 = vmul.f32 %v3933_v0, %v3933_v0  ;;  %v5489_v52 = vld [vmem:[%s7230_s17 + $0x30] ss:$8 sps:$4 sm:$0xff] (!%p4802_p7)   ;;  %v5490_v59 = vld [vmem:[%s7230_s17 + $0x44] ss:$8 sps:$4 sm:$0xff] (!%p4802_p7)  }
0x11c6   : > { %3949 = vadd.xlane.f32.xlu0 %v3948_v54  ;;  %v3951_v34 = vadd.f32 %v3941_v60, %v3940_v47  ;;  %v5492_v54 = vld [vmem:[%s7230_s17 + $0x40] ss:$8 sps:$4 sm:$0xff] (!%p4802_p7)   ;;  %v5493_v47 = vld [vmem:[%s7230_s17 + $0x54] ss:$8 sps:$4 sm:$0xff] (!%p4802_p7)   ;;  %v5495_v60 = vld [vmem:[%s7230_s17 + $0x50] ss:$8 sps:$4 sm:$0xff] (!%p4802_p7)  }
0x11c8   : > { %3952 = vadd.xlane.f32.xlu1 %v3951_v34  ;;  %v5496_v34 = vld [vmem:[%s7230_s17 + $0x64] ss:$8 sps:$4 sm:$0xff] (!%p4802_p7)  }
0x124b   : > { %v3944_v53 = vpop.xlane.xlu0 %3943 }
0x124c   : > { %v3954_v61 = vmul.f32 0.00390625, %v3944_v53  ;;  %v5498_v53 = vld [vmem:[%s7230_s17 + $0x60] ss:$8 sps:$4 sm:$0xff] (!%p4802_p7)  }
0x124d   : > { %v3947_v19 = vpop.xlane.xlu1 %3946 }
0x124e   : > { %v3958_v1 = vadd.f32 1e-05, %v3954_v61  ;;  %v3955_v37 = vmul.f32 0.00390625, %v3947_v19  ;;  %v5499_v61 = vld [vmem:[%s7230_s17 + $0x74] ss:$8 sps:$4 sm:$0xff] (!%p4802_p7)  }
0x124f   : > { %v5501_v19 = vld [vmem:[%s7230_s17 + $0x70] ss:$8 sps:$4 sm:$0xff] (!%p4802_p7)  }
0x1250   : > { %5462 = vrsqrt.f32 %v3958_v1  ;;  %v3959_v39 = vadd.f32 1e-05, %v3955_v37  ;;  %v5502_v1 = vld [vmem:[%s7230_s17 + $0x84] ss:$8 sps:$4 sm:$0xff] (!%p4802_p7)   ;;  %v5504_v37 = vld [vmem:[%s7230_s17 + $0x80] ss:$8 sps:$4 sm:$0xff] (!%p4802_p7)  }
0x1252   : > { %5464 = vrsqrt.f32 %v3959_v39  ;;  %v5505_v39 = vld [vmem:[%s7230_s17 + $0x94] ss:$8 sps:$4 sm:$0xff] (!%p4802_p7)  }
0x1253   : > { %v3950_v62 = vpop.xlane.xlu0 %3949 }
0x1254   : > { %v3956_v48 = vmul.f32 0.00390625, %v3950_v62  ;;  %v5507_v62 = vld [vmem:[%s7230_s17 + $0x90] ss:$8 sps:$4 sm:$0xff] (!%p4802_p7)  }
0x1255   : > { %v3953_v7 = vpop.xlane.xlu1 %3952 }
0x1256   : > { %v3960_v11 = vadd.f32 1e-05, %v3956_v48  ;;  %v3957_v16 = vmul.f32 0.00390625, %v3953_v7  ;;  %v5508_v48 = vld [vmem:[%s7230_s17 + $0xa4] ss:$8 sps:$4 sm:$0xff] (!%p4802_p7)  }
0x1257   : > { %v5510_v7 = vld [vmem:[%s7230_s17 + $0xa0] ss:$8 sps:$4 sm:$0xff] (!%p4802_p7)  }
0x1258   : > { %5466 = vrsqrt.f32 %v3960_v11  ;;  %v3961_v5 = vadd.f32 1e-05, %v3957_v16  ;;  %v5513_v11 = vld [vmem:[%s7230_s17 + $0xb0] ss:$8 sps:$4 sm:$0xff] (!%p4802_p7)   ;;  %v5514_v16 = vld [vmem:[%s7230_s17 + $0xc4] ss:$8 sps:$4 sm:$0xff] (!%p4802_p7)  }
0x125a   : > { %v5463_v50 = vpop.eup %5462  ;;  %5468 = vrsqrt.f32 %v3961_v5  ;;  %v5517_v5 = vld [vmem:[%s7230_s17 + $0xd4] ss:$8 sps:$4 sm:$0xff] (!%p4802_p7)  }
0x125b   : > { %v3966_v12 = vmul.f32 %v5463_v50, %v3926_v40  ;;  %v3967_v21 = vmul.f32 %v5463_v50, %v3927_v6  ;;  %v5522_v50 = vld [vmem:[%s7230_s17 + $0xe0] ss:$8 sps:$4 sm:$0xff] (!%p4802_p7)  }
0x125c   : > { %v5465_v23 = vpop.eup %5464 }
0x125d   : > { %v3985_v51 = vmul.f32 %v3978_v36, %v3966_v12  ;;  %v3986_v35 = vmul.f32 %v3982_v3, %v3967_v21  ;;  %v3968_v63 = vmul.f32 %v5465_v23, %v3928_v31  ;;  %v3969_v56 = vmul.f32 %v5465_v23, %v3929_v57  ;;  %v5525_v12 = vld [vmem:[%s7230_s17 + $0xf0] ss:$8 sps:$4 sm:$0xff] (!%p4802_p7)  }
0x125f   : > { %v6977_v27 = vadd.f32 %v3997_v10, %v3985_v51  ;;  %v4005_v29 = vadd.f32 %v4001_v42, %v3986_v35  ;;  %v3987_v25 = vmul.f32 %v3978_v36, %v3968_v63  ;;  %v3988_v30 = vmul.f32 %v3982_v3, %v3969_v56  ;;  %v4075_v51 = vld [vmem:[%s7231_s4] sm:$0x3] (!%p4802_p7) }
0x1260   : > { %v4080_v35 = vrot.slane (!%p4802_p7), %v4075_v51, %v6153_v44  ;;  %v4084_v63 = vrot.slane (!%p4802_p7), %v4075_v51, %v6156_v45 }
0x1261   : > { %4012 = vst [vmem:[#allocation2] sm:$0xff] %v6977_v27  ;;  %4013 = vst [vmem:[#allocation2 + $0x8] sm:$0xff] %v4005_v29  ;;  %v4006_v49 = vadd.f32 %v3997_v10, %v3987_v25  ;;  %v4007_v4 = vadd.f32 %v4001_v42, %v3988_v30 }
0x1262   : > { %v5467_v8 = vpop.eup %5466  ;;  %4024 = vst [vmem:[%s7229_s29] sm:$0xff] (!%p4802_p7), %v6977_v27  ;;  %4025 = vst [vmem:[%s7229_s29 + $0x8] sm:$0xff] (!%p4802_p7), %v4005_v29 }
0x1263   : > { %4014 = vst [vmem:[#allocation2 + $0x10] sm:$0xff] %v4006_v49  ;;  %4015 = vst [vmem:[#allocation2 + $0x18] sm:$0xff] %v4007_v4  ;;  %v3970_v26 = vmul.f32 %v5467_v8, %v3930_v55  ;;  %v3971_v33 = vmul.f32 %v5467_v8, %v3931_v32  ;;  %v5483_v55 = vld [vmem:[%s7230_s17 + $0x10] ss:$8 sps:$4 sm:$0xff] (!%p4802_p7)  }
0x1264   : > { %v5469_v13 = vpop.eup %5468  ;;  %4026 = vst [vmem:[%s7229_s29 + $0x10] sm:$0xff] (!%p4802_p7), %v4006_v49  ;;  %4027 = vst [vmem:[%s7229_s29 + $0x18] sm:$0xff] (!%p4802_p7), %v4007_v4  ;;  %4250 = vmatpush1.bf16.msra.mxu0 (!%p4802_p7), %v5483_v55 }
0x1265   : > { %v3989_v15 = vmul.f32 %v3978_v36, %v3970_v26  ;;  %v3990_v40 = vmul.f32 %v3982_v3, %v3971_v33  ;;  %v3972_v6 = vmul.f32 %v5469_v13, %v3932_v46  ;;  %v3973_v28 = vmul.f32 %v5469_v13, %v3933_v0  ;;  %4023 = sbr.rel (%p4802_p7) target bundleno = 4996 (0x1384), region = 112  ;;  %v5486_v46 = vld [vmem:[%s7230_s17 + $0x20] ss:$8 sps:$4 sm:$0xff] (!%p4802_p7)   ;;  %4251 = vmatprep.subr.bf16.mxu0 (!%p4802_p7), %v5484_v38  ;;  %v5487_v0 = vld [vmem:[%s7230_s17 + $0x34] ss:$8 sps:$4 sm:$0xff] (!%p4802_p7)  }
0x1267   : > { %v6980_v31 = vadd.f32 %v3997_v10, %v3989_v15  ;;  %v4009_v57 = vadd.f32 %v4001_v42, %v3990_v40  ;;  %v3991_v41 = vmul.f32 %v3978_v36, %v3972_v6  ;;  %v3992_v17 = vmul.f32 %v3982_v3, %v3973_v28  ;;  %v5519_v36 = vld [vmem:[%s7230_s17 + $0xd0] ss:$8 sps:$4 sm:$0xff] (!%p4802_p7)   ;;  %v5520_v3 = vld [vmem:[%s7230_s17 + $0xe4] ss:$8 sps:$4 sm:$0xff] (!%p4802_p7)  }
0x1268   : > { %4252 = vmatpush1.bf16.msra.mxu0 (!%p4802_p7), %v5486_v46 }
0x1269   : > { %4016 = vst [vmem:[#allocation2 + $0x20] sm:$0xff] %v6980_v31  ;;  %4017 = vst [vmem:[#allocation2 + $0x28] sm:$0xff] %v4009_v57  ;;  %v4010_v18 = vadd.f32 %v3997_v10, %v3991_v41  ;;  %v4011_v14 = vadd.f32 %v4001_v42, %v3992_v17  ;;  %v4035_v22 = vrot.slane (!%p4802_p7), %v4009_v57, 7  ;;  %4253 = vmatprep.subr.bf16.mxu0 (!%p4802_p7), %v5487_v0  ;;  %v4034_v10 = vrot.slane (!%p4802_p7), %v6980_v31, 7  ;;  %v5523_v42 = vld [vmem:[%s7230_s17 + $0xf4] ss:$8 sps:$4 sm:$0xff] (!%p4802_p7)  }
0x126a   : > { %4028 = vst [vmem:[%s7229_s29 + $0x20] sm:$0xff] (!%p4802_p7), %v6980_v31  ;;  %4029 = vst [vmem:[%s7229_s29 + $0x28] sm:$0xff] (!%p4802_p7), %v4009_v57 }
0x126b   : > { %4018 = vst [vmem:[#allocation2 + $0x30] sm:$0xff] %v4010_v18  ;;  %4019 = vst [vmem:[#allocation2 + $0x38] sm:$0xff] %v4011_v14  ;;  %v4040_v43 = vsel (!%p4802_p7), %vm4038_vm2, %v4005_v29, %v4035_v22  ;;  %v4039_v21 = vsel (!%p4802_p7), %vm4038_vm2, %v6977_v27, %v4034_v10 }
0x126c   : > { %4030 = vst [vmem:[%s7229_s29 + $0x30] sm:$0xff] %v4010_v18  ;;  %4031 = vst [vmem:[%s7229_s29 + $0x38] sm:$0xff] %v4011_v14  ;;  %v4042_v32 = vpack.c.bf16 %v4040_v43, %v4040_v43  ;;  %4254 = vmatpush1.bf16.msra.mxu0 %v5489_v52  ;;  %v4041_v23 = vpack.c.bf16 %v4039_v21, %v4039_v21 }
0x126d   : > { %4255 = vmatprep.subr.bf16.mxu0 %v5490_v59 }
0x126e   : > { %4279 = vmatprep.mubr.bf16.mxu0 %v4042_v32 }
0x1270   : > { %4256 = vmatpush1.bf16.msra.mxu0 %v5492_v54 }
0x1271   : > { %4257 = vmatprep.subr.bf16.mxu0 %v5493_v47 }
0x1274   : > { %4258 = vmatpush1.bf16.msra.mxu0 %v5495_v60 }
0x1275   : > { %4259 = vmatprep.subr.bf16.mxu0 %v5496_v34 }
0x1278   : > { %4260 = vmatpush1.bf16.msra.mxu0 %v5498_v53 }
0x1279   : > { %4261 = vmatprep.subr.bf16.mxu0 %v5499_v61 }
0x127c   : > { %4262 = vmatpush1.bf16.msra.mxu0 %v5501_v19 }
0x127d   : > { %4263 = vmatprep.subr.bf16.mxu0 %v5502_v1 }
0x1280   : > { %4264 = vmatpush1.bf16.msra.mxu0 %v5504_v37 }
0x1281   : > { %4265 = vmatprep.subr.bf16.mxu0 %v5505_v39 }
0x1284   : > { %4266 = vmatpush1.bf16.msra.mxu0 %v5507_v62 }
0x1285   : > { %4267 = vmatprep.subr.bf16.mxu0 %v5508_v48 }
0x1288   : > { %4268 = vmatpush1.bf16.msra.mxu0 %v5510_v7 }
0x1289   : > { %4269 = vmatprep.subr.bf16.mxu0 %v5511_v9 }
0x128c   : > { %4270 = vmatpush1.bf16.msra.mxu0 %v5513_v11 }
0x128d   : > { %4271 = vmatprep.subr.bf16.mxu0 %v5514_v16 }
0x1290   : > { %4272 = vmatpush1.bf16.msra.mxu0 %v5516_v2 }
0x1291   : > { %4273 = vmatprep.subr.bf16.mxu0 %v5517_v5 }
0x1294   : > { %4274 = vmatpush1.bf16.msra.mxu0 %v5519_v36 }
0x1295   : > { %4275 = vmatprep.subr.bf16.mxu0 %v5520_v3 }
0x1298   : > { %4276 = vmatpush1.bf16.msra.mxu0 %v5522_v50 }
0x1299   : > { %4277 = vmatprep.subr.bf16.mxu0 %v5523_v42 }
0x129c   : > { %4278 = vmatpush1.bf16.msra.mxu0 %v5525_v12 }
0x129f   : > { %4280 = vmatmul.mubr.bf16.vlgmr.msra.gmra.mrb[0].mxu0 %v4041_v23 }
0x1372   : > { %v4281_v56 = vpop.f32.mrb[0].mxu0 }
0x1373   : > { %v4282_v29 = vadd.f32 %v4281_v56, %v4080_v35  ;;  %v4283_v25 = vpop.f32.mrb[1].mxu0 }
0x1374   : > { %v4284_v30 = vadd.f32 %v4283_v25, %v4084_v63  ;;  %v4285_v49 = vpop.f32.mrb[2].mxu0 }
0x1375   : > { %5526 = vtanh.f32 %v4282_v29  ;;  %v4286_v4 = vpop.f32.mrb[3].mxu0 }
0x1376   : > { %5528 = vtanh.f32 %v4284_v30 }
0x137f   : > { %v5527_v27 = vpop.eup %5526 }
0x1380   : > { %v5529_v8 = vpop.eup %5528 }
0x1381   : > { %v4292_v26 = vcombine.low %v5527_v27, %v5529_v8 }
0x1383   : > { %4835 = vst.sshfl [vmem:[#allocation10] sm:$0x33 pattern:$0x76325410] %v4292_v26 }
0x1384 PF: > { %p4956_p12 = scmp.eq.s32.totalorder %s5820_s1, 1  ;;  %s5700_s12 = smov [#allocation10]  }
0x1385   : > { %s4312_s2 = sshll.u32 %s5700_s12, 4  ;;  %s4313_s2 = int_to_ptr.vmem [resolvable:$true] %s4312_s2 }
0x1386   : > { %s5620_s24 = scalar_lea.vmem %s4313_s2, 64  ;;  %p5627_p6 = scmp.lt.s32.totalorder %s4313_s2, %s4313_s2 }
0x1387   : > { %p5621_p2 = scmp.ne.s32.totalorder %s4313_s2, %s5620_s24  ;;  %p5628_p1 = scmp.lt.s32.totalorder %s5620_s24, %s5620_s24 }
0x1389   : > { %p5622_p3 = pnand %p5621_p2, %p4956_p12  ;;  %p5629_p4 = por %p5628_p1, %p5627_p6 }
0x138b   : > { %p5623_p5 = pneg %p5622_p3 }
0x138d   : > { %p5630_p11 = pnand %p5629_p4, %p5623_p5 }
0x138f   : > { %5633 = shalt.err (!%p5630_p11)
}
0x1390   : > { %s7232_s26 = sld [smem:[#allocation30_spill]] }
0x1396   : > { %s5634_s25 = scalar_lea.hbm %s7232_s26, 64 }
0x1397   : > { %p5635_p13 = scmp.ne.s32.totalorder %s7232_s26, %s5634_s25  ;;  %p5640_p8 = scmp.lt.u32.totalorder %s5634_s25, %s7232_s26 }
0x1399   : > { %p5636_p10 = pnand %p5635_p13, %p4956_p12 }
0x139b   : > { %p5637_p9 = pneg %p5636_p10 }
0x139d   : > { %p5642_p0 = pnand %p5640_p8, %p5637_p9 }
0x139f   : > { %5645 = shalt.err (!%p5642_p0)
}
0x13a0   : > { %4942 = dma.vmem_to_hbm [thread:$0]  (%p4956_p12), %s4313_s2, 64, %s7232_s26, [#allocation6]  }
0x13a1   : > { %5671 = dma.done.wait (%p4956_p12), [#allocation6], 64  }
0x13a2   : > { %5673 = vsyncadd (%p4956_p12), [#allocation6], 4294967232 }
0x13a3 PF: > { %s7233_s21 = sld [smem:[#allocation16_spill]]  ;;  %s7234_s0 = sld [smem:[#allocation14_spill]] }
0x13a4   : > { %s7235_s30 = sld [smem:[#allocation15_spill]]  ;;  %s7236_s20 = sld [smem:[#allocation17_spill]] }
0x13a9   : > { %p34_p7 = scmp.ge.s32.totalorder %s7233_s21, 4  }
0x13ab   :  { %36 = sbr.rel (!%p34_p7) target bundleno = 20 (0x14), region = 197 }
0x13b2   :  { %4328 = vsyncpa [#allocation5], 1 }
0x13b3   :  { %4330 = vsyncpa [#allocation5 + $0x1], 1 }
0x13b4   :  { %4331 = vsyncpa [#allocation8], 1 }
0x13b5   :  { %4333 = vsyncpa [#allocation8 + $0x1], 1 }
0x13b6   :  { %4334 = vsyncpa [#allocation6], 1 }
0x13b7   :  { %4336 = vsyncpa [#allocation6 + $0x1], 1 }

</bundles_post_ra>
